<compile_context>
chip_gen: v7x
topology: tpu7x:2x2x1
jax: 0.10.0
libtpu: 0.0.40
codegen_flags: <defaults>
</compile_context>

<pallas_src>
import jax
import jax.numpy as jnp
from jax import lax
from jax.experimental import pallas as pl
from jax.experimental.pallas import tpu as pltpu

# ----------------------------------------------------------------------------
# Model dimensions (synthetic small VGG-style landmark detector)
# ----------------------------------------------------------------------------
H = W = 16            # input spatial size (must be power-of-two here, W == 16)
CIN = 3               # input channels
C1 = 16               # conv block 1 channels
C2 = 32               # conv block 2 channels
HID = 64              # hidden FC width
N_LM = 8              # landmarks -> pred_vis (8), pred_lm (16)
HEAD_PAD = 128        # lane-dense fused head width (vis | lm | zero pad)

HW = H * W            # 256 rows, row index r = h*W + w
HALO1 = W + 1         # covers 3x3 tap row shifts  oy*W + ox, oy,ox in {-1,0,1}
HALO2 = 2 * W + 2     # covers block-2 tap row shifts 2*(oy*W + ox)
W_SHIFT = 4           # log2(W)
assert W == 1 << W_SHIFT


# ----------------------------------------------------------------------------
# Fused kernel: conv1 -> pool -> conv2 -> pool -> GAP -> FC -> (vis | lm)
# ----------------------------------------------------------------------------
def _vgg_landmark_kernel(x_ref, w1_ref, b1_ref, w2_ref, b2_ref,
                         wf_ref, bf_ref, wh_ref, bh_ref,
                         out_ref, y1pad, m1pad, y2pad):
    f32 = jnp.float32

    # Row-index helpers (r = h*W + w); bit ops only (no vector div/rem).
    ridx = lax.broadcasted_iota(jnp.int32, (HW, 1), 0)
    wcol = ridx & (W - 1)                       # w coordinate of each row

    # Column-validity masks per horizontal tap offset (row validity is handled
    # by the zero halos).  Block 2 lives on the stride-2 pooled lattice.
    col_ok1 = {-1: wcol >= 1, 1: wcol <= W - 2}
    col_ok2 = {-1: wcol >= 2, 1: wcol <= W - 3}

    # Zero scratch: the m1pad halos MUST be zero (they implement the zero
    # padding of conv block 2); the rest is zeroed defensively.
    y1pad[...] = jnp.zeros_like(y1pad)
    m1pad[...] = jnp.zeros_like(m1pad)
    y2pad[...] = jnp.zeros_like(y2pad)

    # ---- Block 1: conv3x3(pad=1) + bias + ReLU at full resolution (M = 256).
    acc1 = jnp.zeros((HW, C1), f32)
    for dy in range(3):
        for dx in range(3):
            off = (dy - 1) * W + (dx - 1)
            tap = x_ref[0, pl.ds(HALO1 + off, HW), :]            # (HW, CIN) f32
            m = col_ok1.get(dx - 1)
            if m is not None:
                tap = jnp.where(m, tap, 0.0)
            acc1 += jnp.dot(tap.astype(jnp.bfloat16), w1_ref[dy * 3 + dx],
                            preferred_element_type=f32)
    y1 = jnp.maximum(acc1 + b1_ref[...], 0.0)                    # (HW, C1) f32

    # ---- Block 1: 2x2 max-pool kept at full resolution (valid at even h, w).
    y1pad[pl.ds(0, HW), :] = y1
    m1 = y1
    for d in (1, W, W + 1):
        m1 = jnp.maximum(m1, y1pad[pl.ds(d, HW), :])
    m1pad[pl.ds(HALO2, HW), :] = m1                              # body; halos = 0

    # ---- Block 2: conv3x3(pad=1) + bias + ReLU on the stride-2 pooled lattice.
    acc2 = jnp.zeros((HW, C2), f32)
    for dy in range(3):
        for dx in range(3):
            off = 2 * ((dy - 1) * W + (dx - 1))
            tap = m1pad[pl.ds(HALO2 + off, HW), :]               # (HW, C1) f32
            m = col_ok2.get(dx - 1)
            if m is not None:
                tap = jnp.where(m, tap, 0.0)
            acc2 += jnp.dot(tap.astype(jnp.bfloat16), w2_ref[dy * 3 + dx],
                            preferred_element_type=f32)
    y2 = jnp.maximum(acc2 + b2_ref[...], 0.0)                    # (HW, C2) f32

    # ---- Block 2: 2x2 max-pool at full res (valid at h % 4 == 0, w % 4 == 0).
    y2pad[pl.ds(0, HW), :] = y2
    m2 = y2
    for d in (2, 2 * W, 2 * W + 2):
        m2 = jnp.maximum(m2, y2pad[pl.ds(d, HW), :])

    # ---- Global average pool over the (H//4)*(W//4) valid pooled positions.
    gap_mask = jnp.logical_and((ridx & 3) == 0, ((ridx >> W_SHIFT) & 3) == 0)
    n_valid = (H // 4) * (W // 4)
    feat = jnp.sum(jnp.where(gap_mask, m2, 0.0), axis=0, keepdims=True) * (1.0 / n_valid)

    # ---- Head: hidden FC + fused lane-dense (visibility | landmarks) head.
    h = jnp.dot(feat.astype(jnp.bfloat16), wf_ref[...],
                preferred_element_type=f32) + bf_ref[...]
    h = jnp.maximum(h, 0.0)                                      # (1, HID)
    z = jnp.dot(h.astype(jnp.bfloat16), wh_ref[...],
                preferred_element_type=f32) + bh_ref[...]        # (1, 128)
    lane = lax.broadcasted_iota(jnp.int32, z.shape, 1)
    sig = pl.reciprocal(1.0 + jnp.exp(-z), approx=True)          # EUP sigmoid
    out_ref[0] = jnp.where(lane < N_LM, sig, z)


# ----------------------------------------------------------------------------
# pallas_call wrapper (equivalent of LandmarkWrapper.forward)
# ----------------------------------------------------------------------------
def landmark_forward(params, x_nchw):
    """x (NCHW, float32) -> (pred_vis (B, 8), pred_lm (B, 16))."""
    x = jnp.transpose(x_nchw, (0, 2, 3, 1)).astype(jnp.float32)  # NCHW -> NHWC
    B = x.shape[0]

    # Row-flatten (r = h*W + w) and add a zero row-halo so every 3x3 tap becomes
    # a plain static windowed VMEM load inside the kernel (no 9x im2col in HBM).
    x_rows = x.reshape(B, HW, CIN)
    x_rows = jnp.pad(x_rows, ((0, 0), (HALO1, HALO1), (0, 0)))   # (B, 290, 3)

    b1 = params["b1"][None, :]
    b2 = params["b2"][None, :]
    bf = params["bf"][None, :]

    # Fused, lane-dense head weights: [visibility | landmarks | zero pad] -> 128.
    wh = jnp.zeros((HID, HEAD_PAD), jnp.bfloat16)
    wh = wh.at[:, :N_LM].set(params["wv"]).at[:, N_LM:3 * N_LM].set(params["wl"])
    bh = jnp.zeros((1, HEAD_PAD), jnp.float32)
    bh = bh.at[0, :N_LM].set(params["bv"]).at[0, N_LM:3 * N_LM].set(params["bl"])

    out = pl.pallas_call(
        _vgg_landmark_kernel,
        out_shape=jax.ShapeDtypeStruct((B, 1, HEAD_PAD), jnp.float32),
        grid=(B,),
        in_specs=[
            pl.BlockSpec((1, HW + 2 * HALO1, CIN), lambda i: (i, 0, 0)),
            pl.BlockSpec((9, CIN, C1), lambda i: (0, 0, 0)),
            pl.BlockSpec((1, C1), lambda i: (0, 0)),
            pl.BlockSpec((9, C1, C2), lambda i: (0, 0, 0)),
            pl.BlockSpec((1, C2), lambda i: (0, 0)),
            pl.BlockSpec((C2, HID), lambda i: (0, 0)),
            pl.BlockSpec((1, HID), lambda i: (0, 0)),
            pl.BlockSpec((HID, HEAD_PAD), lambda i: (0, 0)),
            pl.BlockSpec((1, HEAD_PAD), lambda i: (0, 0)),
        ],
        out_specs=pl.BlockSpec((1, 1, HEAD_PAD), lambda i: (i, 0, 0)),
        scratch_shapes=[
            pltpu.VMEM((HW + HALO1, C1), jnp.float32),        # conv1 out + halo
            pltpu.VMEM((HW + 2 * HALO2, C1), jnp.float32),    # pooled1, both halos
            pltpu.VMEM((HW + HALO2, C2), jnp.float32),        # conv2 out + halo
        ],
        compiler_params=pltpu.CompilerParams(
            dimension_semantics=("parallel",)),                # batch across TCs on v7x
    )(x_rows, params["w1"], b1, params["w2"], b2, params["wf"], bf, wh, bh)

    out = out.reshape(B, HEAD_PAD)
    pred_vis = out[:, :N_LM]
    pred_lm = out[:, N_LM:3 * N_LM]
    return pred_vis, pred_lm


# ----------------------------------------------------------------------------
# Synthetic parameters and a pure-JAX reference (for a value-level self-check)
# ----------------------------------------------------------------------------
def init_params(key):
    ks = jax.random.split(key, 10)

    def wgt(k, fan_in, shape):
        w = jax.random.normal(k, shape, jnp.float32) / jnp.sqrt(float(fan_in))
        return w.astype(jnp.bfloat16)

    def bias(k, shape):
        return 0.01 * jax.random.normal(k, shape, jnp.float32)

    # Conv weights stored as (tap, Cin, Cout) with tap = dy*3 + dx.
    return dict(
        w1=wgt(ks[0], 9 * CIN, (9, CIN, C1)), b1=bias(ks[1], (C1,)),
        w2=wgt(ks[2], 9 * C1, (9, C1, C2)), b2=bias(ks[3], (C2,)),
        wf=wgt(ks[4], C2, (C2, HID)), bf=bias(ks[5], (HID,)),
        wv=wgt(ks[6], HID, (HID, N_LM)), bv=bias(ks[7], (N_LM,)),
        wl=wgt(ks[8], HID, (HID, 2 * N_LM)), bl=bias(ks[9], (2 * N_LM,)),
    )


def reference_forward(params, x_nchw):
    """Pure-JAX reference with the same bf16 rounding points as the kernel."""
    r16 = lambda a: a.astype(jnp.bfloat16).astype(jnp.float32)
    x = jnp.transpose(x_nchw, (0, 2, 3, 1)).astype(jnp.float32)

    def block(inp, w, b, cin, cout):
        w4 = w.astype(jnp.float32).reshape(3, 3, cin, cout)     # (dy, dx, cin, cout)
        y = lax.conv_general_dilated(
            r16(inp), w4, window_strides=(1, 1), padding="SAME",
            dimension_numbers=("NHWC", "HWIO", "NHWC"))
        y = jnp.maximum(y + b.reshape(1, 1, 1, -1), 0.0)
        return lax.reduce_window(y, -jnp.inf, lax.max,
                                 (1, 2, 2, 1), (1, 2, 2, 1), "VALID")

    f1 = block(x, params["w1"], params["b1"], CIN, C1)           # (B, 8, 8, 16)
    f2 = block(f1, params["w2"], params["b2"], C1, C2)           # (B, 4, 4, 32)
    feat = jnp.mean(f2, axis=(1, 2))                             # (B, 32)
    h = jnp.maximum(r16(feat) @ params["wf"].astype(jnp.float32) + params["bf"], 0.0)
    hz = r16(h)
    vis = jax.nn.sigmoid(hz @ params["wv"].astype(jnp.float32) + params["bv"])
    lm = hz @ params["wl"].astype(jnp.float32) + params["bl"]
    return vis, lm


if __name__ == "__main__":
    key = jax.random.PRNGKey(0)
    pkey, xkey = jax.random.split(key)
    params = init_params(pkey)

    # Small NCHW input, matching the PyTorch module's convention.
    x = jax.random.normal(xkey, (2, CIN, H, W), jnp.float32)

    fwd = jax.jit(landmark_forward)
    pred_vis, pred_lm = fwd(params, x)
    jax.block_until_ready((pred_vis, pred_lm))

    assert pred_vis.shape == (2, N_LM), pred_vis.shape
    assert pred_lm.shape == (2, 2 * N_LM), pred_lm.shape
    assert bool(jnp.all(jnp.isfinite(pred_vis))) and bool(jnp.all(jnp.isfinite(pred_lm)))
    assert bool(jnp.all(pred_vis >= -1e-3)) and bool(jnp.all(pred_vis <= 1.0 + 1e-3))

    # Value-level check against a pure-JAX/XLA reference (loose tolerance covers
    # bf16 MXU rounding and the approximate-reciprocal sigmoid).
    ref_vis, ref_lm = reference_forward(params, x)
    assert bool(jnp.allclose(pred_vis, ref_vis, atol=5e-2, rtol=5e-2)), (
        float(jnp.max(jnp.abs(pred_vis - ref_vis))))
    assert bool(jnp.allclose(pred_lm, ref_lm, atol=5e-2, rtol=5e-2)), (
        float(jnp.max(jnp.abs(pred_lm - ref_lm))))

    print("KERNEL_OK")
</pallas_src>

<mosaic_0001>
module attributes {stable_mosaic.version = 11 : i64} {
  func.func @_vgg_landmark_kernel(%arg0: i32, %arg1: memref<1x290x3xf32, #tpu.memory_space<vmem>>, %arg2: memref<9x3x16xbf16, #tpu.memory_space<vmem>>, %arg3: memref<1x16xf32, #tpu.memory_space<vmem>>, %arg4: memref<9x16x32xbf16, #tpu.memory_space<vmem>>, %arg5: memref<1x32xf32, #tpu.memory_space<vmem>>, %arg6: memref<32x64xbf16, #tpu.memory_space<vmem>>, %arg7: memref<1x64xf32, #tpu.memory_space<vmem>>, %arg8: memref<64x128xbf16, #tpu.memory_space<vmem>>, %arg9: memref<1x128xf32, #tpu.memory_space<vmem>>, %arg10: memref<1x1x128xf32, #tpu.memory_space<vmem>>, %arg11: memref<273x16xf32, #tpu.memory_space<vmem>>, %arg12: memref<324x16xf32, #tpu.memory_space<vmem>>, %arg13: memref<290x32xf32, #tpu.memory_space<vmem>>) attributes {dimension_semantics = [#tpu.dimension_semantics<parallel>], iteration_bounds = array<i64: 2>, scalar_prefetch = 0 : i64, scratch_operands = 3 : i64, tpu.core_type = #tpu.core_type<tc>, window_params = [{transform_indices = @transform_0, window_bounds = array<i64: 1, 290, 3>}, {pipeline_mode = #tpu.pipeline_mode<synchronous>, transform_indices = @transform_1, window_bounds = array<i64: 9, 3, 16>}, {pipeline_mode = #tpu.pipeline_mode<synchronous>, transform_indices = @transform_2, window_bounds = array<i64: 1, 16>}, {pipeline_mode = #tpu.pipeline_mode<synchronous>, transform_indices = @transform_3, window_bounds = array<i64: 9, 16, 32>}, {pipeline_mode = #tpu.pipeline_mode<synchronous>, transform_indices = @transform_4, window_bounds = array<i64: 1, 32>}, {pipeline_mode = #tpu.pipeline_mode<synchronous>, transform_indices = @transform_5, window_bounds = array<i64: 32, 64>}, {pipeline_mode = #tpu.pipeline_mode<synchronous>, transform_indices = @transform_6, window_bounds = array<i64: 1, 64>}, {pipeline_mode = #tpu.pipeline_mode<synchronous>, transform_indices = @transform_7, window_bounds = array<i64: 64, 128>}, {pipeline_mode = #tpu.pipeline_mode<synchronous>, transform_indices = @transform_8, window_bounds = array<i64: 1, 128>}, {transform_indices = @transform_9, window_bounds = array<i64: 1, 1, 128>}]} {
    %0 = tpu.iota {dimensions = array<i32: 0>} : vector<256x1xi32>
    %c15_i32 = arith.constant 15 : i32
    %1 = vector.broadcast %c15_i32 : i32 to vector<256x1xi32>
    %2 = arith.andi %0, %1 : vector<256x1xi32>
    %c1_i32 = arith.constant 1 : i32
    %3 = vector.broadcast %c1_i32 : i32 to vector<256x1xi32>
    %4 = arith.cmpi sge, %2, %3 : vector<256x1xi32>
    %c14_i32 = arith.constant 14 : i32
    %5 = vector.broadcast %c14_i32 : i32 to vector<256x1xi32>
    %6 = arith.cmpi sle, %2, %5 : vector<256x1xi32>
    %c2_i32 = arith.constant 2 : i32
    %7 = vector.broadcast %c2_i32 : i32 to vector<256x1xi32>
    %8 = arith.cmpi sge, %2, %7 : vector<256x1xi32>
    %c13_i32 = arith.constant 13 : i32
    %9 = vector.broadcast %c13_i32 : i32 to vector<256x1xi32>
    %10 = arith.cmpi sle, %2, %9 : vector<256x1xi32>
    %cst = arith.constant 0.000000e+00 : f32
    %11 = vector.broadcast %cst : f32 to vector<273x16xf32>
    %c0 = arith.constant 0 : index
    %c0_0 = arith.constant 0 : index
    %12 = vector.load %arg11[%c0, %c0_0] : memref<273x16xf32, #tpu.memory_space<vmem>>, vector<273x16xf32>
    tpu.vector_store %arg11[%c0, %c0_0], %11 {strides = array<i32>} : memref<273x16xf32, #tpu.memory_space<vmem>>, vector<273x16xf32>,
    %cst_1 = arith.constant 0.000000e+00 : f32
    %13 = vector.broadcast %cst_1 : f32 to vector<324x16xf32>
    %c0_2 = arith.constant 0 : index
    %c0_3 = arith.constant 0 : index
    %14 = vector.load %arg12[%c0_2, %c0_3] : memref<324x16xf32, #tpu.memory_space<vmem>>, vector<324x16xf32>
    tpu.vector_store %arg12[%c0_2, %c0_3], %13 {strides = array<i32>} : memref<324x16xf32, #tpu.memory_space<vmem>>, vector<324x16xf32>,
    %cst_4 = arith.constant 0.000000e+00 : f32
    %15 = vector.broadcast %cst_4 : f32 to vector<290x32xf32>
    %c0_5 = arith.constant 0 : index
    %c0_6 = arith.constant 0 : index
    %16 = vector.load %arg13[%c0_5, %c0_6] : memref<290x32xf32, #tpu.memory_space<vmem>>, vector<290x32xf32>
    tpu.vector_store %arg13[%c0_5, %c0_6], %15 {strides = array<i32>} : memref<290x32xf32, #tpu.memory_space<vmem>>, vector<290x32xf32>,
    %cst_7 = arith.constant 0.000000e+00 : f32
    %17 = vector.broadcast %cst_7 : f32 to vector<256x16xf32>
    %c0_8 = arith.constant 0 : index
    %c0_9 = arith.constant 0 : index
    %c0_10 = arith.constant 0 : index
    %18 = vector.load %arg1[%c0_8, %c0_9, %c0_10] : memref<1x290x3xf32, #tpu.memory_space<vmem>>, vector<1x256x3xf32>
    %19 = vector.shape_cast %18 : vector<1x256x3xf32> to vector<256x3xf32>
    %cst_11 = arith.constant 0.000000e+00 : f32
    %20 = vector.shape_cast %4 : vector<256x1xi1> to vector<256x1xi1>
    %21 = vector.broadcast %20 : vector<256x1xi1> to vector<256x3xi1>
    %22 = vector.broadcast %cst_11 : f32 to vector<256x3xf32>
    %23 = arith.select %21, %19, %22 : vector<256x3xi1>, vector<256x3xf32>
    %24 = arith.truncf %23 : vector<256x3xf32> to vector<256x3xbf16>
    %c0_12 = arith.constant 0 : index
    %c0_13 = arith.constant 0 : index
    %c0_14 = arith.constant 0 : index
    %25 = vector.load %arg2[%c0_12, %c0_13, %c0_14] : memref<9x3x16xbf16, #tpu.memory_space<vmem>>, vector<1x3x16xbf16>
    %26 = vector.shape_cast %25 : vector<1x3x16xbf16> to vector<3x16xbf16>
    %cst_15 = arith.constant dense<0.000000e+00> : vector<256x16xf32>
    %27 = tpu.matmul %24, %26, %cst_15 {dimension_numbers = #tpu.dot_dimension_numbers<[1], [0], [0], [1], [0, 0, 1, 1], [], []>} : vector<256x3xbf16>, vector<3x16xbf16>, vector<256x16xf32> -> vector<256x16xf32>
    %28 = arith.addf %17, %27 : vector<256x16xf32>
    %c0_16 = arith.constant 0 : index
    %c1 = arith.constant 1 : index
    %c0_17 = arith.constant 0 : index
    %29 = vector.load %arg1[%c0_16, %c1, %c0_17] : memref<1x290x3xf32, #tpu.memory_space<vmem>>, vector<1x256x3xf32>
    %30 = vector.shape_cast %29 : vector<1x256x3xf32> to vector<256x3xf32>
    %31 = arith.truncf %30 : vector<256x3xf32> to vector<256x3xbf16>
    %c1_18 = arith.constant 1 : index
    %c0_19 = arith.constant 0 : index
    %c0_20 = arith.constant 0 : index
    %32 = vector.load %arg2[%c1_18, %c0_19, %c0_20] : memref<9x3x16xbf16, #tpu.memory_space<vmem>>, vector<1x3x16xbf16>
    %33 = vector.shape_cast %32 : vector<1x3x16xbf16> to vector<3x16xbf16>
    %cst_21 = arith.constant dense<0.000000e+00> : vector<256x16xf32>
    %34 = tpu.matmul %31, %33, %cst_21 {dimension_numbers = #tpu.dot_dimension_numbers<[1], [0], [0], [1], [0, 0, 1, 1], [], []>} : vector<256x3xbf16>, vector<3x16xbf16>, vector<256x16xf32> -> vector<256x16xf32>
    %35 = arith.addf %28, %34 : vector<256x16xf32>
    %c0_22 = arith.constant 0 : index
    %c2 = arith.constant 2 : index
    %c0_23 = arith.constant 0 : index
    %36 = vector.load %arg1[%c0_22, %c2, %c0_23] : memref<1x290x3xf32, #tpu.memory_space<vmem>>, vector<1x256x3xf32>
    %37 = vector.shape_cast %36 : vector<1x256x3xf32> to vector<256x3xf32>
    %cst_24 = arith.constant 0.000000e+00 : f32
    %38 = vector.shape_cast %6 : vector<256x1xi1> to vector<256x1xi1>
    %39 = vector.broadcast %38 : vector<256x1xi1> to vector<256x3xi1>
    %40 = vector.broadcast %cst_24 : f32 to vector<256x3xf32>
    %41 = arith.select %39, %37, %40 : vector<256x3xi1>, vector<256x3xf32>
    %42 = arith.truncf %41 : vector<256x3xf32> to vector<256x3xbf16>
    %c2_25 = arith.constant 2 : index
    %c0_26 = arith.constant 0 : index
    %c0_27 = arith.constant 0 : index
    %43 = vector.load %arg2[%c2_25, %c0_26, %c0_27] : memref<9x3x16xbf16, #tpu.memory_space<vmem>>, vector<1x3x16xbf16>
    %44 = vector.shape_cast %43 : vector<1x3x16xbf16> to vector<3x16xbf16>
    %cst_28 = arith.constant dense<0.000000e+00> : vector<256x16xf32>
    %45 = tpu.matmul %42, %44, %cst_28 {dimension_numbers = #tpu.dot_dimension_numbers<[1], [0], [0], [1], [0, 0, 1, 1], [], []>} : vector<256x3xbf16>, vector<3x16xbf16>, vector<256x16xf32> -> vector<256x16xf32>
    %46 = arith.addf %35, %45 : vector<256x16xf32>
    %c0_29 = arith.constant 0 : index
    %c16 = arith.constant 16 : index
    %c0_30 = arith.constant 0 : index
    %47 = vector.load %arg1[%c0_29, %c16, %c0_30] : memref<1x290x3xf32, #tpu.memory_space<vmem>>, vector<1x256x3xf32>
    %48 = vector.shape_cast %47 : vector<1x256x3xf32> to vector<256x3xf32>
    %cst_31 = arith.constant 0.000000e+00 : f32
    %49 = vector.shape_cast %4 : vector<256x1xi1> to vector<256x1xi1>
    %50 = vector.broadcast %49 : vector<256x1xi1> to vector<256x3xi1>
    %51 = vector.broadcast %cst_31 : f32 to vector<256x3xf32>
    %52 = arith.select %50, %48, %51 : vector<256x3xi1>, vector<256x3xf32>
    %53 = arith.truncf %52 : vector<256x3xf32> to vector<256x3xbf16>
    %c3 = arith.constant 3 : index
    %c0_32 = arith.constant 0 : index
    %c0_33 = arith.constant 0 : index
    %54 = vector.load %arg2[%c3, %c0_32, %c0_33] : memref<9x3x16xbf16, #tpu.memory_space<vmem>>, vector<1x3x16xbf16>
    %55 = vector.shape_cast %54 : vector<1x3x16xbf16> to vector<3x16xbf16>
    %cst_34 = arith.constant dense<0.000000e+00> : vector<256x16xf32>
    %56 = tpu.matmul %53, %55, %cst_34 {dimension_numbers = #tpu.dot_dimension_numbers<[1], [0], [0], [1], [0, 0, 1, 1], [], []>} : vector<256x3xbf16>, vector<3x16xbf16>, vector<256x16xf32> -> vector<256x16xf32>
    %57 = arith.addf %46, %56 : vector<256x16xf32>
    %c0_35 = arith.constant 0 : index
    %c17 = arith.constant 17 : index
    %c0_36 = arith.constant 0 : index
    %58 = vector.load %arg1[%c0_35, %c17, %c0_36] : memref<1x290x3xf32, #tpu.memory_space<vmem>>, vector<1x256x3xf32>
    %59 = vector.shape_cast %58 : vector<1x256x3xf32> to vector<256x3xf32>
    %60 = arith.truncf %59 : vector<256x3xf32> to vector<256x3xbf16>
    %c4 = arith.constant 4 : index
    %c0_37 = arith.constant 0 : index
    %c0_38 = arith.constant 0 : index
    %61 = vector.load %arg2[%c4, %c0_37, %c0_38] : memref<9x3x16xbf16, #tpu.memory_space<vmem>>, vector<1x3x16xbf16>
    %62 = vector.shape_cast %61 : vector<1x3x16xbf16> to vector<3x16xbf16>
    %cst_39 = arith.constant dense<0.000000e+00> : vector<256x16xf32>
    %63 = tpu.matmul %60, %62, %cst_39 {dimension_numbers = #tpu.dot_dimension_numbers<[1], [0], [0], [1], [0, 0, 1, 1], [], []>} : vector<256x3xbf16>, vector<3x16xbf16>, vector<256x16xf32> -> vector<256x16xf32>
    %64 = arith.addf %57, %63 : vector<256x16xf32>
    %c0_40 = arith.constant 0 : index
    %c18 = arith.constant 18 : index
    %c0_41 = arith.constant 0 : index
    %65 = vector.load %arg1[%c0_40, %c18, %c0_41] : memref<1x290x3xf32, #tpu.memory_space<vmem>>, vector<1x256x3xf32>
    %66 = vector.shape_cast %65 : vector<1x256x3xf32> to vector<256x3xf32>
    %cst_42 = arith.constant 0.000000e+00 : f32
    %67 = vector.shape_cast %6 : vector<256x1xi1> to vector<256x1xi1>
    %68 = vector.broadcast %67 : vector<256x1xi1> to vector<256x3xi1>
    %69 = vector.broadcast %cst_42 : f32 to vector<256x3xf32>
    %70 = arith.select %68, %66, %69 : vector<256x3xi1>, vector<256x3xf32>
    %71 = arith.truncf %70 : vector<256x3xf32> to vector<256x3xbf16>
    %c5 = arith.constant 5 : index
    %c0_43 = arith.constant 0 : index
    %c0_44 = arith.constant 0 : index
    %72 = vector.load %arg2[%c5, %c0_43, %c0_44] : memref<9x3x16xbf16, #tpu.memory_space<vmem>>, vector<1x3x16xbf16>
    %73 = vector.shape_cast %72 : vector<1x3x16xbf16> to vector<3x16xbf16>
    %cst_45 = arith.constant dense<0.000000e+00> : vector<256x16xf32>
    %74 = tpu.matmul %71, %73, %cst_45 {dimension_numbers = #tpu.dot_dimension_numbers<[1], [0], [0], [1], [0, 0, 1, 1], [], []>} : vector<256x3xbf16>, vector<3x16xbf16>, vector<256x16xf32> -> vector<256x16xf32>
    %75 = arith.addf %64, %74 : vector<256x16xf32>
    %c0_46 = arith.constant 0 : index
    %c32 = arith.constant 32 : index
    %c0_47 = arith.constant 0 : index
    %76 = vector.load %arg1[%c0_46, %c32, %c0_47] : memref<1x290x3xf32, #tpu.memory_space<vmem>>, vector<1x256x3xf32>
    %77 = vector.shape_cast %76 : vector<1x256x3xf32> to vector<256x3xf32>
    %cst_48 = arith.constant 0.000000e+00 : f32
    %78 = vector.shape_cast %4 : vector<256x1xi1> to vector<256x1xi1>
    %79 = vector.broadcast %78 : vector<256x1xi1> to vector<256x3xi1>
    %80 = vector.broadcast %cst_48 : f32 to vector<256x3xf32>
    %81 = arith.select %79, %77, %80 : vector<256x3xi1>, vector<256x3xf32>
    %82 = arith.truncf %81 : vector<256x3xf32> to vector<256x3xbf16>
    %c6 = arith.constant 6 : index
    %c0_49 = arith.constant 0 : index
    %c0_50 = arith.constant 0 : index
    %83 = vector.load %arg2[%c6, %c0_49, %c0_50] : memref<9x3x16xbf16, #tpu.memory_space<vmem>>, vector<1x3x16xbf16>
    %84 = vector.shape_cast %83 : vector<1x3x16xbf16> to vector<3x16xbf16>
    %cst_51 = arith.constant dense<0.000000e+00> : vector<256x16xf32>
    %85 = tpu.matmul %82, %84, %cst_51 {dimension_numbers = #tpu.dot_dimension_numbers<[1], [0], [0], [1], [0, 0, 1, 1], [], []>} : vector<256x3xbf16>, vector<3x16xbf16>, vector<256x16xf32> -> vector<256x16xf32>
    %86 = arith.addf %75, %85 : vector<256x16xf32>
    %c0_52 = arith.constant 0 : index
    %c33 = arith.constant 33 : index
    %c0_53 = arith.constant 0 : index
    %87 = vector.load %arg1[%c0_52, %c33, %c0_53] : memref<1x290x3xf32, #tpu.memory_space<vmem>>, vector<1x256x3xf32>
    %88 = vector.shape_cast %87 : vector<1x256x3xf32> to vector<256x3xf32>
    %89 = arith.truncf %88 : vector<256x3xf32> to vector<256x3xbf16>
    %c7 = arith.constant 7 : index
    %c0_54 = arith.constant 0 : index
    %c0_55 = arith.constant 0 : index
    %90 = vector.load %arg2[%c7, %c0_54, %c0_55] : memref<9x3x16xbf16, #tpu.memory_space<vmem>>, vector<1x3x16xbf16>
    %91 = vector.shape_cast %90 : vector<1x3x16xbf16> to vector<3x16xbf16>
    %cst_56 = arith.constant dense<0.000000e+00> : vector<256x16xf32>
    %92 = tpu.matmul %89, %91, %cst_56 {dimension_numbers = #tpu.dot_dimension_numbers<[1], [0], [0], [1], [0, 0, 1, 1], [], []>} : vector<256x3xbf16>, vector<3x16xbf16>, vector<256x16xf32> -> vector<256x16xf32>
    %93 = arith.addf %86, %92 : vector<256x16xf32>
    %c0_57 = arith.constant 0 : index
    %c34 = arith.constant 34 : index
    %c0_58 = arith.constant 0 : index
    %94 = vector.load %arg1[%c0_57, %c34, %c0_58] : memref<1x290x3xf32, #tpu.memory_space<vmem>>, vector<1x256x3xf32>
    %95 = vector.shape_cast %94 : vector<1x256x3xf32> to vector<256x3xf32>
    %cst_59 = arith.constant 0.000000e+00 : f32
    %96 = vector.shape_cast %6 : vector<256x1xi1> to vector<256x1xi1>
    %97 = vector.broadcast %96 : vector<256x1xi1> to vector<256x3xi1>
    %98 = vector.broadcast %cst_59 : f32 to vector<256x3xf32>
    %99 = arith.select %97, %95, %98 : vector<256x3xi1>, vector<256x3xf32>
    %100 = arith.truncf %99 : vector<256x3xf32> to vector<256x3xbf16>
    %c8 = arith.constant 8 : index
    %c0_60 = arith.constant 0 : index
    %c0_61 = arith.constant 0 : index
    %101 = vector.load %arg2[%c8, %c0_60, %c0_61] : memref<9x3x16xbf16, #tpu.memory_space<vmem>>, vector<1x3x16xbf16>
    %102 = vector.shape_cast %101 : vector<1x3x16xbf16> to vector<3x16xbf16>
    %cst_62 = arith.constant dense<0.000000e+00> : vector<256x16xf32>
    %103 = tpu.matmul %100, %102, %cst_62 {dimension_numbers = #tpu.dot_dimension_numbers<[1], [0], [0], [1], [0, 0, 1, 1], [], []>} : vector<256x3xbf16>, vector<3x16xbf16>, vector<256x16xf32> -> vector<256x16xf32>
    %104 = arith.addf %93, %103 : vector<256x16xf32>
    %c0_63 = arith.constant 0 : index
    %c0_64 = arith.constant 0 : index
    %105 = vector.load %arg3[%c0_63, %c0_64] : memref<1x16xf32, #tpu.memory_space<vmem>>, vector<1x16xf32>
    %106 = vector.broadcast %105 : vector<1x16xf32> to vector<256x16xf32>
    %107 = arith.addf %104, %106 : vector<256x16xf32>
    %cst_65 = arith.constant 0.000000e+00 : f32
    %108 = vector.broadcast %cst_65 : f32 to vector<256x16xf32>
    %109 = arith.maximumf %107, %108 : vector<256x16xf32>
    %c0_66 = arith.constant 0 : index
    %c0_67 = arith.constant 0 : index
    %110 = vector.load %arg11[%c0_66, %c0_67] : memref<273x16xf32, #tpu.memory_space<vmem>>, vector<256x16xf32>
    tpu.vector_store %arg11[%c0_66, %c0_67], %109 {strides = array<i32>} : memref<273x16xf32, #tpu.memory_space<vmem>>, vector<256x16xf32>,
    %c1_68 = arith.constant 1 : index
    %c0_69 = arith.constant 0 : index
    %111 = vector.load %arg11[%c1_68, %c0_69] : memref<273x16xf32, #tpu.memory_space<vmem>>, vector<256x16xf32>
    %112 = arith.maximumf %109, %111 : vector<256x16xf32>
    %c16_70 = arith.constant 16 : index
    %c0_71 = arith.constant 0 : index
    %113 = vector.load %arg11[%c16_70, %c0_71] : memref<273x16xf32, #tpu.memory_space<vmem>>, vector<256x16xf32>
    %114 = arith.maximumf %112, %113 : vector<256x16xf32>
    %c17_72 = arith.constant 17 : index
    %c0_73 = arith.constant 0 : index
    %115 = vector.load %arg11[%c17_72, %c0_73] : memref<273x16xf32, #tpu.memory_space<vmem>>, vector<256x16xf32>
    %116 = arith.maximumf %114, %115 : vector<256x16xf32>
    %c34_74 = arith.constant 34 : index
    %c0_75 = arith.constant 0 : index
    %117 = vector.load %arg12[%c34_74, %c0_75] : memref<324x16xf32, #tpu.memory_space<vmem>>, vector<256x16xf32>
    tpu.vector_store %arg12[%c34_74, %c0_75], %116 {strides = array<i32>} : memref<324x16xf32, #tpu.memory_space<vmem>>, vector<256x16xf32>,
    %cst_76 = arith.constant 0.000000e+00 : f32
    %118 = vector.broadcast %cst_76 : f32 to vector<256x32xf32>
    %c0_77 = arith.constant 0 : index
    %c0_78 = arith.constant 0 : index
    %119 = vector.load %arg12[%c0_77, %c0_78] : memref<324x16xf32, #tpu.memory_space<vmem>>, vector<256x16xf32>
    %cst_79 = arith.constant 0.000000e+00 : f32
    %120 = vector.shape_cast %8 : vector<256x1xi1> to vector<256x1xi1>
    %121 = vector.broadcast %120 : vector<256x1xi1> to vector<256x16xi1>
    %122 = vector.broadcast %cst_79 : f32 to vector<256x16xf32>
    %123 = arith.select %121, %119, %122 : vector<256x16xi1>, vector<256x16xf32>
    %124 = arith.truncf %123 : vector<256x16xf32> to vector<256x16xbf16>
    %c0_80 = arith.constant 0 : index
    %c0_81 = arith.constant 0 : index
    %c0_82 = arith.constant 0 : index
    %125 = vector.load %arg4[%c0_80, %c0_81, %c0_82] : memref<9x16x32xbf16, #tpu.memory_space<vmem>>, vector<1x16x32xbf16>
    %126 = vector.shape_cast %125 : vector<1x16x32xbf16> to vector<16x32xbf16>
    %cst_83 = arith.constant dense<0.000000e+00> : vector<256x32xf32>
    %127 = tpu.matmul %124, %126, %cst_83 {dimension_numbers = #tpu.dot_dimension_numbers<[1], [0], [0], [1], [0, 0, 1, 1], [], []>} : vector<256x16xbf16>, vector<16x32xbf16>, vector<256x32xf32> -> vector<256x32xf32>
    %128 = arith.addf %118, %127 : vector<256x32xf32>
    %c2_84 = arith.constant 2 : index
    %c0_85 = arith.constant 0 : index
    %129 = vector.load %arg12[%c2_84, %c0_85] : memref<324x16xf32, #tpu.memory_space<vmem>>, vector<256x16xf32>
    %130 = arith.truncf %129 : vector<256x16xf32> to vector<256x16xbf16>
    %c1_86 = arith.constant 1 : index
    %c0_87 = arith.constant 0 : index
    %c0_88 = arith.constant 0 : index
    %131 = vector.load %arg4[%c1_86, %c0_87, %c0_88] : memref<9x16x32xbf16, #tpu.memory_space<vmem>>, vector<1x16x32xbf16>
    %132 = vector.shape_cast %131 : vector<1x16x32xbf16> to vector<16x32xbf16>
    %cst_89 = arith.constant dense<0.000000e+00> : vector<256x32xf32>
    %133 = tpu.matmul %130, %132, %cst_89 {dimension_numbers = #tpu.dot_dimension_numbers<[1], [0], [0], [1], [0, 0, 1, 1], [], []>} : vector<256x16xbf16>, vector<16x32xbf16>, vector<256x32xf32> -> vector<256x32xf32>
    %134 = arith.addf %128, %133 : vector<256x32xf32>
    %c4_90 = arith.constant 4 : index
    %c0_91 = arith.constant 0 : index
    %135 = vector.load %arg12[%c4_90, %c0_91] : memref<324x16xf32, #tpu.memory_space<vmem>>, vector<256x16xf32>
    %cst_92 = arith.constant 0.000000e+00 : f32
    %136 = vector.shape_cast %10 : vector<256x1xi1> to vector<256x1xi1>
    %137 = vector.broadcast %136 : vector<256x1xi1> to vector<256x16xi1>
    %138 = vector.broadcast %cst_92 : f32 to vector<256x16xf32>
    %139 = arith.select %137, %135, %138 : vector<256x16xi1>, vector<256x16xf32>
    %140 = arith.truncf %139 : vector<256x16xf32> to vector<256x16xbf16>
    %c2_93 = arith.constant 2 : index
    %c0_94 = arith.constant 0 : index
    %c0_95 = arith.constant 0 : index
    %141 = vector.load %arg4[%c2_93, %c0_94, %c0_95] : memref<9x16x32xbf16, #tpu.memory_space<vmem>>, vector<1x16x32xbf16>
    %142 = vector.shape_cast %141 : vector<1x16x32xbf16> to vector<16x32xbf16>
    %cst_96 = arith.constant dense<0.000000e+00> : vector<256x32xf32>
    %143 = tpu.matmul %140, %142, %cst_96 {dimension_numbers = #tpu.dot_dimension_numbers<[1], [0], [0], [1], [0, 0, 1, 1], [], []>} : vector<256x16xbf16>, vector<16x32xbf16>, vector<256x32xf32> -> vector<256x32xf32>
    %144 = arith.addf %134, %143 : vector<256x32xf32>
    %c32_97 = arith.constant 32 : index
    %c0_98 = arith.constant 0 : index
    %145 = vector.load %arg12[%c32_97, %c0_98] : memref<324x16xf32, #tpu.memory_space<vmem>>, vector<256x16xf32>
    %cst_99 = arith.constant 0.000000e+00 : f32
    %146 = vector.shape_cast %8 : vector<256x1xi1> to vector<256x1xi1>
    %147 = vector.broadcast %146 : vector<256x1xi1> to vector<256x16xi1>
    %148 = vector.broadcast %cst_99 : f32 to vector<256x16xf32>
    %149 = arith.select %147, %145, %148 : vector<256x16xi1>, vector<256x16xf32>
    %150 = arith.truncf %149 : vector<256x16xf32> to vector<256x16xbf16>
    %c3_100 = arith.constant 3 : index
    %c0_101 = arith.constant 0 : index
    %c0_102 = arith.constant 0 : index
    %151 = vector.load %arg4[%c3_100, %c0_101, %c0_102] : memref<9x16x32xbf16, #tpu.memory_space<vmem>>, vector<1x16x32xbf16>
    %152 = vector.shape_cast %151 : vector<1x16x32xbf16> to vector<16x32xbf16>
    %cst_103 = arith.constant dense<0.000000e+00> : vector<256x32xf32>
    %153 = tpu.matmul %150, %152, %cst_103 {dimension_numbers = #tpu.dot_dimension_numbers<[1], [0], [0], [1], [0, 0, 1, 1], [], []>} : vector<256x16xbf16>, vector<16x32xbf16>, vector<256x32xf32> -> vector<256x32xf32>
    %154 = arith.addf %144, %153 : vector<256x32xf32>
    %c34_104 = arith.constant 34 : index
    %c0_105 = arith.constant 0 : index
    %155 = vector.load %arg12[%c34_104, %c0_105] : memref<324x16xf32, #tpu.memory_space<vmem>>, vector<256x16xf32>
    %156 = arith.truncf %155 : vector<256x16xf32> to vector<256x16xbf16>
    %c4_106 = arith.constant 4 : index
    %c0_107 = arith.constant 0 : index
    %c0_108 = arith.constant 0 : index
    %157 = vector.load %arg4[%c4_106, %c0_107, %c0_108] : memref<9x16x32xbf16, #tpu.memory_space<vmem>>, vector<1x16x32xbf16>
    %158 = vector.shape_cast %157 : vector<1x16x32xbf16> to vector<16x32xbf16>
    %cst_109 = arith.constant dense<0.000000e+00> : vector<256x32xf32>
    %159 = tpu.matmul %156, %158, %cst_109 {dimension_numbers = #tpu.dot_dimension_numbers<[1], [0], [0], [1], [0, 0, 1, 1], [], []>} : vector<256x16xbf16>, vector<16x32xbf16>, vector<256x32xf32> -> vector<256x32xf32>
    %160 = arith.addf %154, %159 : vector<256x32xf32>
    %c36 = arith.constant 36 : index
    %c0_110 = arith.constant 0 : index
    %161 = vector.load %arg12[%c36, %c0_110] : memref<324x16xf32, #tpu.memory_space<vmem>>, vector<256x16xf32>
    %cst_111 = arith.constant 0.000000e+00 : f32
    %162 = vector.shape_cast %10 : vector<256x1xi1> to vector<256x1xi1>
    %163 = vector.broadcast %162 : vector<256x1xi1> to vector<256x16xi1>
    %164 = vector.broadcast %cst_111 : f32 to vector<256x16xf32>
    %165 = arith.select %163, %161, %164 : vector<256x16xi1>, vector<256x16xf32>
    %166 = arith.truncf %165 : vector<256x16xf32> to vector<256x16xbf16>
    %c5_112 = arith.constant 5 : index
    %c0_113 = arith.constant 0 : index
    %c0_114 = arith.constant 0 : index
    %167 = vector.load %arg4[%c5_112, %c0_113, %c0_114] : memref<9x16x32xbf16, #tpu.memory_space<vmem>>, vector<1x16x32xbf16>
    %168 = vector.shape_cast %167 : vector<1x16x32xbf16> to vector<16x32xbf16>
    %cst_115 = arith.constant dense<0.000000e+00> : vector<256x32xf32>
    %169 = tpu.matmul %166, %168, %cst_115 {dimension_numbers = #tpu.dot_dimension_numbers<[1], [0], [0], [1], [0, 0, 1, 1], [], []>} : vector<256x16xbf16>, vector<16x32xbf16>, vector<256x32xf32> -> vector<256x32xf32>
    %170 = arith.addf %160, %169 : vector<256x32xf32>
    %c64 = arith.constant 64 : index
    %c0_116 = arith.constant 0 : index
    %171 = vector.load %arg12[%c64, %c0_116] : memref<324x16xf32, #tpu.memory_space<vmem>>, vector<256x16xf32>
    %cst_117 = arith.constant 0.000000e+00 : f32
    %172 = vector.shape_cast %8 : vector<256x1xi1> to vector<256x1xi1>
    %173 = vector.broadcast %172 : vector<256x1xi1> to vector<256x16xi1>
    %174 = vector.broadcast %cst_117 : f32 to vector<256x16xf32>
    %175 = arith.select %173, %171, %174 : vector<256x16xi1>, vector<256x16xf32>
    %176 = arith.truncf %175 : vector<256x16xf32> to vector<256x16xbf16>
    %c6_118 = arith.constant 6 : index
    %c0_119 = arith.constant 0 : index
    %c0_120 = arith.constant 0 : index
    %177 = vector.load %arg4[%c6_118, %c0_119, %c0_120] : memref<9x16x32xbf16, #tpu.memory_space<vmem>>, vector<1x16x32xbf16>
    %178 = vector.shape_cast %177 : vector<1x16x32xbf16> to vector<16x32xbf16>
    %cst_121 = arith.constant dense<0.000000e+00> : vector<256x32xf32>
    %179 = tpu.matmul %176, %178, %cst_121 {dimension_numbers = #tpu.dot_dimension_numbers<[1], [0], [0], [1], [0, 0, 1, 1], [], []>} : vector<256x16xbf16>, vector<16x32xbf16>, vector<256x32xf32> -> vector<256x32xf32>
    %180 = arith.addf %170, %179 : vector<256x32xf32>
    %c66 = arith.constant 66 : index
    %c0_122 = arith.constant 0 : index
    %181 = vector.load %arg12[%c66, %c0_122] : memref<324x16xf32, #tpu.memory_space<vmem>>, vector<256x16xf32>
    %182 = arith.truncf %181 : vector<256x16xf32> to vector<256x16xbf16>
    %c7_123 = arith.constant 7 : index
    %c0_124 = arith.constant 0 : index
    %c0_125 = arith.constant 0 : index
    %183 = vector.load %arg4[%c7_123, %c0_124, %c0_125] : memref<9x16x32xbf16, #tpu.memory_space<vmem>>, vector<1x16x32xbf16>
    %184 = vector.shape_cast %183 : vector<1x16x32xbf16> to vector<16x32xbf16>
    %cst_126 = arith.constant dense<0.000000e+00> : vector<256x32xf32>
    %185 = tpu.matmul %182, %184, %cst_126 {dimension_numbers = #tpu.dot_dimension_numbers<[1], [0], [0], [1], [0, 0, 1, 1], [], []>} : vector<256x16xbf16>, vector<16x32xbf16>, vector<256x32xf32> -> vector<256x32xf32>
    %186 = arith.addf %180, %185 : vector<256x32xf32>
    %c68 = arith.constant 68 : index
    %c0_127 = arith.constant 0 : index
    %187 = vector.load %arg12[%c68, %c0_127] : memref<324x16xf32, #tpu.memory_space<vmem>>, vector<256x16xf32>
    %cst_128 = arith.constant 0.000000e+00 : f32
    %188 = vector.shape_cast %10 : vector<256x1xi1> to vector<256x1xi1>
    %189 = vector.broadcast %188 : vector<256x1xi1> to vector<256x16xi1>
    %190 = vector.broadcast %cst_128 : f32 to vector<256x16xf32>
    %191 = arith.select %189, %187, %190 : vector<256x16xi1>, vector<256x16xf32>
    %192 = arith.truncf %191 : vector<256x16xf32> to vector<256x16xbf16>
    %c8_129 = arith.constant 8 : index
    %c0_130 = arith.constant 0 : index
    %c0_131 = arith.constant 0 : index
    %193 = vector.load %arg4[%c8_129, %c0_130, %c0_131] : memref<9x16x32xbf16, #tpu.memory_space<vmem>>, vector<1x16x32xbf16>
    %194 = vector.shape_cast %193 : vector<1x16x32xbf16> to vector<16x32xbf16>
    %cst_132 = arith.constant dense<0.000000e+00> : vector<256x32xf32>
    %195 = tpu.matmul %192, %194, %cst_132 {dimension_numbers = #tpu.dot_dimension_numbers<[1], [0], [0], [1], [0, 0, 1, 1], [], []>} : vector<256x16xbf16>, vector<16x32xbf16>, vector<256x32xf32> -> vector<256x32xf32>
    %196 = arith.addf %186, %195 : vector<256x32xf32>
    %c0_133 = arith.constant 0 : index
    %c0_134 = arith.constant 0 : index
    %197 = vector.load %arg5[%c0_133, %c0_134] : memref<1x32xf32, #tpu.memory_space<vmem>>, vector<1x32xf32>
    %198 = vector.broadcast %197 : vector<1x32xf32> to vector<256x32xf32>
    %199 = arith.addf %196, %198 : vector<256x32xf32>
    %cst_135 = arith.constant 0.000000e+00 : f32
    %200 = vector.broadcast %cst_135 : f32 to vector<256x32xf32>
    %201 = arith.maximumf %199, %200 : vector<256x32xf32>
    %c0_136 = arith.constant 0 : index
    %c0_137 = arith.constant 0 : index
    %202 = vector.load %arg13[%c0_136, %c0_137] : memref<290x32xf32, #tpu.memory_space<vmem>>, vector<256x32xf32>
    tpu.vector_store %arg13[%c0_136, %c0_137], %201 {strides = array<i32>} : memref<290x32xf32, #tpu.memory_space<vmem>>, vector<256x32xf32>,
    %c2_138 = arith.constant 2 : index
    %c0_139 = arith.constant 0 : index
    %203 = vector.load %arg13[%c2_138, %c0_139] : memref<290x32xf32, #tpu.memory_space<vmem>>, vector<256x32xf32>
    %204 = arith.maximumf %201, %203 : vector<256x32xf32>
    %c32_140 = arith.constant 32 : index
    %c0_141 = arith.constant 0 : index
    %205 = vector.load %arg13[%c32_140, %c0_141] : memref<290x32xf32, #tpu.memory_space<vmem>>, vector<256x32xf32>
    %206 = arith.maximumf %204, %205 : vector<256x32xf32>
    %c34_142 = arith.constant 34 : index
    %c0_143 = arith.constant 0 : index
    %207 = vector.load %arg13[%c34_142, %c0_143] : memref<290x32xf32, #tpu.memory_space<vmem>>, vector<256x32xf32>
    %208 = arith.maximumf %206, %207 : vector<256x32xf32>
    %c3_i32 = arith.constant 3 : i32
    %209 = vector.broadcast %c3_i32 : i32 to vector<256x1xi32>
    %210 = arith.andi %0, %209 : vector<256x1xi32>
    %c0_i32 = arith.constant 0 : i32
    %211 = vector.broadcast %c0_i32 : i32 to vector<256x1xi32>
    %212 = arith.cmpi eq, %210, %211 : vector<256x1xi32>
    %c4_i32 = arith.constant 4 : i32
    %213 = vector.broadcast %c4_i32 : i32 to vector<256x1xi32>
    %214 = arith.shrsi %0, %213 : vector<256x1xi32>
    %c3_i32_144 = arith.constant 3 : i32
    %215 = vector.broadcast %c3_i32_144 : i32 to vector<256x1xi32>
    %216 = arith.andi %214, %215 : vector<256x1xi32>
    %c0_i32_145 = arith.constant 0 : i32
    %217 = vector.broadcast %c0_i32_145 : i32 to vector<256x1xi32>
    %218 = arith.cmpi eq, %216, %217 : vector<256x1xi32>
    %219 = arith.andi %212, %218 : vector<256x1xi1>
    %cst_146 = arith.constant 0.000000e+00 : f32
    %220 = vector.shape_cast %219 : vector<256x1xi1> to vector<256x1xi1>
    %221 = vector.broadcast %220 : vector<256x1xi1> to vector<256x32xi1>
    %222 = vector.broadcast %cst_146 : f32 to vector<256x32xf32>
    %223 = arith.select %221, %208, %222 : vector<256x32xi1>, vector<256x32xf32>
    %cst_147 = arith.constant dense<0.000000e+00> : vector<32xf32>
    %224 = vector.multi_reduction <add>, %223, %cst_147 [0] : vector<256x32xf32> to vector<32xf32>
    %225 = vector.shape_cast %224 : vector<32xf32> to vector<1x32xf32>
    %cst_148 = arith.constant 6.250000e-02 : f32
    %226 = vector.broadcast %cst_148 : f32 to vector<1x32xf32>
    %227 = arith.mulf %225, %226 : vector<1x32xf32>
    %228 = arith.truncf %227 : vector<1x32xf32> to vector<1x32xbf16>
    %c0_149 = arith.constant 0 : index
    %c0_150 = arith.constant 0 : index
    %229 = vector.load %arg6[%c0_149, %c0_150] : memref<32x64xbf16, #tpu.memory_space<vmem>>, vector<32x64xbf16>
    %cst_151 = arith.constant dense<0.000000e+00> : vector<1x64xf32>
    %230 = tpu.matmul %228, %229, %cst_151 {dimension_numbers = #tpu.dot_dimension_numbers<[1], [0], [0], [1], [0, 0, 1, 1], [], []>} : vector<1x32xbf16>, vector<32x64xbf16>, vector<1x64xf32> -> vector<1x64xf32>
    %c0_152 = arith.constant 0 : index
    %c0_153 = arith.constant 0 : index
    %231 = vector.load %arg7[%c0_152, %c0_153] : memref<1x64xf32, #tpu.memory_space<vmem>>, vector<1x64xf32>
    %232 = arith.addf %230, %231 : vector<1x64xf32>
    %cst_154 = arith.constant 0.000000e+00 : f32
    %233 = vector.broadcast %cst_154 : f32 to vector<1x64xf32>
    %234 = arith.maximumf %232, %233 : vector<1x64xf32>
    %235 = arith.truncf %234 : vector<1x64xf32> to vector<1x64xbf16>
    %c0_155 = arith.constant 0 : index
    %c0_156 = arith.constant 0 : index
    %236 = vector.load %arg8[%c0_155, %c0_156] : memref<64x128xbf16, #tpu.memory_space<vmem>>, vector<64x128xbf16>
    %cst_157 = arith.constant dense<0.000000e+00> : vector<1x128xf32>
    %237 = tpu.matmul %235, %236, %cst_157 {dimension_numbers = #tpu.dot_dimension_numbers<[1], [0], [0], [1], [0, 0, 1, 1], [], []>} : vector<1x64xbf16>, vector<64x128xbf16>, vector<1x128xf32> -> vector<1x128xf32>
    %c0_158 = arith.constant 0 : index
    %c0_159 = arith.constant 0 : index
    %238 = vector.load %arg9[%c0_158, %c0_159] : memref<1x128xf32, #tpu.memory_space<vmem>>, vector<1x128xf32>
    %239 = arith.addf %237, %238 : vector<1x128xf32>
    %240 = tpu.iota {dimensions = array<i32: 1>} : vector<1x128xi32>
    %cst_160 = arith.constant 0.000000e+00 : f32
    %241 = vector.broadcast %cst_160 : f32 to vector<1x128xf32>
    %242 = arith.subf %241, %239 : vector<1x128xf32>
    %243 = math.exp %242 : vector<1x128xf32>
    %cst_161 = arith.constant 1.000000e+00 : f32
    %244 = vector.broadcast %cst_161 : f32 to vector<1x128xf32>
    %245 = arith.addf %244, %243 : vector<1x128xf32>
    %246 = tpu.reciprocal %245 {approx = true} : vector<1x128xf32> -> vector<1x128xf32>
    %c8_i32 = arith.constant 8 : i32
    %247 = vector.broadcast %c8_i32 : i32 to vector<1x128xi32>
    %248 = arith.cmpi slt, %240, %247 : vector<1x128xi32>
    %249 = arith.select %248, %246, %239 : vector<1x128xi1>, vector<1x128xf32>
    %c0_162 = arith.constant 0 : index
    %c0_163 = arith.constant 0 : index
    %c0_164 = arith.constant 0 : index
    %250 = vector.load %arg10[%c0_162, %c0_163, %c0_164] : memref<1x1x128xf32, #tpu.memory_space<vmem>>, vector<1x1x128xf32>
    %251 = vector.shape_cast %250 : vector<1x1x128xf32> to vector<1x128xf32>
    %252 = vector.shape_cast %249 : vector<1x128xf32> to vector<1x1x128xf32>
    tpu.vector_store %arg10[%c0_162, %c0_163, %c0_164], %252 {strides = array<i32>} : memref<1x1x128xf32, #tpu.memory_space<vmem>>, vector<1x1x128xf32>,
    return
  }
  func.func @transform_0(%arg0: i32) -> (i32, i32, i32) {
    %c0_i32 = arith.constant 0 : i32
    %c0_i32_0 = arith.constant 0 : i32
    %c0_i32_1 = arith.constant 0 : i32
    return %arg0, %c0_i32, %c0_i32_0 : i32, i32, i32
  }
  func.func @transform_1(%arg0: i32) -> (i32, i32, i32) {
    %c0_i32 = arith.constant 0 : i32
    %c0_i32_0 = arith.constant 0 : i32
    %c0_i32_1 = arith.constant 0 : i32
    %c0_i32_2 = arith.constant 0 : i32
    return %c0_i32, %c0_i32_0, %c0_i32_1 : i32, i32, i32
  }
  func.func @transform_2(%arg0: i32) -> (i32, i32) {
    %c0_i32 = arith.constant 0 : i32
    %c0_i32_0 = arith.constant 0 : i32
    %c0_i32_1 = arith.constant 0 : i32
    return %c0_i32, %c0_i32_0 : i32, i32
  }
  func.func @transform_3(%arg0: i32) -> (i32, i32, i32) {
    %c0_i32 = arith.constant 0 : i32
    %c0_i32_0 = arith.constant 0 : i32
    %c0_i32_1 = arith.constant 0 : i32
    %c0_i32_2 = arith.constant 0 : i32
    return %c0_i32, %c0_i32_0, %c0_i32_1 : i32, i32, i32
  }
  func.func @transform_4(%arg0: i32) -> (i32, i32) {
    %c0_i32 = arith.constant 0 : i32
    %c0_i32_0 = arith.constant 0 : i32
    %c0_i32_1 = arith.constant 0 : i32
    return %c0_i32, %c0_i32_0 : i32, i32
  }
  func.func @transform_5(%arg0: i32) -> (i32, i32) {
    %c0_i32 = arith.constant 0 : i32
    %c0_i32_0 = arith.constant 0 : i32
    %c0_i32_1 = arith.constant 0 : i32
    return %c0_i32, %c0_i32_0 : i32, i32
  }
  func.func @transform_6(%arg0: i32) -> (i32, i32) {
    %c0_i32 = arith.constant 0 : i32
    %c0_i32_0 = arith.constant 0 : i32
    %c0_i32_1 = arith.constant 0 : i32
    return %c0_i32, %c0_i32_0 : i32, i32
  }
  func.func @transform_7(%arg0: i32) -> (i32, i32) {
    %c0_i32 = arith.constant 0 : i32
    %c0_i32_0 = arith.constant 0 : i32
    %c0_i32_1 = arith.constant 0 : i32
    return %c0_i32, %c0_i32_0 : i32, i32
  }
  func.func @transform_8(%arg0: i32) -> (i32, i32) {
    %c0_i32 = arith.constant 0 : i32
    %c0_i32_0 = arith.constant 0 : i32
    %c0_i32_1 = arith.constant 0 : i32
    return %c0_i32, %c0_i32_0 : i32, i32
  }
  func.func @transform_9(%arg0: i32) -> (i32, i32, i32) {
    %c0_i32 = arith.constant 0 : i32
    %c0_i32_0 = arith.constant 0 : i32
    %c0_i32_1 = arith.constant 0 : i32
    return %arg0, %c0_i32, %c0_i32_0 : i32, i32, i32
  }
}

</mosaic_0001>

<bundles_post_ra>
// kernel: landmark_forward.1
= control target key start
LH: loop header
LB: loop body
LE: loop exit
PB: predicated region body
PF: predicated region fallthrough
CT: control target
= control target key end

     0   :  { %s9493_s30 = smov 0   ;;  %s13319_s0 = inlined_call_operand.vmem [shape: f32[2,290,3], index: 0, kind: input, shape index: {}]   ;;  %s13320_s1 = inlined_call_operand.vmem [shape: bf16[9,3,16], index: 1, kind: input, shape index: {}]   ;;  %s13321_s2 = inlined_call_operand.vmem [shape: f32[1,16], index: 2, kind: input, shape index: {}]   ;;  %s13322_s3 = inlined_call_operand.vmem [shape: bf16[9,16,32], index: 3, kind: input, shape index: {}]   ;;  %s13323_s4 = inlined_call_operand.vmem [shape: f32[1,32], index: 4, kind: input, shape index: {}]   ;;  %s13324_s5 = inlined_call_operand.vmem [shape: bf16[32,64], index: 5, kind: input, shape index: {}]   ;;  %s13325_s6 = inlined_call_operand.vmem [shape: f32[1,64], index: 6, kind: input, shape index: {}]   ;;  %s13326_s7 = inlined_call_operand.vmem [shape: bf16[64,128], index: 7, kind: input, shape index: {}]   ;;  %s13327_s8 = inlined_call_operand.vmem [shape: f32[1,128], index: 8, kind: input, shape index: {}]   ;;  %s13328_s9 = inlined_call_operand.vmem [shape: f32[2,1,128], index: 9, kind: output, shape index: {}]  }
   0x1 LB: > { %s7603_s10 = sadd.s32 4294967295, %s9438_s30   ;;  %p7607_p0 = scmp.ge.s32.totalorder %s9438_s30, 1  ;;  %s9438_s30 = sphi %s9493_s30, %s19_s30  }
   0x2   : > { %p287_p1 = scmp.lt.s32.totalorder %s9438_s30, 3 }
   0x4   : > { %p288_p2 = pnand %p7607_p0, %p287_p1 }
   0x6   : > { %291 = sbr.rel (%p288_p2) target bundleno = 2120 (0x848), region = 56 }
   0xd   : > { %v7609_v0 = vld [vmem:[%s13320_s1 + $0x2] sm:$0x3]  ;;  %vm885_vm0 = vcmask 1040384   ;;  %vm886_vm1 = vcmask 1041408   ;;  %p321_p3 = scmp.lt.s32.totalorder %s7603_s10, 1  ;;  %v9440_v1 = vmov 65535   ;;  %v13329_v46 = vlaneseq }
   0xe   : > { %v887_v2 = vsel %vm885_vm0, 4294967295, %v9440_v1  ;;  %v785_v3 = vld [vmem:[%s13320_s1] sm:$0x3]  ;;  %v7642_v7 = vld [vmem:[%s13320_s1 + $0x4] sm:$0x3]  ;;  %vm13377_vm2 = vcmask 23552  }
   0xf   : > { %v9507_v4 = vsel %vm886_vm1, %v887_v2, 0  ;;  %s14802_s10 = smov (!%p321_p3, %s7603_s10), 1  ;;  %v9598_v49 = vshrl.u32 %v13329_v46, 7  ;;  %v13722_v58 = vmov 0 }
  0x10   : > { %v890_v5 = vand.u32 %v7609_v0, %v9507_v4  ;;  %v1102_v6 = vand.u32 %v9507_v4, %v785_v3  ;;  %s9400_s15 = smul.u32 296, %s14802_s10  ;;  %v9533_v17 = vand.u32 %v7642_v7, %v9507_v4 }
  0x11   : > { %13718 = vst [vmem:[#allocation15_spill] sm:$0xff] %v9598_v49  ;;  %v13340_v54 = vand.u32 15, %v9598_v49  ;;  %v9614_v57 = vadd.s32 16, %v9598_v49  ;;  %v9624_v60 = vadd.s32 32, %v9598_v49 }
  0x12   : > { %8256 = vmatprep.subr.bf16.mxu0 %v890_v5  ;;  %s9517_s18 = scalar_lea.vmem %s13319_s0, %s9400_s15 }
  0x13   : > { %8257 = vmatpush3.bf16.msra.mxu0 %v890_v5  ;;  %v786_v8 = vld [vmem:[%s9517_s18 + $0x1] sm:$0xff]  ;;  %v787_v9 = vld [vmem:[%s9517_s18 + $0x9] sm:$0xff]  ;;  %v788_v10 = vld [vmem:[%s9517_s18 + $0x11] sm:$0xff]  ;;  %13721 = vst [vmem:[#allocation18_spill] sm:$0xff] %v9614_v57  ;;  %vm9618_vm3 = vcmp.ge.s32.totalorder %v13340_v54, 1  ;;  %v13339_v1 = vand.u32 15, %v9614_v57 }
  0x14   : > { %8290 = vmatprep.subr.bf16.mxu0 %v1102_v6  ;;  %v818_v11 = vpack.c.bf16 %v787_v9, %v786_v8  ;;  %v789_v12 = vld [vmem:[%s9517_s18 + $0x19] sm:$0xff]  ;;  %v790_v13 = vld [vmem:[%s9517_s18 + $0x21] sm:$0xff]  ;;  %v791_v14 = vld [vmem:[%s9517_s18 + $0x29] sm:$0xff]  ;;  %v13723_v58 = vsel %vm9618_vm3, 4294967295, %v13722_v58  ;;  %13725 = vst [vmem:[#allocation20_spill] sm:$0xff] %v9624_v60  ;;  %v13336_v2 = vand.u32 15, %v9624_v60 }
  0x15   : > { %v9528_v15 = vpack.c.bf16 %v789_v12, %v788_v10  ;;  %v9530_v16 = vpack.c.bf16 %v791_v14, %v790_v13  ;;  %v792_v18 = vld [vmem:[%s9517_s18 + $0x31] sm:$0xff]  ;;  %v793_v19 = vld [vmem:[%s9517_s18 + $0x39] sm:$0xff]  ;;  %v794_v20 = vld [vmem:[%s9517_s18 + $0x41] sm:$0xff]  ;;  %13724 = vst [vmem:[#allocation19_spill] sm:$0xff] %v13723_v58  ;;  %vm9641_vm4 = vcmp.ge.s32.totalorder %v13339_v1, 1  ;;  %v9647_v8 = vadd.s32 48, %v9598_v49 }
  0x16   : > { %8258 = vmatprep.mubr.msk.bf16.mxu0 %vm13377_vm2, %v818_v11  ;;  %v795_v21 = vld [vmem:[%s9517_s18 + $0x49] sm:$0xff]  ;;  %v9545_v22 = vpack.c.bf16 %v793_v19, %v792_v18  ;;  %v796_v24 = vld [vmem:[%s9517_s18 + $0x51] sm:$0xff]  ;;  %v797_v25 = vld [vmem:[%s9517_s18 + $0x59] sm:$0xff]  ;;  %vm9651_vm5 = vcmp.ge.s32.totalorder %v13336_v2, 1  ;;  %v13730_v9 = vmov 0  ;;  %v9659_v11 = vadd.s32 64, %v9598_v49 }
  0x17   : > { %8259 = vmatmul.mubr.msk.bf16.vlgmr.msra.gmra.mrb[0].mxu0 %vm13377_vm2, %v9528_v15  ;;  %v9547_v23 = vpack.c.bf16 %v795_v21, %v794_v20  ;;  %v798_v26 = vld [vmem:[%s9517_s18 + $0x61] sm:$0xff]  ;;  %v799_v27 = vld [vmem:[%s9517_s18 + $0x69] sm:$0xff]  ;;  %v9557_v28 = vpack.c.bf16 %v797_v25, %v796_v24  ;;  %v800_v30 = vld [vmem:[%s9517_s18 + $0x71] sm:$0xff]  ;;  %13729 = vst [vmem:[#allocation22_spill] sm:$0xff] %v9647_v8  ;;  %v13731_v9 = vsel %vm9651_vm5, 4294967295, %v13730_v9  ;;  %v13335_v21 = vand.u32 15, %v9647_v8 }
  0x18   : > { %8291 = vmatpush3.bf16.msra.mxu0 %v1102_v6  ;;  %8262 = vmatprep.mubr.msk.bf16.mxu0 %vm13377_vm2, %v9530_v16  ;;  %13708 = vst [vmem:[#allocation5_spill] sm:$0xff] %v9545_v22  ;;  %v9559_v29 = vpack.c.bf16 %v799_v27, %v798_v26  ;;  %v801_v31 = vld [vmem:[%s9517_s18 + $0x79] sm:$0xff]  ;;  %v802_v32 = vld [vmem:[%s9517_s18 + $0x81] sm:$0xff]  ;;  %v803_v33 = vld [vmem:[%s9517_s18 + $0x89] sm:$0xff]  ;;  %v13334_v24 = vand.u32 15, %v9659_v11  ;;  %v13755_v2 = vmov 0 }
  0x19   : > { %8324 = vmatprep.subr.bf16.mxu0 %v9533_v17  ;;  %13709 = vst [vmem:[#allocation6_spill] sm:$0xff] %v9547_v23  ;;  %13710 = vst [vmem:[#allocation7_spill] sm:$0xff] %v9557_v28  ;;  %v9569_v34 = vpack.c.bf16 %v801_v31, %v800_v30  ;;  %v9571_v35 = vpack.c.bf16 %v803_v33, %v802_v32  ;;  %v804_v36 = vld [vmem:[%s9517_s18 + $0x91] sm:$0xff]  ;;  %v805_v37 = vld [vmem:[%s9517_s18 + $0x99] sm:$0xff]  ;;  %vm9685_vm6 = vcmp.ge.s32.totalorder %v13335_v21, 1  ;;  %v9693_v32 = vadd.s32 80, %v9598_v49 }
  0x1a   : > { %13711 = vst [vmem:[#allocation8_spill] sm:$0xff] %v9559_v29  ;;  %v806_v38 = vld [vmem:[%s9517_s18 + $0xa1] sm:$0xff]  ;;  %v807_v39 = vld [vmem:[%s9517_s18 + $0xa9] sm:$0xff]  ;;  %v9581_v40 = vpack.c.bf16 %v805_v37, %v804_v36  ;;  %v808_v42 = vld [vmem:[%s9517_s18 + $0xb1] sm:$0xff]  ;;  %vm9700_vm7 = vcmp.ge.s32.totalorder %v13334_v24, 1  ;;  %v9824_v21 = vadd.s32 176, %v9598_v49 }
  0x1b   : > { %13712 = vst [vmem:[#allocation9_spill] sm:$0xff] %v9569_v34  ;;  %13713 = vst [vmem:[#allocation10_spill] sm:$0xff] %v9571_v35  ;;  %v9583_v41 = vpack.c.bf16 %v807_v39, %v806_v38  ;;  %v809_v43 = vld [vmem:[%s9517_s18 + $0xb9] sm:$0xff]  ;;  %v810_v44 = vld [vmem:[%s9517_s18 + $0xc1] sm:$0xff]  ;;  %v9708_v38 = vadd.s32 96, %v9598_v49  ;;  %v13765_v60 = vmov 0 }
  0x1c   : > { %13714 = vst [vmem:[#allocation11_spill] sm:$0xff] %v9581_v40  ;;  %v811_v45 = vld [vmem:[%s9517_s18 + $0xc9] sm:$0xff]  ;;  %v9593_v47 = vpack.c.bf16 %v809_v43, %v808_v42  ;;  %v812_v50 = vld [vmem:[%s9517_s18 + $0xd1] sm:$0xff]  ;;  %v813_v51 = vld [vmem:[%s9517_s18 + $0xd9] sm:$0xff]  ;;  %v9908_v58 = vadd.s32 240, %v9598_v49 }
  0x1d   : > { %13715 = vst [vmem:[#allocation12_spill] sm:$0xff] %v9583_v41  ;;  %v9595_v48 = vpack.c.bf16 %v811_v45, %v810_v44  ;;  %v814_v52 = vld [vmem:[%s9517_s18 + $0xe1] sm:$0xff]  ;;  %v815_v53 = vld [vmem:[%s9517_s18 + $0xe9] sm:$0xff]  ;;  %v9609_v55 = vpack.c.bf16 %v813_v51, %v812_v50  ;;  %v816_v61 = vld [vmem:[%s9517_s18 + $0xf1] sm:$0xff]  ;;  %v13333_v45 = vand.u32 15, %v9693_v32 }
  0x1e   : > { %13716 = vst [vmem:[#allocation13_spill] sm:$0xff] %v9593_v47  ;;  %v9611_v56 = vpack.c.bf16 %v815_v53, %v814_v52  ;;  %v641_v59 = vld [vmem:[%s9517_s18] sm:$0xff]  ;;  %v642_v63 = vld [vmem:[%s9517_s18 + $0x8] sm:$0xff]  ;;  %v643_v7 = vld [vmem:[%s9517_s18 + $0x10] sm:$0xff] }
  0x1f   : > { %8263 = vmatmul.mubr.msk.bf16.gmra.mrb[4].mxu0 %vm13377_vm2, %v9545_v22  ;;  %13717 = vst [vmem:[#allocation14_spill] sm:$0xff] %v9595_v48  ;;  %13719 = vst [vmem:[#allocation16_spill] sm:$0xff] %v9609_v55  ;;  %v817_v62 = vld [vmem:[%s9517_s18 + $0xf9] sm:$0xff]  ;;  %v737_v0 = vsel %vm9618_vm3, %v641_v59, 0.0  ;;  %v1687_v13 = vsel %vm9618_vm3, %v643_v7, 0.0  ;;  %v739_v14 = vsel %vm9641_vm4, %v643_v7, 0.0 }
  0x20   : > { %8266 = vmatprep.mubr.msk.bf16.mxu0 %vm13377_vm2, %v9547_v23  ;;  %13720 = vst [vmem:[#allocation17_spill] sm:$0xff] %v9611_v56  ;;  %v9637_v3 = vpack.c.bf16 %v817_v62, %v816_v61  ;;  %v769_v5 = vpack.c.bf16 %v642_v63, %v737_v0  ;;  %13732 = vst [vmem:[#allocation23_spill] sm:$0xff] %v13731_v9  ;;  %v9656_v10 = vld [vmem:[%s9517_s18 + $0x20] sm:$0xff]  ;;  %v644_v12 = vld [vmem:[%s9517_s18 + $0x18] sm:$0xff]  ;;  %vm9732_vm8 = vcmp.ge.s32.totalorder %v13333_v45, 1  ;;  %v9740_v59 = vadd.s32 112, %v9598_v49 }
  0x21   : > { %13733 = vst [vmem:[#allocation24_spill] sm:$0xff] %v9659_v11  ;;  %v9669_v18 = vpack.c.bf16 %v644_v12, %v1687_v13  ;;  %v9672_v19 = vld [vmem:[%s9517_s18 + $0x28] sm:$0xff]  ;;  %v741_v20 = vsel %vm9651_vm5, %v9656_v10, 0.0  ;;  %v7659_v25 = vld [vmem:[%s13320_s1 + $0x6] sm:$0x3]  ;;  %v770_v26 = vpack.c.bf16 %v644_v12, %v739_v14  ;;  %v9690_v31 = vld [vmem:[%s9517_s18 + $0x30] sm:$0xff] }
  0x22   : > { %13726 = vst [vmem:[#allocation21_spill] sm:$0xff] %v9637_v3  ;;  %v771_v27 = vpack.c.bf16 %v9672_v19, %v741_v20  ;;  %13736 = vst [vmem:[#allocation25_spill] sm:$0xff] %v9693_v32  ;;  %v9696_v33 = vand.u32 %v7659_v25, %v9507_v4  ;;  %v9705_v37 = vld [vmem:[%s9517_s18 + $0x40] sm:$0xff]  ;;  %v9714_v39 = vld [vmem:[%s9517_s18 + $0x38] sm:$0xff]  ;;  %v743_v42 = vsel %vm9685_vm6, %v9690_v31, 0.0  ;;  %v9752_v63 = vadd.s32 128, %v9598_v49 }
  0x23   : > { %13739 = vst [vmem:[#allocation26_spill] sm:$0xff] %v9708_v38  ;;  %v9720_v43 = vld [vmem:[%s9517_s18 + $0x48] sm:$0xff]  ;;  %v745_v44 = vsel %vm9700_vm7, %v9705_v37, 0.0  ;;  %v772_v50 = vpack.c.bf16 %v9714_v39, %v743_v42  ;;  %v9737_v53 = vld [vmem:[%s9517_s18 + $0x50] sm:$0xff]  ;;  %13742 = vst [vmem:[#allocation27_spill] sm:$0xff] %v9740_v59  ;;  %v13331_v13 = vand.u32 15, %v9740_v59 }
  0x24   : > { %v773_v51 = vpack.c.bf16 %v9720_v43, %v745_v44  ;;  %v9749_v62 = vld [vmem:[%s9517_s18 + $0x60] sm:$0xff]  ;;  %13745 = vst [vmem:[#allocation28_spill] sm:$0xff] %v9752_v63  ;;  %v9757_v0 = vld [vmem:[%s9517_s18 + $0x58] sm:$0xff]  ;;  %v9763_v7 = vld [vmem:[%s9517_s18 + $0x68] sm:$0xff]  ;;  %v13330_v14 = vand.u32 15, %v9752_v63  ;;  %v9782_v42 = vadd.s32 144, %v9598_v49 }
  0x25   : > { %vm9774_vm10 = vcmp.ge.s32.totalorder %v13331_v13, 1  ;;  %v9805_v46 = vld [vmem:[%s9517_s18 + $0x88] sm:$0xff]  ;;  %v13752_v45 = vmov 0  ;;  %v9821_v24 = vld [vmem:[%s9517_s18 + $0x90] sm:$0xff]  ;;  %13754 = vst [vmem:[#allocation31_spill] sm:$0xff] %v9824_v21  ;;  %v13758_v63 = vmov 0 }
  0x26   : > { %13748 = vst [vmem:[#allocation29_spill] sm:$0xff] %v9782_v42  ;;  %vm9786_vm11 = vcmp.ge.s32.totalorder %v13330_v14, 1  ;;  %v13337_v13 = vand.u32 15, %v9782_v42  ;;  %v9847_v1 = vld [vmem:[%s9517_s18 + $0xa8] sm:$0xff]  ;;  %v9863_v59 = vld [vmem:[%s9517_s18 + $0xb0] sm:$0xff]  ;;  %v13761_v32 = vmov 0 }
  0x27   : > { %8267 = vmatmul.mubr.msk.bf16.gmra.mrb[8].mxu0 %vm13377_vm2, %v9557_v28  ;;  %v9905_v57 = vld [vmem:[%s9517_s18 + $0xd0] sm:$0xff]  ;;  %13768 = vst [vmem:[#allocation37_spill] sm:$0xff] %v9908_v58  ;;  %v9983_v28 = vld [vmem:[%s9517_s18 + $0x1a] sm:$0xff]  ;;  %v9986_v23 = vadd.s32 56, %v9598_v49  ;;  %v1695_v9 = vsel %vm9700_vm7, %v9737_v53, 0.0  ;;  %v2639_v6 = vsel %vm9685_vm6, %v9737_v53, 0.0 }
  0x28   : > { %8270 = vmatprep.mubr.msk.bf16.mxu0 %vm13377_vm2, %v9559_v29  ;;  %vm9816_vm12 = vcmp.ge.s32.totalorder %v13337_v13, 1  ;;  %v9841_v13 = vld [vmem:[%s9517_s18 + $0x98] sm:$0xff]  ;;  %13787 = vst [vmem:[#allocation46_spill] sm:$0xff] %v9983_v28 }
  0x29   : > { %v13753_v45 = vsel %vm9816_vm12, 4294967295, %v13752_v45  ;;  %13788 = vst [vmem:[#allocation47_spill] sm:$0xff] %v9986_v23 }
  0x2f   : > { %8271 = vmatmul.mubr.msk.bf16.gmra.mrb[12].mxu0 %vm13377_vm2, %v9569_v34 }
  0x30   : > { %8274 = vmatprep.mubr.msk.bf16.mxu0 %vm13377_vm2, %v9571_v35 }
  0x37   : > { %8275 = vmatmul.mubr.msk.bf16.gmra.mrb[16].mxu0 %vm13377_vm2, %v9581_v40  ;;  %v13777_v40 = vmov 0 }
  0x38   : > { %8278 = vmatprep.mubr.msk.bf16.mxu0 %vm13377_vm2, %v9583_v41  ;;  %v9950_v41 = vadd.s32 24, %v9598_v49 }
  0x3a   : > { %13776 = vst [vmem:[#allocation41_spill] sm:$0xff] %v9950_v41  ;;  %v13402_v35 = vand.u32 15, %v9950_v41  ;;  %v13418_v41 = vand.u32 15, %v9986_v23 }
  0x3f   : > { %8279 = vmatmul.mubr.msk.bf16.gmra.mrb[20].mxu0 %vm13377_vm2, %v9593_v47  ;;  %v9947_v47 = vld [vmem:[%s9517_s18 + $0xf0] sm:$0xff] }
  0x40   : > { %8282 = vmatprep.mubr.msk.bf16.mxu0 %vm13377_vm2, %v9595_v48  ;;  %v13773_v48 = vmov 0 }
  0x47   : > { %8283 = vmatmul.mubr.msk.bf16.gmra.mrb[24].mxu0 %vm13377_vm2, %v9609_v55 }
  0x48   : > { %8286 = vmatprep.mubr.msk.bf16.mxu0 %vm13377_vm2, %v9611_v56  ;;  %v13387_v56 = vand.u32 15, %v9908_v58 }
  0x4f   : > { %8287 = vmatmul.mubr.msk.bf16.gmra.mrb[28].mxu0 %vm13377_vm2, %v9637_v3  ;;  %v13769_v3 = vmov 0 }
  0x50   : > { %8292 = vmatprep.mubr.msk.bf16.mxu0 %vm13377_vm2, %v769_v5  ;;  %v747_v5 = vsel %vm9732_vm8, %v9737_v53, 0.0 }
  0x51   : > { %v774_v20 = vpack.c.bf16 %v9757_v0, %v747_v5  ;;  %v9799_v5 = vld [vmem:[%s9517_s18 + $0x78] sm:$0xff] }
  0x57   : > { %8293 = vmatmul.mubr.msk.bf16.vlgmr.msra.gmra.mrb[0].mxu0 %vm13377_vm2, %v770_v26 }
  0x58   : > { %8325 = vmatpush3.bf16.msra.mxu0 %v9533_v17  ;;  %8296 = vmatprep.mubr.msk.bf16.mxu0 %vm13377_vm2, %v771_v27  ;;  %v13332_v17 = vand.u32 15, %v9708_v38  ;;  %v9779_v27 = vld [vmem:[%s9517_s18 + $0x70] sm:$0xff]  ;;  %v9866_v38 = vadd.s32 208, %v9598_v49 }
  0x59   : > { %8358 = vmatprep.subr.bf16.mxu0 %v9696_v33 }
  0x5a   : > { %vm9744_vm9 = vcmp.ge.s32.totalorder %v13332_v17, 1  ;;  %13760 = vst [vmem:[#allocation33_spill] sm:$0xff] %v9866_v38  ;;  %v13369_v11 = vand.u32 15, %v9866_v38 }
  0x5b   : > { %v749_v12 = vsel %vm9744_vm9, %v9749_v62, 0.0 }
  0x5c   : > { %v775_v25 = vpack.c.bf16 %v9763_v7, %v749_v12  ;;  %v751_v12 = vsel %vm9774_vm10, %v9779_v27, 0.0  ;;  %vm9900_vm0 = vcmp.ge.s32.totalorder %v13369_v11, 1  ;;  %v9925_v11 = vld [vmem:[%s9517_s18 + $0xd8] sm:$0xff] }
  0x5d   : > { %v13766_v60 = vsel %vm9900_vm0, 4294967295, %v13765_v60 }
  0x5e   : > { %13767 = vst [vmem:[#allocation36_spill] sm:$0xff] %v13766_v60 }
  0x5f   : > { %8297 = vmatmul.mubr.msk.bf16.gmra.mrb[4].mxu0 %vm13377_vm2, %v772_v50  ;;  %v9791_v50 = vld [vmem:[%s9517_s18 + $0x80] sm:$0xff] }
  0x60   : > { %8300 = vmatprep.mubr.msk.bf16.mxu0 %vm13377_vm2, %v773_v51  ;;  %v9794_v51 = vadd.s32 160, %v9598_v49  ;;  %v753_v14 = vsel %vm9786_vm11, %v9791_v50, 0.0  ;;  %v2645_v30 = vsel %vm9744_vm9, %v9791_v50, 0.0 }
  0x61   : > { %v777_v17 = vpack.c.bf16 %v9805_v46, %v753_v14  ;;  %v9836_v14 = vadd.s32 192, %v9598_v49 }
  0x62   : > { %13751 = vst [vmem:[#allocation30_spill] sm:$0xff] %v9794_v51 }
  0x63   : > { %13757 = vst [vmem:[#allocation32_spill] sm:$0xff] %v9836_v14 }
  0x67   : > { %8301 = vmatmul.mubr.msk.bf16.gmra.mrb[8].mxu0 %vm13377_vm2, %v774_v20  ;;  %v13338_v20 = vand.u32 15, %v9794_v51  ;;  %v13353_v51 = vand.u32 15, %v9824_v21 }
  0x68   : > { %8304 = vmatprep.mubr.msk.bf16.mxu0 %vm13377_vm2, %v775_v25  ;;  %v776_v25 = vpack.c.bf16 %v9799_v5, %v751_v12  ;;  %v9833_v12 = vld [vmem:[%s9517_s18 + $0xa0] sm:$0xff] }
  0x69   : > { %vm9828_vm13 = vcmp.ge.s32.totalorder %v13338_v20, 1  ;;  %v755_v20 = vsel %vm9816_vm12, %v9821_v24, 0.0  ;;  %vm9858_vm14 = vcmp.ge.s32.totalorder %v13353_v51, 1  ;;  %v9883_v51 = vld [vmem:[%s9517_s18 + $0xb8] sm:$0xff]  ;;  %v2649_v52 = vsel %vm9786_vm11, %v9833_v12, 0.0 }
  0x6a   : > { %v13756_v2 = vsel %vm9828_vm13, 4294967295, %v13755_v2  ;;  %v757_v54 = vsel %vm9828_vm13, %v9833_v12, 0.0  ;;  %v13759_v63 = vsel %vm9858_vm14, 4294967295, %v13758_v63  ;;  %v2673_v61 = vpack.c.bf16 %v9847_v1, %v2649_v52 }
  0x6b   : > { %v779_v42 = vpack.c.bf16 %v9847_v1, %v757_v54  ;;  %v9878_v54 = vadd.s32 224, %v9598_v49 }
  0x6d   : > { %13764 = vst [vmem:[#allocation35_spill] sm:$0xff] %v9878_v54 }
  0x6f   : > { %8305 = vmatmul.mubr.msk.bf16.gmra.mrb[12].mxu0 %vm13377_vm2, %v776_v25  ;;  %v13354_v25 = vand.u32 15, %v9836_v14  ;;  %v9889_v14 = vld [vmem:[%s9517_s18 + $0xc8] sm:$0xff] }
  0x70   : > { %8308 = vmatprep.mubr.msk.bf16.mxu0 %vm13377_vm2, %v777_v17  ;;  %v778_v17 = vpack.c.bf16 %v9841_v13, %v755_v20  ;;  %v9875_v20 = vld [vmem:[%s9517_s18 + $0xc0] sm:$0xff] }
  0x71   : > { %vm9870_vm15 = vcmp.ge.s32.totalorder %v13354_v25, 1  ;;  %v759_v25 = vsel %vm9858_vm14, %v9863_v59, 0.0 }
  0x72   : > { %v13762_v32 = vsel %vm9870_vm15, 4294967295, %v13761_v32  ;;  %v761_v21 = vsel %vm9870_vm15, %v9875_v20, 0.0 }
  0x73   : > { %13763 = vst [vmem:[#allocation34_spill] sm:$0xff] %v13762_v32  ;;  %v781_v8 = vpack.c.bf16 %v9889_v14, %v761_v21  ;;  %v9920_v21 = vadd.s32 8, %v9598_v49 }
  0x75   : > { %13772 = vst [vmem:[#allocation39_spill] sm:$0xff] %v9920_v21 }
  0x77   : > { %8309 = vmatmul.mubr.msk.bf16.gmra.mrb[16].mxu0 %vm13377_vm2, %v778_v17  ;;  %v13370_v17 = vand.u32 15, %v9878_v54  ;;  %v9931_v54 = vld [vmem:[%s9517_s18 + $0xe8] sm:$0xff] }
  0x78   : > { %8312 = vmatprep.mubr.msk.bf16.mxu0 %vm13377_vm2, %v779_v42  ;;  %v780_v42 = vpack.c.bf16 %v9883_v51, %v759_v25  ;;  %v9917_v25 = vld [vmem:[%s9517_s18 + $0xe0] sm:$0xff] }
  0x79   : > { %vm9912_vm1 = vcmp.ge.s32.totalorder %v13370_v17, 1  ;;  %v763_v17 = vsel %vm9900_vm0, %v9905_v57, 0.0 }
  0x7a   : > { %v13770_v3 = vsel %vm9912_vm1, 4294967295, %v13769_v3  ;;  %v765_v38 = vsel %vm9912_vm1, %v9917_v25, 0.0  ;;  %vm13781_vm1 = vcmask 23552  }
  0x7b   : > { %13771 = vst [vmem:[#allocation38_spill] sm:$0xff] %v13770_v3  ;;  %v783_v55 = vpack.c.bf16 %v9931_v54, %v765_v38  ;;  %v9960_v38 = vadd.s32 40, %v9598_v49  ;;  %vm13782_vm0 = vmmov %vm13781_vm1 }
  0x7d   : > { %13780 = vst [vmem:[#allocation43_spill] sm:$0xff] %v9960_v38  ;;  %v13403_v34 = vand.u32 15, %v9960_v38 }
  0x7f   : > { %8313 = vmatmul.mubr.msk.bf16.gmra.mrb[20].mxu0 %vm13377_vm2, %v780_v42  ;;  %v13390_v42 = vand.u32 15, %v9920_v21 }
  0x80   : > { %8316 = vmatprep.mubr.msk.bf16.mxu0 %vm13377_vm2, %v781_v8  ;;  %v782_v8 = vpack.c.bf16 %v9925_v11, %v763_v17  ;;  %vm9942_vm2 = vcmp.ge.s32.totalorder %v13387_v56, 1  ;;  %v1266_v17 = vld [vmem:[%s9517_s18 + $0xa] sm:$0xff]  ;;  %v9965_v56 = vld [vmem:[%s9517_s18 + $0xf8] sm:$0xff] }
  0x81   : > { %v13774_v48 = vsel %vm9942_vm2, 4294967295, %v13773_v48  ;;  %vm9954_vm3 = vcmp.le.s32.totalorder %v13390_v42, 14  ;;  %13783 = vst [vmem:[#allocation44_spill] sm:$0xff] %v9965_v56  ;;  %v767_v58 = vsel %vm9942_vm2, %v9947_v47, 0.0  ;;  %v1265_v42 = vld [vmem:[%s9517_s18 + $0x2] sm:$0xff] }
  0x82   : > { %13775 = vst [vmem:[#allocation40_spill] sm:$0xff] %v13774_v48  ;;  %v13778_v40 = vsel %vm9954_vm3, 4294967295, %v13777_v40  ;;  %v1362_v21 = vsel %vm9954_vm3, %v1266_v17, 0.0  ;;  %v13789_v17 = vmov 0  ;;  %vm13794_vm3 = vcmask 23552  }
  0x83   : > { %13779 = vst [vmem:[#allocation42_spill] sm:$0xff] %v13778_v40  ;;  %v1393_v29 = vpack.c.bf16 %v1362_v21, %v1265_v42  ;;  %v9998_v21 = vadd.s32 72, %v9598_v49  ;;  %vm13795_vm2 = vmmov %vm13794_vm3  ;;  %v10003_v42 = vld [vmem:[%s9517_s18 + $0x12] sm:$0xff] }
  0x85   : > { %13793 = vst [vmem:[#allocation50_spill] sm:$0xff] %v9998_v21  ;;  %v13802_v22 = vand.u32 15, %v9998_v21  ;;  %v10058_v21 = vld [vmem:[%s9517_s18 + $0x42] sm:$0xff] }
  0x86   : > { %13811 = vst [vmem:[#allocation59_spill] sm:$0xff] %v10058_v21 }
  0x87   : > { %8317 = vmatmul.mubr.msk.bf16.gmra.mrb[24].mxu0 %vm13781_vm1, %v782_v8  ;;  %v784_v8 = vpack.c.bf16 %v9965_v56, %v767_v58  ;;  %vm9990_vm1 = vcmp.le.s32.totalorder %v13403_v34, 14  ;;  %v9995_v58 = vld [vmem:[%s9517_s18 + $0x2a] sm:$0xff]  ;;  %v10009_v34 = vld [vmem:[%s9517_s18 + $0x22] sm:$0xff] }
  0x88   : > { %8320 = vmatprep.mubr.msk.bf16.mxu0 %vm13782_vm0, %v783_v55  ;;  %vm9978_vm0 = vcmp.le.s32.totalorder %v13402_v35, 14  ;;  %v13784_v55 = vmov 0  ;;  %v13790_v17 = vsel %vm9990_vm1, 4294967295, %v13789_v17  ;;  %13792 = vst [vmem:[#allocation49_spill] sm:$0xff] %v9995_v58  ;;  %13796 = vst [vmem:[#allocation51_spill] sm:$0xff] %v10009_v34  ;;  %v1366_v38 = vsel %vm9990_vm1, %v9995_v58, 0.0 }
  0x89   : > { %v13785_v55 = vsel %vm9978_vm0, 4294967295, %v13784_v55  ;;  %13791 = vst [vmem:[#allocation48_spill] sm:$0xff] %v13790_v17  ;;  %v1364_v35 = vsel %vm9978_vm0, %v9983_v28, 0.0  ;;  %v13797_v28 = vmov 0  ;;  %v10028_v17 = vld [vmem:[%s9517_s18 + $0x3a] sm:$0xff]  ;;  %v10031_v58 = vadd.s32 88, %v9598_v49 }
  0x8a   : > { %13786 = vst [vmem:[#allocation45_spill] sm:$0xff] %v13785_v55  ;;  %v1394_v40 = vpack.c.bf16 %v1364_v35, %v10003_v42  ;;  %v1395_v55 = vpack.c.bf16 %v1366_v38, %v10009_v34  ;;  %13800 = vst [vmem:[#allocation53_spill] sm:$0xff] %v10028_v17  ;;  %v13803_v35 = vmov 0  ;;  %v10043_v38 = vld [vmem:[%s9517_s18 + $0x4a] sm:$0xff]  ;;  %vm13808_vm1 = vcmask 23552   ;;  %v14018_v44 = vld [vmem:[#allocation44_spill] sm:$0xff] }
  0x8b   : > { %13801 = vst [vmem:[#allocation54_spill] sm:$0xff] %v10031_v58  ;;  %13806 = vst [vmem:[#allocation56_spill] sm:$0xff] %v10043_v38 }
  0x8c   : > { %vm13809_vm0 = vmmov %vm13808_vm1 }
  0x8f   : > { %8321 = vmatmul.mubr.msk.bf16.gmra.mrb[28].mxu0 %vm13794_vm3, %v784_v8  ;;  %vm10038_vm3 = vcmp.le.s32.totalorder %v13802_v22, 14 }
  0x90   : > { %8326 = vmatprep.mubr.msk.bf16.mxu0 %vm13795_vm2, %v1393_v29  ;;  %v7676_v29 = vld [vmem:[%s13320_s1 + $0x8] sm:$0x3]  ;;  %vm10023_vm2 = vcmp.le.s32.totalorder %v13418_v41, 14  ;;  %v13804_v35 = vsel %vm10038_vm3, 4294967295, %v13803_v35  ;;  %v10046_v41 = vadd.s32 104, %v9598_v49  ;;  %v1370_v23 = vsel %vm10038_vm3, %v10043_v38, 0.0 }
  0x91   : > { %v13798_v28 = vsel %vm10023_vm2, 4294967295, %v13797_v28  ;;  %v10034_v8 = vand.u32 %v7676_v29, %v9507_v4  ;;  %13805 = vst [vmem:[#allocation55_spill] sm:$0xff] %v13804_v35  ;;  %v10052_v29 = vld [vmem:[%s9517_s18 + $0x32] sm:$0xff]  ;;  %v1368_v22 = vsel %vm10023_vm2, %v10028_v17, 0.0  ;;  %v1397_v34 = vpack.c.bf16 %v1370_v23, %v10058_v21  ;;  %v10075_v17 = vld [vmem:[%s9517_s18 + $0x5a] sm:$0xff] }
  0x92   : > { %13799 = vst [vmem:[#allocation52_spill] sm:$0xff] %v13798_v28  ;;  %13807 = vst [vmem:[#allocation57_spill] sm:$0xff] %v10046_v41  ;;  %v13812_v28 = vmov 0  ;;  %v10078_v35 = vadd.s32 120, %v9598_v49  ;;  %v13817_v38 = vmov 0  ;;  %v10090_v23 = vadd.s32 136, %v9598_v49 }
  0x93   : > { %13810 = vst [vmem:[#allocation58_spill] sm:$0xff] %v10052_v29  ;;  %13815 = vst [vmem:[#allocation61_spill] sm:$0xff] %v10075_v17  ;;  %vm13822_vm3 = vcmask 23552  }
  0x94   : > { %13816 = vst [vmem:[#allocation62_spill] sm:$0xff] %v10078_v35  ;;  %13821 = vst [vmem:[#allocation65_spill] sm:$0xff] %v10090_v23  ;;  %v13463_v21 = vand.u32 15, %v10078_v35 }
  0x95   : > { %vm13823_vm2 = vmmov %vm13822_vm3 }
  0x97   : > { %8327 = vmatmul.mubr.msk.bf16.vlgmr.msra.gmra.mrb[0].mxu0 %vm13808_vm1, %v1394_v40  ;;  %v13441_v40 = vand.u32 15, %v10031_v58 }
  0x98   : > { %8359 = vmatpush3.bf16.msra.mxu0 %v9696_v33  ;;  %8330 = vmatprep.mubr.msk.bf16.mxu0 %vm13809_vm0, %v1395_v55  ;;  %v13442_v33 = vand.u32 15, %v10046_v41  ;;  %v1396_v55 = vpack.c.bf16 %v1368_v22, %v10052_v29  ;;  %v10087_v22 = vld [vmem:[%s9517_s18 + $0x6a] sm:$0xff]  ;;  %v10101_v41 = vld [vmem:[%s9517_s18 + $0x62] sm:$0xff] }
  0x99   : > { %8392 = vmatprep.subr.bf16.mxu0 %v10034_v8  ;;  %vm10070_vm0 = vcmp.le.s32.totalorder %v13441_v40, 14  ;;  %13820 = vst [vmem:[#allocation64_spill] sm:$0xff] %v10087_v22  ;;  %v10095_v40 = vld [vmem:[%s9517_s18 + $0x52] sm:$0xff]  ;;  %13825 = vst [vmem:[#allocation67_spill] sm:$0xff] %v10101_v41 }
  0x9a   : > { %v13813_v28 = vsel %vm10070_vm0, 4294967295, %v13812_v28  ;;  %vm10082_vm1 = vcmp.le.s32.totalorder %v13442_v33, 14  ;;  %13824 = vst [vmem:[#allocation66_spill] sm:$0xff] %v10095_v40  ;;  %v1372_v33 = vsel %vm10070_vm0, %v10075_v17, 0.0  ;;  %v10117_v17 = vld [vmem:[%s9517_s18 + $0x7a] sm:$0xff] }
  0x9b   : > { %13814 = vst [vmem:[#allocation60_spill] sm:$0xff] %v13813_v28  ;;  %v13818_v38 = vsel %vm10082_vm1, 4294967295, %v13817_v38  ;;  %v1374_v58 = vsel %vm10082_vm1, %v10087_v22, 0.0  ;;  %v13826_v28 = vmov 0  ;;  %13829 = vst [vmem:[#allocation69_spill] sm:$0xff] %v10117_v17  ;;  %v13831_v22 = vmov 0 }
  0x9c   : > { %13819 = vst [vmem:[#allocation63_spill] sm:$0xff] %v13818_v38  ;;  %v1399_v29 = vpack.c.bf16 %v1374_v58, %v10101_v41  ;;  %v10120_v38 = vadd.s32 152, %v9598_v49  ;;  %v10132_v58 = vadd.s32 168, %v9598_v49  ;;  %vm13836_vm1 = vcmask 23552  }
  0x9d   : > { %vm13837_vm0 = vmmov %vm13836_vm1 }
  0x9e   : > { %13830 = vst [vmem:[#allocation70_spill] sm:$0xff] %v10120_v38  ;;  %13835 = vst [vmem:[#allocation73_spill] sm:$0xff] %v10132_v58  ;;  %v13485_v41 = vand.u32 15, %v10120_v38 }
  0x9f   : > { %8331 = vmatmul.mubr.msk.bf16.gmra.mrb[4].mxu0 %vm13822_vm3, %v1396_v55  ;;  %v13464_v55 = vand.u32 15, %v10090_v23  ;;  %v10143_v23 = vld [vmem:[%s9517_s18 + $0x82] sm:$0xff] }
  0xa0   : > { %8334 = vmatprep.mubr.msk.bf16.mxu0 %vm13823_vm2, %v1397_v34  ;;  %v1398_v34 = vpack.c.bf16 %v1372_v33, %v10095_v40  ;;  %vm10112_vm2 = vcmp.le.s32.totalorder %v13463_v21, 14  ;;  %v10129_v33 = vld [vmem:[%s9517_s18 + $0x8a] sm:$0xff]  ;;  %v10137_v21 = vld [vmem:[%s9517_s18 + $0x72] sm:$0xff]  ;;  %13839 = vst [vmem:[#allocation75_spill] sm:$0xff] %v10143_v23 }
  0xa1   : > { %v13827_v28 = vsel %vm10112_vm2, 4294967295, %v13826_v28  ;;  %vm10124_vm3 = vcmp.le.s32.totalorder %v13464_v55, 14  ;;  %13834 = vst [vmem:[#allocation72_spill] sm:$0xff] %v10129_v33  ;;  %13838 = vst [vmem:[#allocation74_spill] sm:$0xff] %v10137_v21  ;;  %v1376_v55 = vsel %vm10112_vm2, %v10117_v17, 0.0  ;;  %v10159_v17 = vld [vmem:[%s9517_s18 + $0x9a] sm:$0xff] }
  0xa2   : > { %13828 = vst [vmem:[#allocation68_spill] sm:$0xff] %v13827_v28  ;;  %v13832_v22 = vsel %vm10124_vm3, 4294967295, %v13831_v22  ;;  %v1378_v35 = vsel %vm10124_vm3, %v10129_v33, 0.0  ;;  %v13840_v28 = vmov 0  ;;  %13843 = vst [vmem:[#allocation77_spill] sm:$0xff] %v10159_v17  ;;  %v13845_v33 = vmov 0 }
  0xa3   : > { %13833 = vst [vmem:[#allocation71_spill] sm:$0xff] %v13832_v22  ;;  %v1401_v40 = vpack.c.bf16 %v1378_v35, %v10143_v23  ;;  %v10162_v22 = vadd.s32 184, %v9598_v49  ;;  %v10174_v35 = vadd.s32 200, %v9598_v49  ;;  %vm13850_vm3 = vcmask 23552  }
  0xa4   : > { %vm13851_vm2 = vmmov %vm13850_vm3 }
  0xa5   : > { %13844 = vst [vmem:[#allocation78_spill] sm:$0xff] %v10162_v22  ;;  %13849 = vst [vmem:[#allocation81_spill] sm:$0xff] %v10174_v35  ;;  %v13507_v23 = vand.u32 15, %v10162_v22 }
  0xa7   : > { %8335 = vmatmul.mubr.msk.bf16.gmra.mrb[8].mxu0 %vm13836_vm1, %v1398_v34  ;;  %v13486_v34 = vand.u32 15, %v10132_v58  ;;  %v10185_v58 = vld [vmem:[%s9517_s18 + $0xa2] sm:$0xff] }
  0xa8   : > { %8338 = vmatprep.mubr.msk.bf16.mxu0 %vm13837_vm0, %v1399_v29  ;;  %v1400_v29 = vpack.c.bf16 %v1376_v55, %v10137_v21  ;;  %vm10154_vm0 = vcmp.le.s32.totalorder %v13485_v41, 14  ;;  %v10171_v55 = vld [vmem:[%s9517_s18 + $0xaa] sm:$0xff]  ;;  %v10179_v41 = vld [vmem:[%s9517_s18 + $0x92] sm:$0xff]  ;;  %13853 = vst [vmem:[#allocation83_spill] sm:$0xff] %v10185_v58 }
  0xa9   : > { %v13841_v28 = vsel %vm10154_vm0, 4294967295, %v13840_v28  ;;  %vm10166_vm1 = vcmp.le.s32.totalorder %v13486_v34, 14  ;;  %13848 = vst [vmem:[#allocation80_spill] sm:$0xff] %v10171_v55  ;;  %13852 = vst [vmem:[#allocation82_spill] sm:$0xff] %v10179_v41  ;;  %v1380_v34 = vsel %vm10154_vm0, %v10159_v17, 0.0  ;;  %v10201_v17 = vld [vmem:[%s9517_s18 + $0xba] sm:$0xff] }
  0xaa   : > { %13842 = vst [vmem:[#allocation76_spill] sm:$0xff] %v13841_v28  ;;  %v13846_v33 = vsel %vm10166_vm1, 4294967295, %v13845_v33  ;;  %v1382_v38 = vsel %vm10166_vm1, %v10171_v55, 0.0  ;;  %v13854_v28 = vmov 0  ;;  %13857 = vst [vmem:[#allocation85_spill] sm:$0xff] %v10201_v17  ;;  %v13859_v55 = vmov 0 }
  0xab   : > { %13847 = vst [vmem:[#allocation79_spill] sm:$0xff] %v13846_v33  ;;  %v1403_v21 = vpack.c.bf16 %v1382_v38, %v10185_v58  ;;  %v10204_v33 = vadd.s32 216, %v9598_v49  ;;  %v10216_v38 = vadd.s32 232, %v9598_v49  ;;  %vm13864_vm1 = vcmask 23552  }
  0xac   : > { %vm13865_vm0 = vmmov %vm13864_vm1 }
  0xad   : > { %13858 = vst [vmem:[#allocation86_spill] sm:$0xff] %v10204_v33  ;;  %13863 = vst [vmem:[#allocation89_spill] sm:$0xff] %v10216_v38  ;;  %v13529_v58 = vand.u32 15, %v10204_v33  ;;  %v10266_v33 = vld [vmem:[%s9517_s18 + $0xe2] sm:$0xff] }
  0xaf   : > { %8339 = vmatmul.mubr.msk.bf16.gmra.mrb[12].mxu0 %vm13850_vm3, %v1400_v29  ;;  %v13508_v29 = vand.u32 15, %v10174_v35  ;;  %v10227_v35 = vld [vmem:[%s9517_s18 + $0xc2] sm:$0xff] }
  0xb0   : > { %8342 = vmatprep.mubr.msk.bf16.mxu0 %vm13851_vm2, %v1401_v40  ;;  %v1402_v40 = vpack.c.bf16 %v1380_v34, %v10179_v41  ;;  %vm10196_vm2 = vcmp.le.s32.totalorder %v13507_v23, 14  ;;  %v10213_v34 = vld [vmem:[%s9517_s18 + $0xca] sm:$0xff]  ;;  %v10221_v23 = vld [vmem:[%s9517_s18 + $0xb2] sm:$0xff] }
  0xb1   : > { %v13855_v28 = vsel %vm10196_vm2, 4294967295, %v13854_v28  ;;  %vm10208_vm3 = vcmp.le.s32.totalorder %v13508_v29, 14  ;;  %13862 = vst [vmem:[#allocation88_spill] sm:$0xff] %v10213_v34  ;;  %v1384_v29 = vsel %vm10196_vm2, %v10201_v17, 0.0  ;;  %v10243_v17 = vld [vmem:[%s9517_s18 + $0xda] sm:$0xff] }
  0xb2   : > { %13856 = vst [vmem:[#allocation84_spill] sm:$0xff] %v13855_v28  ;;  %v13860_v55 = vsel %vm10208_vm3, 4294967295, %v13859_v55  ;;  %v1386_v22 = vsel %vm10208_vm3, %v10213_v34, 0.0  ;;  %v13866_v28 = vmov 0  ;;  %13869 = vst [vmem:[#allocation91_spill] sm:$0xff] %v10243_v17  ;;  %v13871_v34 = vmov 0 }
  0xb3   : > { %13861 = vst [vmem:[#allocation87_spill] sm:$0xff] %v13860_v55  ;;  %v1405_v41 = vpack.c.bf16 %v1386_v22, %v10227_v35  ;;  %v10246_v55 = vadd.s32 248, %v9598_v49  ;;  %v10255_v22 = vld [vmem:[%s9517_s18 + $0xea] sm:$0xff]  ;;  %vm13874_vm3 = vcmask 23552  }
  0xb4   : > { %vm13875_vm2 = vmmov %vm13874_vm3 }
  0xb5   : > { %13870 = vst [vmem:[#allocation92_spill] sm:$0xff] %v10246_v55 }
  0xb7   : > { %8343 = vmatmul.mubr.msk.bf16.gmra.mrb[16].mxu0 %vm13864_vm1, %v1402_v40  ;;  %v13532_v40 = vand.u32 15, %v10216_v38  ;;  %v13547_v38 = vand.u32 15, %v10246_v55 }
  0xb8   : > { %8346 = vmatprep.mubr.msk.bf16.mxu0 %vm13865_vm0, %v1403_v21  ;;  %v1404_v21 = vpack.c.bf16 %v1384_v29, %v10221_v23  ;;  %vm10238_vm0 = vcmp.le.s32.totalorder %v13529_v58, 14  ;;  %v10260_v29 = vld [vmem:[%s9517_s18 + $0xd2] sm:$0xff] }
  0xb9   : > { %v13867_v28 = vsel %vm10238_vm0, 4294967295, %v13866_v28  ;;  %vm10250_vm1 = vcmp.le.s32.totalorder %v13532_v40, 14  ;;  %v1388_v58 = vsel %vm10238_vm0, %v10243_v17, 0.0  ;;  %vm13879_vm0 = vmmov %vm13874_vm3 }
  0xba   : > { %13868 = vst [vmem:[#allocation90_spill] sm:$0xff] %v13867_v28  ;;  %v13872_v34 = vsel %vm10250_vm1, 4294967295, %v13871_v34  ;;  %v1390_v40 = vsel %vm10250_vm1, %v10255_v22, 0.0  ;;  %v1406_v49 = vpack.c.bf16 %v1388_v58, %v10260_v29  ;;  %v10281_v28 = vld [vmem:[%s9517_s18 + $0xfa] sm:$0xff]  ;;  %vm13880_vm1 = vmmov %vm13879_vm0 }
  0xbb   : > { %13873 = vst [vmem:[#allocation93_spill] sm:$0xff] %v13872_v34  ;;  %v10286_v34 = vld [vmem:[%s9517_s18 + $0xf2] sm:$0xff]  ;;  %vm13881_vm15 = vmmov %vm13879_vm0 }
  0xbf   : > { %8347 = vmatmul.mubr.msk.bf16.gmra.mrb[20].mxu0 %vm13874_vm3, %v1404_v21  ;;  %v1407_v21 = vpack.c.bf16 %v1390_v40, %v10266_v33 }
  0xc0   : > { %8350 = vmatprep.mubr.msk.bf16.mxu0 %vm13875_vm2, %v1405_v41  ;;  %vm10276_vm2 = vcmp.le.s32.totalorder %v13547_v38, 14  ;;  %v13876_v41 = vmov 0  ;;  %v1689_v38 = vsel %vm9641_vm4, %v9656_v10, 0.0 }
  0xc1   : > { %v13877_v41 = vsel %vm10276_vm2, 4294967295, %v13876_v41  ;;  %v1392_v58 = vsel %vm10276_vm2, %v10281_v28, 0.0  ;;  %v1720_v55 = vpack.c.bf16 %v9672_v19, %v1689_v38 }
  0xc2   : > { %13878 = vst [vmem:[#allocation94_spill] sm:$0xff] %v13877_v41  ;;  %v1408_v40 = vpack.c.bf16 %v1392_v58, %v10286_v34  ;;  %v2637_v41 = vsel %vm9651_vm5, %v9705_v37, 0.0 }
  0xc7   : > { %8351 = vmatmul.mubr.msk.bf16.gmra.mrb[24].mxu0 %vm13874_vm3, %v1406_v49  ;;  %v1691_v49 = vsel %vm9651_vm5, %v9690_v31, 0.0  ;;  %vm13884_vm3 = vmmov %vm13879_vm0 }
  0xc8   : > { %8354 = vmatprep.mubr.msk.bf16.mxu0 %vm13879_vm0, %v1407_v21  ;;  %v7693_v21 = vld [vmem:[%s13320_s1 + $0xa] sm:$0x3]  ;;  %v1721_v58 = vpack.c.bf16 %v9714_v39, %v1691_v49  ;;  %v1723_v49 = vpack.c.bf16 %v9757_v0, %v1695_v9  ;;  %v1701_v9 = vsel %vm9774_vm10, %v9791_v50, 0.0 }
  0xcf   : > { %8355 = vmatmul.mubr.msk.bf16.gmra.mrb[28].mxu0 %vm13880_vm1, %v1408_v40  ;;  %v2406_v40 = vand.u32 %v7693_v21, %v9507_v4  ;;  %vm13883_vm1 = vmmov %vm13879_vm0 }
  0xd0   : > { %8360 = vmatprep.mubr.msk.bf16.mxu0 %vm13881_vm15, %v9669_v18  ;;  %vm13882_vm15 = vmmov %vm13879_vm0  ;;  %v1693_v18 = vsel %vm9685_vm6, %v9705_v37, 0.0  ;;  %v2668_v37 = vpack.c.bf16 %v9757_v0, %v2639_v6  ;;  %v2934_v6 = vld [vmem:[%s9517_s18 + $0x59] sm:$0xff] }
  0xd1   : > { %v1722_v38 = vpack.c.bf16 %v9720_v43, %v1693_v18  ;;  %v1703_v18 = vsel %vm9786_vm11, %v9821_v24, 0.0 }
  0xd7   : > { %8361 = vmatmul.mubr.msk.bf16.vlgmr.msra.gmra.mrb[0].mxu0 %vm13879_vm0, %v1720_v55  ;;  %v1699_v55 = vsel %vm9744_vm9, %v9779_v27, 0.0 }
  0xd8   : > { %8393 = vmatpush3.bf16.msra.mxu0 %v10034_v8  ;;  %8364 = vmatprep.mubr.msk.bf16.mxu0 %vm13882_vm15, %v1721_v58  ;;  %v1697_v8 = vsel %vm9732_vm8, %v9749_v62, 0.0  ;;  %v1725_v58 = vpack.c.bf16 %v9799_v5, %v1699_v55  ;;  %vm13885_vm15 = vmmov %vm13879_vm0  ;;  %v1707_v55 = vsel %vm9828_vm13, %v9863_v59, 0.0 }
  0xd9   : > { %8426 = vmatprep.subr.bf16.mxu0 %v2406_v40  ;;  %v1724_v21 = vpack.c.bf16 %v9763_v7, %v1697_v8  ;;  %v1705_v8 = vsel %vm9816_vm12, %v9833_v12, 0.0  ;;  %vm13891_vm13 = vmmov %vm13879_vm0  ;;  %v2632_v12 = vld [vmem:[%s9517_s18 + $0x118] sm:$0xff] }
  0xdf   : > { %8365 = vmatmul.mubr.msk.bf16.gmra.mrb[4].mxu0 %vm13883_vm1, %v1722_v38  ;;  %v1726_v38 = vpack.c.bf16 %v9805_v46, %v1701_v9  ;;  %vm13886_vm1 = vmmov %vm13879_vm0  ;;  %v1709_v9 = vsel %vm9858_vm14, %v9875_v20, 0.0 }
  0xe0   : > { %8368 = vmatprep.mubr.msk.bf16.mxu0 %vm13884_vm3, %v1723_v49  ;;  %v1727_v49 = vpack.c.bf16 %v9841_v13, %v1703_v18  ;;  %vm13887_vm3 = vmmov %vm13879_vm0 }
  0xe7   : > { %8369 = vmatmul.mubr.msk.bf16.gmra.mrb[8].mxu0 %vm13879_vm0, %v1724_v21  ;;  %v1728_v21 = vpack.c.bf16 %v9847_v1, %v1705_v8 }
  0xe8   : > { %8372 = vmatprep.mubr.msk.bf16.mxu0 %vm13885_vm15, %v1725_v58  ;;  %v1729_v58 = vpack.c.bf16 %v9883_v51, %v1707_v55  ;;  %vm13888_vm15 = vmmov %vm13879_vm0 }
  0xef   : > { %8373 = vmatmul.mubr.msk.bf16.gmra.mrb[12].mxu0 %vm13886_vm1, %v1726_v38  ;;  %vm13889_vm1 = vnez %v13762_v32  ;;  %v1730_v38 = vpack.c.bf16 %v9889_v14, %v1709_v9  ;;  %v10369_v32 = vld [vmem:[%s9517_s18 + $0x100] sm:$0xff]  ;;  %v10374_v9 = vld [vmem:[%s9517_s18 + $0x108] sm:$0xff] }
  0xf0   : > { %8376 = vmatprep.mubr.msk.bf16.mxu0 %vm13887_vm3, %v1727_v49  ;;  %v1711_v18 = vsel %vm13889_vm1, %v9905_v57, 0.0  ;;  %vm13890_vm3 = vmmov %vm13879_vm0  ;;  %13894 = vst [vmem:[#allocation95_spill] sm:$0xff] %v10369_v32 }
  0xf1   : > { %v1731_v49 = vpack.c.bf16 %v9925_v11, %v1711_v18  ;;  %vm13895_vm1 = vmmov %vm13890_vm3  ;;  %13897 = vst [vmem:[#allocation96_spill] sm:$0xff] %v10374_v9 }
  0xf2   : > { %vm13896_vm14 = vmmov %vm13895_vm1 }
  0xf7   : > { %8377 = vmatmul.mubr.msk.bf16.gmra.mrb[16].mxu0 %vm13879_vm0, %v1728_v21  ;;  %vm13892_vm0 = vnez %v13766_v60 }
  0xf8   : > { %8380 = vmatprep.mubr.msk.bf16.mxu0 %vm13888_vm15, %v1729_v58  ;;  %v1713_v8 = vsel %vm13892_vm0, %v9917_v25, 0.0  ;;  %vm13893_vm15 = vnez %v13770_v3  ;;  %vm13910_vm0 = vmmov %vm13895_vm1 }
  0xf9   : > { %v1715_v55 = vsel %vm13893_vm15, %v9947_v47, 0.0  ;;  %v1732_v21 = vpack.c.bf16 %v9931_v54, %v1713_v8  ;;  %vm13900_vm15 = vmmov %vm13895_vm1 }
  0xfa   : > { %v1733_v58 = vpack.c.bf16 %v9965_v56, %v1715_v55  ;;  %v13902_v55 = vld [vmem:[#allocation5_spill] sm:$0xff]  ;;  %vm13914_vm12 = vmmov %vm13910_vm0  ;;  %v13936_v56 = vld [vmem:[#allocation48_spill] sm:$0xff] }
  0xff   : > { %8381 = vmatmul.mubr.msk.bf16.gmra.mrb[20].mxu0 %vm13890_vm3, %v1730_v38  ;;  %vm13899_vm3 = vmmov %vm13895_vm1 }
 0x100   : > { %8384 = vmatprep.mubr.msk.bf16.mxu0 %vm13891_vm13, %v1731_v49  ;;  %vm13898_vm13 = vnez %v13774_v48  ;;  %v7710_v49 = vld [vmem:[%s13320_s1 + $0xc] sm:$0x3]  ;;  %v13927_v48 = vld [vmem:[#allocation42_spill] sm:$0xff] }
 0x101   : > { %v1717_v18 = vsel %vm13898_vm13, %v10369_v32, 0.0  ;;  %v2732_v8 = vand.u32 %v7710_v49, %v9507_v4  ;;  %vm13908_vm13 = vmmov %vm13895_vm1  ;;  %v13917_v49 = vld [vmem:[#allocation13_spill] sm:$0xff]  ;;  %v13947_v32 = vld [vmem:[#allocation59_spill] sm:$0xff] }
 0x102   : > { %v1734_v38 = vpack.c.bf16 %v10374_v9, %v1717_v18  ;;  %v13909_v18 = vld [vmem:[#allocation9_spill] sm:$0xff] }
 0x107   : > { %8385 = vmatmul.mubr.msk.bf16.gmra.mrb[24].mxu0 %vm13895_vm1, %v1732_v21  ;;  %v13903_v21 = vld [vmem:[#allocation6_spill] sm:$0xff] }
 0x108   : > { %8388 = vmatprep.mubr.msk.bf16.mxu0 %vm13896_vm14, %v1733_v58  ;;  %vm13901_vm14 = vmmov %vm13895_vm1  ;;  %v13907_v58 = vld [vmem:[#allocation8_spill] sm:$0xff] }
 0x10f   : > { %8389 = vmatmul.mubr.msk.bf16.gmra.mrb[28].mxu0 %vm13899_vm3, %v1734_v38  ;;  %vm13904_vm3 = vmmov %vm13895_vm1  ;;  %v13915_v38 = vld [vmem:[#allocation12_spill] sm:$0xff] }
 0x110   : > { %8394 = vmatprep.mubr.msk.bf16.mxu0 %vm13900_vm15, %v9528_v15  ;;  %v13905_v15 = vld [vmem:[#allocation7_spill] sm:$0xff]  ;;  %vm13906_vm15 = vmmov %vm13895_vm1 }
 0x117   : > { %8395 = vmatmul.mubr.msk.bf16.vlgmr.msra.gmra.mrb[0].mxu0 %vm13901_vm14, %v9530_v16  ;;  %v13911_v16 = vld [vmem:[#allocation10_spill] sm:$0xff]  ;;  %vm13912_vm14 = vmmov %vm13910_vm0 }
 0x118   : > { %8427 = vmatpush3.bf16.msra.mxu0 %v2406_v40  ;;  %8398 = vmatprep.mubr.msk.bf16.mxu0 %vm13895_vm1, %v13902_v55  ;;  %v13913_v40 = vld [vmem:[#allocation11_spill] sm:$0xff]  ;;  %vm13916_vm1 = vmmov %vm13910_vm0  ;;  %v13919_v55 = vld [vmem:[#allocation14_spill] sm:$0xff] }
 0x119   : > { %8460 = vmatprep.subr.bf16.mxu0 %v2732_v8 }
 0x11f   : > { %8399 = vmatmul.mubr.msk.bf16.gmra.mrb[4].mxu0 %vm13904_vm3, %v13903_v21  ;;  %vm13918_vm3 = vmmov %vm13910_vm0  ;;  %v13921_v21 = vld [vmem:[#allocation16_spill] sm:$0xff] }
 0x120   : > { %8402 = vmatprep.mubr.msk.bf16.mxu0 %vm13906_vm15, %v13905_v15  ;;  %vm13920_vm15 = vmmov %vm13910_vm0  ;;  %v13923_v15 = vld [vmem:[#allocation17_spill] sm:$0xff] }
 0x127   : > { %8403 = vmatmul.mubr.msk.bf16.gmra.mrb[8].mxu0 %vm13908_vm13, %v13907_v58  ;;  %vm13922_vm13 = vmmov %vm13910_vm0  ;;  %v13924_v58 = vld [vmem:[#allocation21_spill] sm:$0xff] }
 0x128   : > { %8406 = vmatprep.mubr.msk.bf16.mxu0 %vm13910_vm0, %v13909_v18  ;;  %v2011_v18 = vld [vmem:[%s9517_s18 + $0x101] sm:$0xff] }
 0x12f   : > { %8407 = vmatmul.mubr.msk.bf16.gmra.mrb[12].mxu0 %vm13912_vm14, %v13911_v16  ;;  %vm13925_vm14 = vmmov %vm13910_vm0  ;;  %v2012_v16 = vld [vmem:[%s9517_s18 + $0x109] sm:$0xff] }
 0x130   : > { %8410 = vmatprep.mubr.msk.bf16.mxu0 %vm13914_vm12, %v13913_v40  ;;  %v13926_v40 = vld [vmem:[#allocation46_spill] sm:$0xff]  ;;  %vm13928_vm12 = vnez %v13927_v48  ;;  %v10420_v9 = vpack.c.bf16 %v2012_v16, %v2011_v18  ;;  %v7727_v18 = vld [vmem:[%s13320_s1 + $0xe] sm:$0x3]  ;;  %v13938_v16 = vld [vmem:[#allocation51_spill] sm:$0xff] }
 0x131   : > { %v3026_v48 = vand.u32 %v7727_v18, %v9507_v4  ;;  %v13952_v18 = vld [vmem:[#allocation60_spill] sm:$0xff] }
 0x132   : > { %13929 = vst [vmem:[#allocation5_spill] sm:$0xff] %v10420_v9 }
 0x137   : > { %8411 = vmatmul.mubr.msk.bf16.gmra.mrb[16].mxu0 %vm13916_vm1, %v13915_v38  ;;  %v2308_v38 = vsel %vm13928_vm12, %v13926_v40, 0.0  ;;  %vm13930_vm1 = vmmov %vm13910_vm0 }
 0x138   : > { %8414 = vmatprep.mubr.msk.bf16.mxu0 %vm13918_vm3, %v13917_v49  ;;  %v2339_v49 = vpack.c.bf16 %v2308_v38, %v10003_v42  ;;  %vm13931_vm3 = vmmov %vm13910_vm0  ;;  %v13939_v42 = vld [vmem:[#allocation58_spill] sm:$0xff] }
 0x13f   : > { %8415 = vmatmul.mubr.msk.bf16.gmra.mrb[20].mxu0 %vm13920_vm15, %v13919_v55  ;;  %v13932_v55 = vld [vmem:[#allocation49_spill] sm:$0xff] }
 0x140   : > { %8418 = vmatprep.mubr.msk.bf16.mxu0 %vm13922_vm13, %v13921_v21  ;;  %v13933_v21 = vld [vmem:[#allocation45_spill] sm:$0xff]  ;;  %vm13937_vm13 = vnez %v13936_v56 }
 0x141   : > { %vm13934_vm15 = vnez %v13933_v21  ;;  %v13942_v21 = vld [vmem:[#allocation52_spill] sm:$0xff] }
 0x147   : > { %8419 = vmatmul.mubr.msk.bf16.gmra.mrb[24].mxu0 %vm13910_vm0, %v13923_v15  ;;  %v2310_v15 = vsel %vm13934_vm15, %v13932_v55, 0.0  ;;  %v13945_v55 = vld [vmem:[#allocation55_spill] sm:$0xff]  ;;  %vm13950_vm15 = vmmov %vm13910_vm0 }
 0x148   : > { %8422 = vmatprep.mubr.msk.bf16.mxu0 %vm13925_vm14, %v13924_v58  ;;  %v13935_v58 = vld [vmem:[#allocation53_spill] sm:$0xff]  ;;  %v2340_v40 = vpack.c.bf16 %v2310_v15, %v13938_v16  ;;  %vm13940_vm14 = vmmov %vm13910_vm0  ;;  %v13948_v16 = vld [vmem:[#allocation66_spill] sm:$0xff] }
 0x149   : > { %v2312_v3 = vsel %vm13937_vm13, %v13935_v58, 0.0  ;;  %v13944_v58 = vld [vmem:[#allocation61_spill] sm:$0xff]  ;;  %vm13949_vm13 = vmmov %vm13910_vm0 }
 0x14a   : > { %v2341_v38 = vpack.c.bf16 %v2312_v3, %v13939_v42 }
 0x14f   : > { %8423 = vmatmul.mubr.msk.bf16.gmra.mrb[28].mxu0 %vm13930_vm1, %v10420_v9  ;;  %vm13943_vm1 = vnez %v13942_v21  ;;  %v13955_v21 = vld [vmem:[#allocation63_spill] sm:$0xff] }
 0x150   : > { %8428 = vmatprep.mubr.msk.bf16.mxu0 %vm13931_vm3, %v2339_v49  ;;  %v13941_v49 = vld [vmem:[#allocation56_spill] sm:$0xff]  ;;  %vm13946_vm3 = vnez %v13945_v55 }
 0x151   : > { %v2314_v56 = vsel %vm13943_vm1, %v13941_v49, 0.0  ;;  %v2316_v9 = vsel %vm13946_vm3, %v13944_v58, 0.0  ;;  %v13957_v49 = vld [vmem:[#allocation67_spill] sm:$0xff]  ;;  %v13958_v58 = vld [vmem:[#allocation74_spill] sm:$0xff]  ;;  %vm13959_vm3 = vmmov %vm13949_vm13 }
 0x152   : > { %v2342_v15 = vpack.c.bf16 %v2314_v56, %v13947_v32  ;;  %v2343_v3 = vpack.c.bf16 %v2316_v9, %v13948_v16  ;;  %vm13960_vm1 = vmmov %vm13959_vm3  ;;  %v13961_v56 = vld [vmem:[#allocation72_spill] sm:$0xff]  ;;  %v13965_v16 = vld [vmem:[#allocation71_spill] sm:$0xff] }
 0x153   : > { %v13962_v9 = vld [vmem:[#allocation68_spill] sm:$0xff] }
 0x157   : > { %8429 = vmatmul.mubr.msk.bf16.vlgmr.msra.gmra.mrb[0].mxu0 %vm13910_vm0, %v2340_v40  ;;  %vm13953_vm0 = vnez %v13952_v18 }
 0x158   : > { %8461 = vmatpush3.bf16.msra.mxu0 %v2732_v8  ;;  %8432 = vmatprep.mubr.msk.bf16.mxu0 %vm13940_vm14, %v2341_v38  ;;  %v13951_v8 = vld [vmem:[#allocation64_spill] sm:$0xff]  ;;  %v13954_v38 = vld [vmem:[#allocation69_spill] sm:$0xff]  ;;  %vm13956_vm14 = vnez %v13955_v21  ;;  %v13968_v21 = vld [vmem:[#allocation82_spill] sm:$0xff] }
 0x159   : > { %8494 = vmatprep.subr.bf16.mxu0 %v3026_v48  ;;  %v2318_v40 = vsel %vm13953_vm0, %v13951_v8, 0.0  ;;  %v2320_v42 = vsel %vm13956_vm14, %v13954_v38, 0.0  ;;  %v13967_v8 = vld [vmem:[#allocation75_spill] sm:$0xff]  ;;  %vm13969_vm14 = vmmov %vm13960_vm1 }
 0x15a   : > { %v2344_v55 = vpack.c.bf16 %v2318_v40, %v13957_v49  ;;  %v2345_v60 = vpack.c.bf16 %v2320_v42, %v13958_v58  ;;  %vm13970_vm0 = vmmov %vm13960_vm1  ;;  %v13971_v42 = vld [vmem:[#allocation80_spill] sm:$0xff]  ;;  %v13974_v40 = vld [vmem:[#allocation85_spill] sm:$0xff] }
 0x15b   : > { %v13975_v58 = vld [vmem:[#allocation79_spill] sm:$0xff] }
 0x15f   : > { %8433 = vmatmul.mubr.msk.bf16.gmra.mrb[4].mxu0 %vm13949_vm13, %v2342_v15  ;;  %vm13963_vm13 = vnez %v13962_v9 }
 0x160   : > { %8436 = vmatprep.mubr.msk.bf16.mxu0 %vm13950_vm15, %v2343_v3  ;;  %v2322_v15 = vsel %vm13963_vm13, %v13961_v56, 0.0  ;;  %v13964_v3 = vld [vmem:[#allocation77_spill] sm:$0xff]  ;;  %vm13966_vm15 = vnez %v13965_v16  ;;  %v13977_v56 = vld [vmem:[#allocation83_spill] sm:$0xff]  ;;  %vm13979_vm13 = vmmov %vm13970_vm0 }
 0x161   : > { %v2324_v18 = vsel %vm13966_vm15, %v13964_v3, 0.0  ;;  %v2346_v32 = vpack.c.bf16 %v2322_v15, %v13967_v8  ;;  %vm13978_vm15 = vmmov %vm13970_vm0  ;;  %v13983_v15 = vld [vmem:[#allocation87_spill] sm:$0xff] }
 0x162   : > { %v2347_v38 = vpack.c.bf16 %v2324_v18, %v13968_v21  ;;  %v13981_v18 = vld [vmem:[#allocation84_spill] sm:$0xff] }
 0x167   : > { %8437 = vmatmul.mubr.msk.bf16.gmra.mrb[8].mxu0 %vm13959_vm3, %v2344_v55  ;;  %v13972_v55 = vld [vmem:[#allocation76_spill] sm:$0xff] }
 0x168   : > { %8440 = vmatprep.mubr.msk.bf16.mxu0 %vm13960_vm1, %v2345_v60  ;;  %vm13973_vm3 = vnez %v13972_v55  ;;  %vm13976_vm1 = vnez %v13975_v58 }
 0x169   : > { %v2326_v60 = vsel %vm13973_vm3, %v13971_v42, 0.0  ;;  %v2328_v9 = vsel %vm13976_vm1, %v13974_v40, 0.0  ;;  %vm13985_vm1 = vmmov %vm13979_vm13 }
 0x16a   : > { %v2348_v16 = vpack.c.bf16 %v2326_v60, %v13977_v56  ;;  %v2349_v3 = vpack.c.bf16 %v2328_v9, %v10221_v23  ;;  %vm13986_vm3 = vmmov %vm13985_vm1 }
 0x16f   : > { %8441 = vmatmul.mubr.msk.bf16.gmra.mrb[12].mxu0 %vm13969_vm14, %v2346_v32  ;;  %v13980_v32 = vld [vmem:[#allocation88_spill] sm:$0xff]  ;;  %vm13984_vm14 = vnez %v13983_v15 }
 0x170   : > { %8444 = vmatprep.mubr.msk.bf16.mxu0 %vm13970_vm0, %v2347_v38  ;;  %vm13982_vm0 = vnez %v13981_v18  ;;  %v2332_v55 = vsel %vm13984_vm14, %v10243_v17, 0.0  ;;  %v10499_v17 = vld [vmem:[%s9517_s18 + $0x10a] sm:$0xff]  ;;  %vm13991_vm14 = vmmov %vm13985_vm1 }
 0x171   : > { %v2330_v38 = vsel %vm13982_vm0, %v13980_v32, 0.0  ;;  %v2351_v40 = vpack.c.bf16 %v2332_v55, %v10260_v29  ;;  %vm13992_vm0 = vmmov %vm13985_vm1  ;;  %v2338_v55 = vsel %vm10276_vm2, %v10499_v17, 0.0 }
 0x172   : > { %v2350_v58 = vpack.c.bf16 %v2330_v38, %v10227_v35  ;;  %vm14000_vm5 = vmmov %vm13992_vm0 }
 0x173   : > { %vm14001_vm6 = vmmov %vm13992_vm0 }
 0x174   : > { %vm14004_vm9 = vmmov %vm13992_vm0 }
 0x175   : > { %vm14008_vm11 = vmmov %vm13992_vm0 }
 0x177   : > { %8445 = vmatmul.mubr.msk.bf16.gmra.mrb[16].mxu0 %vm13978_vm15, %v2348_v16  ;;  %v13987_v16 = vld [vmem:[#allocation90_spill] sm:$0xff] }
 0x178   : > { %8448 = vmatprep.mubr.msk.bf16.mxu0 %vm13979_vm13, %v2349_v3  ;;  %vm13988_vm15 = vnez %v13987_v16  ;;  %v13989_v3 = vld [vmem:[#allocation93_spill] sm:$0xff] }
 0x179   : > { %v2334_v9 = vsel %vm13988_vm15, %v10255_v22, 0.0  ;;  %vm13990_vm13 = vnez %v13989_v3 }
 0x17a   : > { %v2336_v60 = vsel %vm13990_vm13, %v10281_v28, 0.0  ;;  %v2352_v18 = vpack.c.bf16 %v2334_v9, %v10266_v33  ;;  %vm13996_vm13 = vmmov %vm13992_vm0 }
 0x17b   : > { %v2353_v15 = vpack.c.bf16 %v2336_v60, %v10286_v34 }
 0x17f   : > { %8449 = vmatmul.mubr.msk.bf16.gmra.mrb[20].mxu0 %vm13985_vm1, %v2350_v58  ;;  %v10504_v58 = vld [vmem:[%s9517_s18 + $0x102] sm:$0xff]  ;;  %vm13995_vm1 = vmmov %vm13992_vm0 }
 0x180   : > { %8452 = vmatprep.mubr.msk.bf16.mxu0 %vm13986_vm3, %v2351_v40  ;;  %v13993_v40 = vld [vmem:[#allocation19_spill] sm:$0xff]  ;;  %v2354_v9 = vpack.c.bf16 %v2338_v55, %v10504_v58 }
 0x181   : > { %vm13994_vm3 = vnez %v13993_v40 }
 0x182   : > { %v2633_v38 = vsel %vm13994_vm3, %v9656_v10, 0.0  ;;  %v7744_v10 = vld [vmem:[%s13320_s1 + $0x10] sm:$0x3]  ;;  %vm14006_vm3 = vnez %v13756_v2 }
 0x183   : > { %v2665_v60 = vpack.c.bf16 %v9672_v19, %v2633_v38  ;;  %v2667_v19 = vpack.c.bf16 %v9720_v43, %v2637_v41  ;;  %v10528_v40 = vand.u32 %v7744_v10, %v9507_v4  ;;  %v2647_v43 = vsel %vm9774_vm10, %v9821_v24, 0.0  ;;  %vm14007_vm10 = vmmov %vm13992_vm0  ;;  %v10602_v38 = vld [vmem:[%s9517_s18 + $0x31] sm:$0xff] }
 0x184   : > { %v2672_v53 = vpack.c.bf16 %v9841_v13, %v2647_v43  ;;  %v2653_v24 = vsel %vm14006_vm3, %v9875_v20, 0.0  ;;  %v14013_v13 = vld [vmem:[#allocation36_spill] sm:$0xff]  ;;  %vm13667_vm3 = vcmask 130048  }
 0x185   : > { %v2675_v0 = vpack.c.bf16 %v9889_v14, %v2653_v24  ;;  %v14022_v14 = vld [vmem:[#allocation40_spill] sm:$0xff]  ;;  %v2944_v24 = vld [vmem:[%s9517_s18 + $0xa9] sm:$0xff] }
 0x187   : > { %8453 = vmatmul.mubr.msk.bf16.gmra.mrb[24].mxu0 %vm13991_vm14, %v2352_v18  ;;  %v2635_v18 = vsel %vm9641_vm4, %v9690_v31, 0.0  ;;  %vm13998_vm14 = vmmov %vm13992_vm0  ;;  %v2641_v31 = vsel %vm9700_vm7, %v9749_v62, 0.0 }
 0x188   : > { %8456 = vmatprep.mubr.msk.bf16.mxu0 %vm13992_vm0, %v2353_v15  ;;  %v2666_v55 = vpack.c.bf16 %v9714_v39, %v2635_v18  ;;  %v2669_v4 = vpack.c.bf16 %v9763_v7, %v2641_v31  ;;  %vm13999_vm4 = vmmov %vm13992_vm0  ;;  %v2671_v39 = vpack.c.bf16 %v9805_v46, %v2645_v30  ;;  %v2931_v18 = vld [vmem:[%s9517_s18 + $0x41] sm:$0xff]  ;;  %v2932_v15 = vld [vmem:[%s9517_s18 + $0x49] sm:$0xff] }
 0x189   : > { %vm14002_vm7 = vmmov %vm13992_vm0  ;;  %v2935_v31 = vld [vmem:[%s9517_s18 + $0x61] sm:$0xff]  ;;  %v2937_v30 = vld [vmem:[%s9517_s18 + $0x71] sm:$0xff] }
 0x18f   : > { %8457 = vmatmul.mubr.msk.bf16.gmra.mrb[28].mxu0 %vm13995_vm1, %v2354_v9  ;;  %vm14009_vm1 = vnez %v13759_v63  ;;  %v14015_v63 = vld [vmem:[#allocation95_spill] sm:$0xff] }
 0x190   : > { %8462 = vmatprep.mubr.msk.bf16.mxu0 %vm13996_vm13, %v2665_v60  ;;  %vm14005_vm13 = vnez %v13753_v45  ;;  %v2655_v1 = vsel %vm14009_vm1, %v9905_v57, 0.0  ;;  %v14010_v45 = vld [vmem:[#allocation34_spill] sm:$0xff]  ;;  %v10605_v9 = vld [vmem:[%s9517_s18 + $0x39] sm:$0xff]  ;;  %v13564_v60 = vmov 0.0   ;;  %vm14027_vm1 = vmmov %vm13999_vm4 }
 0x191   : > { %v2651_v46 = vsel %vm14005_vm13, %v9863_v59, 0.0  ;;  %v2676_v59 = vpack.c.bf16 %v9925_v11, %v2655_v1  ;;  %vm14024_vm13 = vmmov %vm13999_vm4  ;;  %526 = vst.msk [vmem:[#allocation2 + $0x10] sm:$0xff] %vm13667_vm3, %v13564_v60  ;;  %v2960_v10 = vpack.c.bf16 %v10605_v9, %v10602_v38  ;;  %v2945_v1 = vld [vmem:[%s9517_s18 + $0xb1] sm:$0xff] }
 0x192   : > { %v2674_v62 = vpack.c.bf16 %v9883_v51, %v2651_v46  ;;  %v14019_v51 = vld [vmem:[#allocation96_spill] sm:$0xff]  ;;  %524 = vst.msk [vmem:[#allocation2] sm:$0xff] %vm13667_vm3, %v13564_v60  ;;  %525 = vst.msk [vmem:[#allocation2 + $0x8] sm:$0xff] %vm13667_vm3, %v13564_v60  ;;  %v14043_v38 = vld [vmem:[#allocation51_spill] sm:$0xff] }
 0x193   : > { %527 = vst.msk [vmem:[#allocation2 + $0x18] sm:$0xff] %vm13667_vm3, %v13564_v60  ;;  %528 = vst.msk [vmem:[#allocation2 + $0x20] sm:$0xff] %vm13667_vm3, %v13564_v60  ;;  %v2943_v46 = vld [vmem:[%s9517_s18 + $0xa1] sm:$0xff] }
 0x194   : > { %529 = vst.msk [vmem:[#allocation2 + $0x28] sm:$0xff] %vm13667_vm3, %v13564_v60  ;;  %530 = vst.msk [vmem:[#allocation2 + $0x30] sm:$0xff] %vm13667_vm3, %v13564_v60 }
 0x195   : > { %531 = vst.msk [vmem:[#allocation2 + $0x38] sm:$0xff] %vm13667_vm3, %v13564_v60  ;;  %532 = vst.msk [vmem:[#allocation2 + $0x40] sm:$0xff] %vm13667_vm3, %v13564_v60 }
 0x196   : > { %533 = vst.msk [vmem:[#allocation2 + $0x48] sm:$0xff] %vm13667_vm3, %v13564_v60  ;;  %534 = vst.msk [vmem:[#allocation2 + $0x50] sm:$0xff] %vm13667_vm3, %v13564_v60 }
 0x197   : > { %8463 = vmatmul.mubr.msk.bf16.vlgmr.msra.gmra.mrb[0].mxu0 %vm13992_vm0, %v2666_v55  ;;  %535 = vst.msk [vmem:[#allocation2 + $0x58] sm:$0xff] %vm13667_vm3, %v13564_v60  ;;  %536 = vst.msk [vmem:[#allocation2 + $0x60] sm:$0xff] %vm13667_vm3, %v13564_v60  ;;  %v2961_v55 = vpack.c.bf16 %v2932_v15, %v2931_v18  ;;  %v14045_v18 = vld [vmem:[#allocation53_spill] sm:$0xff] }
 0x198   : > { %8495 = vmatpush3.bf16.msra.mxu0 %v3026_v48  ;;  %8466 = vmatprep.mubr.msk.bf16.mxu0 %vm13998_vm14, %v2667_v19  ;;  %v2643_v48 = vsel %vm9732_vm8, %v9779_v27, 0.0  ;;  %vm14003_vm8 = vmmov %vm13992_vm0  ;;  %vm14011_vm0 = vnez %v14010_v45  ;;  %v14016_v27 = vld [vmem:[#allocation38_spill] sm:$0xff]  ;;  %537 = vst.msk [vmem:[#allocation2 + $0x68] sm:$0xff] %vm13667_vm3, %v13564_v60  ;;  %v2946_v45 = vld [vmem:[%s9517_s18 + $0xb9] sm:$0xff] }
 0x199   : > { %8528 = vmatprep.subr.bf16.mxu0 %v10528_v40  ;;  %v2670_v36 = vpack.c.bf16 %v9799_v5, %v2643_v48  ;;  %v2657_v2 = vsel %vm14011_vm0, %v9917_v25, 0.0  ;;  %vm14012_vm14 = vmmov %vm13999_vm4  ;;  %v2631_v5 = vld [vmem:[%s9517_s18 + $0x110] sm:$0xff]  ;;  %538 = vst.msk [vmem:[#allocation2 + $0x70] sm:$0xff] %vm13667_vm3, %v13564_v60  ;;  %v14046_v15 = vld [vmem:[#allocation45_spill] sm:$0xff] }
 0x19a   : > { %v2677_v7 = vpack.c.bf16 %v9931_v54, %v2657_v2  ;;  %v2928_v54 = vld [vmem:[%s9517_s18 + $0x29] sm:$0xff]  ;;  %539 = vst.msk [vmem:[#allocation2 + $0x78] sm:$0xff] %vm13667_vm3, %v13564_v60  ;;  %540 = vst.msk [vmem:[#allocation2 + $0x80] sm:$0xff] %vm13667_vm3, %v13564_v60  ;;  %v2933_v19 = vld [vmem:[%s9517_s18 + $0x51] sm:$0xff] }
 0x19b   : > { %541 = vst.msk [vmem:[#allocation2 + $0x88] sm:$0xff] %vm13667_vm3, %v13564_v60  ;;  %542 = vst.msk [vmem:[#allocation2 + $0x90] sm:$0xff] %vm13667_vm3, %v13564_v60  ;;  %v2947_v2 = vld [vmem:[%s9517_s18 + $0xc1] sm:$0xff] }
 0x19c   : > { %543 = vst.msk [vmem:[#allocation2 + $0x98] sm:$0xff] %vm13667_vm3, %v13564_v60  ;;  %544 = vst.msk [vmem:[#allocation2 + $0xa0] sm:$0xff] %vm13667_vm3, %v13564_v60 }
 0x19d   : > { %545 = vst.msk [vmem:[#allocation2 + $0xa8] sm:$0xff] %vm13667_vm3, %v13564_v60  ;;  %546 = vst.msk [vmem:[#allocation2 + $0xb0] sm:$0xff] %vm13667_vm3, %v13564_v60 }
 0x19e   : > { %547 = vst.msk [vmem:[#allocation2 + $0xb8] sm:$0xff] %vm13667_vm3, %v13564_v60  ;;  %548 = vst.msk [vmem:[#allocation2 + $0xc0] sm:$0xff] %vm13667_vm3, %v13564_v60 }
 0x19f   : > { %8467 = vmatmul.mubr.msk.bf16.gmra.mrb[4].mxu0 %vm13999_vm4, %v2668_v37  ;;  %549 = vst.msk [vmem:[#allocation2 + $0xc8] sm:$0xff] %vm13667_vm3, %v13564_v60  ;;  %550 = vst.msk [vmem:[#allocation2 + $0xd0] sm:$0xff] %vm13667_vm3, %v13564_v60  ;;  %v2936_v37 = vld [vmem:[%s9517_s18 + $0x69] sm:$0xff] }
 0x1a0   : > { %8470 = vmatprep.mubr.msk.bf16.mxu0 %vm14000_vm5, %v2669_v4  ;;  %vm14014_vm5 = vnez %v14013_v13  ;;  %551 = vst.msk [vmem:[#allocation2 + $0xd8] sm:$0xff] %vm13667_vm3, %v13564_v60  ;;  %552 = vst.msk [vmem:[#allocation2 + $0xe0] sm:$0xff] %vm13667_vm3, %v13564_v60  ;;  %v2962_v4 = vpack.c.bf16 %v2934_v6, %v2933_v19  ;;  %v2963_v48 = vpack.c.bf16 %v2936_v37, %v2935_v31  ;;  %v14049_v19 = vld [vmem:[#allocation48_spill] sm:$0xff]  ;;  %v14051_v31 = vld [vmem:[#allocation58_spill] sm:$0xff] }
 0x1a1   : > { %v2659_v26 = vsel %vm14014_vm5, %v9947_v47, 0.0  ;;  %v2927_v47 = vld [vmem:[%s9517_s18 + $0x21] sm:$0xff]  ;;  %553 = vst.msk [vmem:[#allocation2 + $0xe8] sm:$0xff] %vm13667_vm3, %v13564_v60  ;;  %554 = vst.msk [vmem:[#allocation2 + $0xf0] sm:$0xff] %vm13667_vm3, %v13564_v60 }
 0x1a2   : > { %v2678_v50 = vpack.c.bf16 %v14018_v44, %v2659_v26  ;;  %v2959_v41 = vpack.c.bf16 %v2928_v54, %v2927_v47  ;;  %555 = vst.msk [vmem:[#allocation2 + $0xf8] sm:$0xff] %vm13667_vm3, %v13564_v60  ;;  %556 = vst.msk [vmem:[#allocation2 + $0x100] sm:$0xff] %vm13667_vm3, %v13564_v60  ;;  %v2949_v26 = vld [vmem:[%s9517_s18 + $0xd1] sm:$0xff]  ;;  %v14041_v47 = vld [vmem:[#allocation49_spill] sm:$0xff] }
 0x1a3   : > { %557 = vst.msk [vmem:[#allocation2 + $0x108] sm:$0xff] %vm13667_vm3, %v13564_v60  ;;  %560 = vst.msk [vmem:[#allocation3] sm:$0xff] %vm13667_vm3, %v13564_v60 }
 0x1a4   : > { %561 = vst.msk [vmem:[#allocation3 + $0x8] sm:$0xff] %vm13667_vm3, %v13564_v60  ;;  %562 = vst.msk [vmem:[#allocation3 + $0x10] sm:$0xff] %vm13667_vm3, %v13564_v60 }
 0x1a5   : > { %563 = vst.msk [vmem:[#allocation3 + $0x18] sm:$0xff] %vm13667_vm3, %v13564_v60  ;;  %564 = vst.msk [vmem:[#allocation3 + $0x20] sm:$0xff] %vm13667_vm3, %v13564_v60 }
 0x1a6   : > { %565 = vst.msk [vmem:[#allocation3 + $0x28] sm:$0xff] %vm13667_vm3, %v13564_v60  ;;  %566 = vst.msk [vmem:[#allocation3 + $0x30] sm:$0xff] %vm13667_vm3, %v13564_v60 }
 0x1a7   : > { %8471 = vmatmul.mubr.msk.bf16.gmra.mrb[8].mxu0 %vm14001_vm6, %v2670_v36  ;;  %vm14017_vm6 = vnez %v14016_v27  ;;  %567 = vst.msk [vmem:[#allocation3 + $0x38] sm:$0xff] %vm13667_vm3, %v13564_v60  ;;  %568 = vst.msk [vmem:[#allocation3 + $0x40] sm:$0xff] %vm13667_vm3, %v13564_v60  ;;  %v2939_v36 = vld [vmem:[%s9517_s18 + $0x81] sm:$0xff] }
 0x1a8   : > { %8474 = vmatprep.mubr.msk.bf16.mxu0 %vm14002_vm7, %v2671_v39  ;;  %v2661_v57 = vsel %vm14017_vm6, %v14015_v63, 0.0  ;;  %vm14020_vm7 = vmmov %vm13999_vm4  ;;  %569 = vst.msk [vmem:[#allocation3 + $0x48] sm:$0xff] %vm13667_vm3, %v13564_v60  ;;  %v2940_v39 = vld [vmem:[%s9517_s18 + $0x89] sm:$0xff]  ;;  %v2950_v63 = vld [vmem:[%s9517_s18 + $0xd9] sm:$0xff] }
 0x1a9   : > { %v2679_v11 = vpack.c.bf16 %v14019_v51, %v2661_v57  ;;  %570 = vst.msk [vmem:[#allocation3 + $0x50] sm:$0xff] %vm13667_vm3, %v13564_v60  ;;  %571 = vst.msk [vmem:[#allocation3 + $0x58] sm:$0xff] %vm13667_vm3, %v13564_v60  ;;  %v2965_v52 = vpack.c.bf16 %v2940_v39, %v2939_v36  ;;  %v2951_v27 = vld [vmem:[%s9517_s18 + $0xe1] sm:$0xff]  ;;  %v2952_v57 = vld [vmem:[%s9517_s18 + $0xe9] sm:$0xff]  ;;  %v2970_v44 = vpack.c.bf16 %v2950_v63, %v2949_v26 }
 0x1aa   : > { %572 = vst.msk [vmem:[#allocation3 + $0x60] sm:$0xff] %vm13667_vm3, %v13564_v60  ;;  %573 = vst.msk [vmem:[#allocation3 + $0x68] sm:$0xff] %vm13667_vm3, %v13564_v60  ;;  %v2953_v51 = vld [vmem:[%s9517_s18 + $0xf1] sm:$0xff]  ;;  %v14058_v39 = vld [vmem:[#allocation64_spill] sm:$0xff] }
 0x1ab   : > { %574 = vst.msk [vmem:[#allocation3 + $0x70] sm:$0xff] %vm13667_vm3, %v13564_v60  ;;  %575 = vst.msk [vmem:[#allocation3 + $0x78] sm:$0xff] %vm13667_vm3, %v13564_v60  ;;  %v14073_v26 = vld [vmem:[#allocation68_spill] sm:$0xff] }
 0x1ac   : > { %576 = vst.msk [vmem:[#allocation3 + $0x80] sm:$0xff] %vm13667_vm3, %v13564_v60  ;;  %577 = vst.msk [vmem:[#allocation3 + $0x88] sm:$0xff] %vm13667_vm3, %v13564_v60 }
 0x1ad   : > { %578 = vst.msk [vmem:[#allocation3 + $0x90] sm:$0xff] %vm13667_vm3, %v13564_v60  ;;  %579 = vst.msk [vmem:[#allocation3 + $0x98] sm:$0xff] %vm13667_vm3, %v13564_v60 }
 0x1ae   : > { %580 = vst.msk [vmem:[#allocation3 + $0xa0] sm:$0xff] %vm13667_vm3, %v13564_v60  ;;  %581 = vst.msk [vmem:[#allocation3 + $0xa8] sm:$0xff] %vm13667_vm3, %v13564_v60 }
 0x1af   : > { %8475 = vmatmul.mubr.msk.bf16.gmra.mrb[12].mxu0 %vm14003_vm8, %v2672_v53  ;;  %vm14021_vm8 = vmmov %vm13999_vm4  ;;  %582 = vst.msk [vmem:[#allocation3 + $0xb0] sm:$0xff] %vm13667_vm3, %v13564_v60  ;;  %v2941_v53 = vld [vmem:[%s9517_s18 + $0x91] sm:$0xff] }
 0x1b0   : > { %8478 = vmatprep.mubr.msk.bf16.mxu0 %vm14004_vm9, %v2673_v61  ;;  %vm14023_vm9 = vnez %v14022_v14  ;;  %583 = vst.msk [vmem:[#allocation3 + $0xb8] sm:$0xff] %vm13667_vm3, %v13564_v60  ;;  %584 = vst.msk [vmem:[#allocation3 + $0xc0] sm:$0xff] %vm13667_vm3, %v13564_v60  ;;  %v2942_v61 = vld [vmem:[%s9517_s18 + $0x99] sm:$0xff]  ;;  %v2957_v14 = vld [vmem:[%s9517_s18 + $0x111] sm:$0xff] }
 0x1b1   : > { %v2663_v20 = vsel %vm14023_vm9, %v2631_v5, 0.0  ;;  %585 = vst.msk [vmem:[#allocation3 + $0xc8] sm:$0xff] %vm13667_vm3, %v13564_v60  ;;  %586 = vst.msk [vmem:[#allocation3 + $0xd0] sm:$0xff] %vm13667_vm3, %v13564_v60 }
 0x1b2   : > { %v2680_v25 = vpack.c.bf16 %v2632_v12, %v2663_v20  ;;  %587 = vst.msk [vmem:[#allocation3 + $0xd8] sm:$0xff] %vm13667_vm3, %v13564_v60  ;;  %588 = vst.msk [vmem:[#allocation3 + $0xe0] sm:$0xff] %vm13667_vm3, %v13564_v60  ;;  %v14039_v12 = vld [vmem:[#allocation5_spill] sm:$0xff]  ;;  %v2958_v20 = vld [vmem:[%s9517_s18 + $0x119] sm:$0xff] }
 0x1b3   : > { %589 = vst.msk [vmem:[#allocation3 + $0xe8] sm:$0xff] %vm13667_vm3, %v13564_v60  ;;  %590 = vst.msk [vmem:[#allocation3 + $0xf0] sm:$0xff] %vm13667_vm3, %v13564_v60 }
 0x1b4   : > { %591 = vst.msk [vmem:[#allocation3 + $0xf8] sm:$0xff] %vm13667_vm3, %v13564_v60  ;;  %592 = vst.msk [vmem:[#allocation3 + $0x100] sm:$0xff] %vm13667_vm3, %v13564_v60 }
 0x1b5   : > { %593 = vst.msk [vmem:[#allocation3 + $0x108] sm:$0xff] %vm13667_vm3, %v13564_v60  ;;  %594 = vst.msk [vmem:[#allocation3 + $0x110] sm:$0xff] %vm13667_vm3, %v13564_v60 }
 0x1b6   : > { %595 = vst.msk [vmem:[#allocation3 + $0x118] sm:$0xff] %vm13667_vm3, %v13564_v60  ;;  %596 = vst.msk [vmem:[#allocation3 + $0x120] sm:$0xff] %vm13667_vm3, %v13564_v60 }
 0x1b7   : > { %8479 = vmatmul.mubr.msk.bf16.gmra.mrb[16].mxu0 %vm14007_vm10, %v2674_v62  ;;  %vm14025_vm10 = vmmov %vm13999_vm4  ;;  %597 = vst.msk [vmem:[#allocation3 + $0x128] sm:$0xff] %vm13667_vm3, %v13564_v60  ;;  %v2966_v62 = vpack.c.bf16 %v2942_v61, %v2941_v53  ;;  %v14061_v53 = vld [vmem:[#allocation66_spill] sm:$0xff] }
 0x1b8   : > { %8482 = vmatprep.mubr.msk.bf16.mxu0 %vm14008_vm11, %v2675_v0  ;;  %598 = vst.msk [vmem:[#allocation3 + $0x130] sm:$0xff] %vm13667_vm3, %v13564_v60  ;;  %599 = vst.msk [vmem:[#allocation3 + $0x138] sm:$0xff] %vm13667_vm3, %v13564_v60  ;;  %v2967_v0 = vpack.c.bf16 %v2944_v24, %v2943_v46  ;;  %v14064_v24 = vld [vmem:[#allocation69_spill] sm:$0xff] }
 0x1b9   : > { %vm14026_vm11 = vmmov %vm13999_vm4 }
 0x1ba   : > { %vm14028_vm0 = vmmov %vm14027_vm1 }
 0x1bb   : > { %vm14031_vm5 = vmmov %vm14028_vm0 }
 0x1bc   : > { %vm14032_vm6 = vmmov %vm14028_vm0 }
 0x1bd   : > { %vm14035_vm9 = vmmov %vm14028_vm0 }
 0x1bf   : > { %8483 = vmatmul.mubr.msk.bf16.gmra.mrb[20].mxu0 %vm14012_vm14, %v2676_v59  ;;  %vm14029_vm14 = vmmov %vm14028_vm0  ;;  %v2948_v59 = vld [vmem:[%s9517_s18 + $0xc9] sm:$0xff] }
 0x1c0   : > { %8486 = vmatprep.mubr.msk.bf16.mxu0 %vm13999_vm4, %v2677_v7  ;;  %vm14030_vm4 = vmmov %vm14028_vm0  ;;  %v2968_v7 = vpack.c.bf16 %v2946_v45, %v2945_v1  ;;  %v2969_v13 = vpack.c.bf16 %v2948_v59, %v2947_v2  ;;  %v14067_v1 = vld [vmem:[#allocation72_spill] sm:$0xff]  ;;  %v14068_v45 = vld [vmem:[#allocation63_spill] sm:$0xff] }
 0x1c1   : > { %v14070_v59 = vld [vmem:[#allocation74_spill] sm:$0xff] }
 0x1c7   : > { %8487 = vmatmul.mubr.msk.bf16.gmra.mrb[24].mxu0 %vm14020_vm7, %v2678_v50  ;;  %vm14033_vm7 = vmmov %vm14028_vm0  ;;  %v2971_v50 = vpack.c.bf16 %v2952_v57, %v2951_v27  ;;  %v14075_v27 = vld [vmem:[#allocation71_spill] sm:$0xff] }
 0x1c8   : > { %8490 = vmatprep.mubr.msk.bf16.mxu0 %vm14021_vm8, %v2679_v11  ;;  %vm14034_vm8 = vmmov %vm14028_vm0  ;;  %v2954_v11 = vld [vmem:[%s9517_s18 + $0xf9] sm:$0xff] }
 0x1c9   : > { %v2972_v5 = vpack.c.bf16 %v2954_v11, %v2953_v51  ;;  %v14080_v51 = vld [vmem:[#allocation76_spill] sm:$0xff] }
 0x1cf   : > { %8491 = vmatmul.mubr.msk.bf16.gmra.mrb[28].mxu0 %vm14024_vm13, %v2680_v25  ;;  %vm14036_vm13 = vmmov %vm14028_vm0  ;;  %v3254_v25 = vsel %vm13928_vm12, %v14041_v47, 0.0  ;;  %v14089_v47 = vld [vmem:[#allocation87_spill] sm:$0xff] }
 0x1d0   : > { %8496 = vmatprep.mubr.msk.bf16.mxu0 %vm14025_vm10, %v2959_v41  ;;  %vm14037_vm10 = vmmov %vm14028_vm0  ;;  %v2974_v41 = vpack.c.bf16 %v2958_v20, %v2957_v14  ;;  %v3285_v9 = vpack.c.bf16 %v3254_v25, %v14043_v38  ;;  %v3252_v38 = vld [vmem:[%s9517_s18 + $0x11a] sm:$0xff] }
 0x1d1   : > { %vm14053_vm12 = vmmov %vm14028_vm0 }
 0x1d7   : > { %8497 = vmatmul.mubr.msk.bf16.vlgmr.msra.gmra.mrb[0].mxu0 %vm14026_vm11, %v2960_v10  ;;  %vm14038_vm11 = vmmov %vm14028_vm0 }
 0x1d8   : > { %8529 = vmatpush3.bf16.msra.mxu0 %v10528_v40  ;;  %8500 = vmatprep.mubr.msk.bf16.mxu0 %vm14027_vm1, %v2961_v55  ;;  %v2938_v40 = vld [vmem:[%s9517_s18 + $0x79] sm:$0xff]  ;;  %vm14040_vm1 = vmmov %vm14028_vm0 }
 0x1d9   : > { %8868 = vmatprep.subr.bf16.mxu0 %v13564_v60  ;;  %v2964_v43 = vpack.c.bf16 %v2938_v40, %v2937_v30  ;;  %v14048_v55 = vld [vmem:[#allocation56_spill] sm:$0xff]  ;;  %v14055_v30 = vld [vmem:[#allocation61_spill] sm:$0xff] }
 0x1da   : > { %v14056_v40 = vld [vmem:[#allocation52_spill] sm:$0xff] }
 0x1df   : > { %8501 = vmatmul.mubr.msk.bf16.gmra.mrb[4].mxu0 %vm14028_vm0, %v2962_v4  ;;  %v14052_v4 = vld [vmem:[#allocation59_spill] sm:$0xff] }
 0x1e0   : > { %8504 = vmatprep.mubr.msk.bf16.mxu0 %vm14029_vm14, %v2963_v48  ;;  %vm14044_vm14 = vmmov %vm14028_vm0 }
 0x1e7   : > { %8505 = vmatmul.mubr.msk.bf16.gmra.mrb[8].mxu0 %vm14030_vm4, %v2964_v43  ;;  %vm14047_vm4 = vnez %v14046_v15  ;;  %v14059_v43 = vld [vmem:[#allocation55_spill] sm:$0xff] }
 0x1e8   : > { %8508 = vmatprep.mubr.msk.bf16.mxu0 %vm14031_vm5, %v2965_v52  ;;  %v3256_v10 = vsel %vm14047_vm4, %v14045_v18, 0.0  ;;  %vm14050_vm5 = vnez %v14049_v19  ;;  %vm14076_vm4 = vnez %v14075_v27  ;;  %v10896_v19 = vld [vmem:[%s13321_s2] ss:$0 sm:$0xff] }
 0x1e9   : > { %v3258_v6 = vsel %vm14050_vm5, %v14048_v55, 0.0  ;;  %v3286_v37 = vpack.c.bf16 %v3256_v10, %v14051_v31  ;;  %v3270_v57 = vsel %vm14076_vm4, %v13971_v42, 0.0  ;;  %vm14077_vm5 = vmmov %vm14028_vm0  ;;  %v9413_v10 = vld [vmem:[%s13322_s3] sm:$0xff]   ;;  %v9414_v55 = vld [vmem:[%s13322_s3 + $0x10] sm:$0xff]  }
 0x1ea   : > { %v3287_v48 = vpack.c.bf16 %v3258_v6, %v14052_v4 }
 0x1ef   : > { %8509 = vmatmul.mubr.msk.bf16.gmra.mrb[12].mxu0 %vm14032_vm6, %v2966_v62  ;;  %vm14054_vm6 = vmmov %vm14028_vm0  ;;  %v14065_v62 = vld [vmem:[#allocation60_spill] sm:$0xff] }
 0x1f0   : > { %8512 = vmatprep.mubr.msk.bf16.mxu0 %vm14033_vm7, %v2967_v0  ;;  %vm14057_vm7 = vnez %v14056_v40 }
 0x1f1   : > { %v3260_v36 = vsel %vm14057_vm7, %v14055_v30, 0.0 }
 0x1f2   : > { %v3288_v61 = vpack.c.bf16 %v3260_v36, %v14061_v53 }
 0x1f7   : > { %8513 = vmatmul.mubr.msk.bf16.gmra.mrb[16].mxu0 %vm14034_vm8, %v2968_v7  ;;  %vm14060_vm8 = vnez %v14059_v43 }
 0x1f8   : > { %8516 = vmatprep.mubr.msk.bf16.mxu0 %vm14035_vm9, %v2969_v13  ;;  %v3262_v52 = vsel %vm14060_vm8, %v14058_v39, 0.0  ;;  %vm14062_vm9 = vmmov %vm14028_vm0 }
 0x1f9   : > { %v3289_v46 = vpack.c.bf16 %v3262_v52, %v13957_v49  ;;  %v14072_v49 = vld [vmem:[#allocation77_spill] sm:$0xff]  ;;  %vm14084_vm8 = vmmov %vm14028_vm0 }
 0x1ff   : > { %8517 = vmatmul.mubr.msk.bf16.gmra.mrb[20].mxu0 %vm14036_vm13, %v2970_v44  ;;  %vm14063_vm13 = vmmov %vm14028_vm0 }
 0x200   : > { %8520 = vmatprep.mubr.msk.bf16.mxu0 %vm14037_vm10, %v2971_v50  ;;  %vm14066_vm10 = vnez %v14065_v62  ;;  %v3293_v50 = vpack.c.bf16 %v3270_v57, %v13977_v56  ;;  %v14087_v56 = vld [vmem:[#allocation84_spill] sm:$0xff] }
 0x201   : > { %v3264_v0 = vsel %vm14066_vm10, %v14064_v24, 0.0  ;;  %vm14090_vm10 = vnez %v14089_v47 }
 0x202   : > { %v3290_v7 = vpack.c.bf16 %v3264_v0, %v14070_v59  ;;  %v3278_v54 = vsel %vm14090_vm10, %v10255_v22, 0.0 }
 0x207   : > { %8521 = vmatmul.mubr.msk.bf16.gmra.mrb[24].mxu0 %vm14038_vm11, %v2972_v5  ;;  %vm14069_vm11 = vnez %v14068_v45  ;;  %v14082_v5 = vld [vmem:[#allocation79_spill] sm:$0xff] }
 0x208   : > { %8524 = vmatprep.mubr.msk.bf16.mxu0 %vm14040_vm1, %v14039_v12  ;;  %v3266_v2 = vsel %vm14069_vm11, %v14067_v1, 0.0  ;;  %vm14071_vm1 = vmmov %vm14028_vm0  ;;  %vm14083_vm7 = vnez %v14082_v5 }
 0x209   : > { %v3291_v13 = vpack.c.bf16 %v3266_v2, %v13967_v8  ;;  %v14079_v8 = vld [vmem:[#allocation85_spill] sm:$0xff]  ;;  %v3274_v12 = vsel %vm14083_vm7, %v13980_v32, 0.0  ;;  %v3297_v32 = vpack.c.bf16 %v3278_v54, %v10266_v33  ;;  %vm14091_vm11 = vmmov %vm14028_vm0  ;;  %v3251_v33 = vld [vmem:[%s9517_s18 + $0x112] sm:$0xff]  ;;  %s328_s18 = scalar_lea.vmem %s13328_s9, %s14802_s10 }
 0x20a   : > { %v3295_v42 = vpack.c.bf16 %v3274_v12, %v10227_v35 }
 0x20f   : > { %8525 = vmatmul.mubr.msk.bf16.gmra.mrb[28].mxu0 %vm14028_vm0, %v2974_v41 }
 0x210   : > { %8530 = vmatprep.mubr.msk.bf16.mxu0 %vm14044_vm14, %v3285_v9  ;;  %vm14074_vm14 = vnez %v14073_v26  ;;  %v3284_v9 = vsel %vm10276_vm2, %v3252_v38, 0.0  ;;  %vm558_vm2 = vcmask 122880  }
 0x211   : > { %v3268_v63 = vsel %vm14074_vm14, %v14072_v49, 0.0  ;;  %v3300_v18 = vpack.c.bf16 %v3284_v9, %v3251_v33  ;;  %559 = vst.msk [vmem:[#allocation2 + $0x110] sm:$0x1] %vm558_vm2, %v13564_v60 }
 0x212   : > { %v3292_v44 = vpack.c.bf16 %v3268_v63, %v13968_v21  ;;  %v14086_v21 = vld [vmem:[#allocation91_spill] sm:$0xff] }
 0x217   : > { %8531 = vmatmul.mubr.msk.bf16.vlgmr.msra.gmra.mrb[0].mxu0 %vm14053_vm12, %v3286_v37  ;;  %vm14078_vm12 = vmmov %vm14028_vm0 }
 0x218   : > { %8534 = vmatprep.mubr.msk.bf16.mxu0 %vm14054_vm6, %v3287_v48  ;;  %vm14081_vm6 = vnez %v14080_v51 }
 0x219   : > { %v3272_v11 = vsel %vm14081_vm6, %v14079_v8, 0.0 }
 0x21a   : > { %v3294_v14 = vpack.c.bf16 %v3272_v11, %v10221_v23  ;;  %v3280_v23 = vsel %vm13988_vm15, %v10281_v28, 0.0  ;;  %v9412_v28 = vld [vmem:[%s13322_s3 + $0x8] sm:$0xff]  }
 0x21b   : > { %v3298_v41 = vpack.c.bf16 %v3280_v23, %v10286_v34  ;;  %8562 = vmatprep.subr.bf16.mxu1 %v9412_v28  ;;  %v3991_v34 = vld [vmem:[#allocation3 + $0xa] sm:$0xff] }
 0x21c   : > { %8563 = vmatpush3.bf16.msra.mxu1 %v9412_v28 }
 0x21d   : > { %8596 = vmatprep.subr.bf16.mxu1 %v9413_v10 }
 0x21f   : > { %8535 = vmatmul.mubr.msk.bf16.gmra.mrb[4].mxu0 %vm14062_vm9, %v3288_v61  ;;  %vm14085_vm9 = vmmov %vm14028_vm0 }
 0x220   : > { %8538 = vmatprep.mubr.msk.bf16.mxu0 %vm14063_vm13, %v3289_v46  ;;  %vm14088_vm13 = vnez %v14087_v56 }
 0x221   : > { %v3276_v20 = vsel %vm14088_vm13, %v14086_v21, 0.0 }
 0x222   : > { %v3296_v25 = vpack.c.bf16 %v3276_v20, %v10260_v29 }
 0x227   : > { %8539 = vmatmul.mubr.msk.bf16.gmra.mrb[8].mxu0 %vm14071_vm1, %v3290_v7  ;;  %vm14092_vm1 = vmmov %vm14028_vm0 }
 0x228   : > { %8542 = vmatprep.mubr.msk.bf16.mxu0 %vm14028_vm0, %v3291_v13  ;;  %vm14093_vm0 = vnez %v13989_v3  ;;  %vm14094_vm14 = vmmov %vm14092_vm1  ;;  %v3992_v3 = vld [vmem:[#allocation3 + $0x12] sm:$0xff] }
 0x229   : > { %v3282_v35 = vsel %vm14093_vm0, %v10499_v17, 0.0  ;;  %vm14095_vm4 = vmmov %vm14092_vm1  ;;  %v3990_v17 = vld [vmem:[#allocation3 + $0x2] sm:$0xff] }
 0x22a   : > { %v3299_v22 = vpack.c.bf16 %v3282_v35, %v10504_v58  ;;  %v4022_v16 = vpack.c.bf16 %v3991_v34, %v3990_v17  ;;  %v3993_v58 = vld [vmem:[#allocation3 + $0x1a] sm:$0xff] }
 0x22b   : > { %v4023_v15 = vpack.c.bf16 %v3993_v58, %v3992_v3 }
 0x22c   : > { %8564 = vmatprep.mubr.msk.bf16.mxu1 %vm13667_vm3, %v4022_v16 }
 0x22d   : > { %8565 = vmatmul.mubr.msk.bf16.vlgmr.msra.gmra.mrb[0].mxu1 %vm13667_vm3, %v4023_v15 }
 0x22e   : > { %8597 = vmatpush3.bf16.msra.mxu1 %v9413_v10 }
 0x22f   : > { %8543 = vmatmul.mubr.msk.bf16.gmra.mrb[12].mxu0 %vm14077_vm5, %v3292_v44  ;;  %vm14097_vm5 = vmmov %vm14092_vm1  ;;  %8630 = vmatprep.subr.bf16.mxu1 %v9414_v55 }
 0x230   : > { %8546 = vmatprep.mubr.msk.bf16.mxu0 %vm14078_vm12, %v3293_v50 }
 0x237   : > { %8547 = vmatmul.mubr.msk.bf16.gmra.mrb[16].mxu0 %vm14084_vm8, %v3294_v14 }
 0x238   : > { %8550 = vmatprep.mubr.msk.bf16.mxu0 %vm14085_vm9, %v3295_v42 }
 0x23f   : > { %8551 = vmatmul.mubr.msk.bf16.gmra.mrb[20].mxu0 %vm14091_vm11, %v3296_v25 }
 0x240   : > { %8554 = vmatprep.mubr.msk.bf16.mxu0 %vm14092_vm1, %v3297_v32 }
 0x247   : > { %8555 = vmatmul.mubr.msk.bf16.gmra.mrb[24].mxu0 %vm14094_vm14, %v3298_v41 }
 0x248   : > { %8558 = vmatprep.mubr.msk.bf16.mxu0 %vm14095_vm4, %v3299_v22 }
 0x24f   : > { %8559 = vmatmul.mubr.msk.bf16.gmra.mrb[28].mxu0 %vm14097_vm5, %v3300_v18 }
 0x2ea   : > { %v8532_v6 = vpop.f32.mrb[0].mxu0 }
 0x2eb   : > { %v3556_v31 = vadd.f32 %v8532_v6, %v10896_v19  ;;  %v3388_v37 = vpop.f32.mrb[1].mxu0 }
 0x2ec   : > { %v3554_v4 = vadd.f32 %v10896_v19, %v3388_v37  ;;  %v8533_v48 = vpop.f32.mrb[2].mxu0 }
 0x2ed   : > { %v3588_v30 = vmax.f32 %v3556_v31, 0.0  ;;  %v3557_v40 = vadd.f32 %v8533_v48, %v10896_v19  ;;  %v3391_v36 = vpop.f32.mrb[3].mxu0 }
 0x2ee   : > { %v3586_v39 = vmax.f32 %v3554_v4, 0.0  ;;  %v3555_v43 = vadd.f32 %v10896_v19, %v3391_v36 }
 0x2ef   : > { %3620 = vst.msk [vmem:[#allocation2 + $0x10] sm:$0xff] %vm13667_vm3, %v3588_v30  ;;  %v3589_v52 = vmax.f32 %v3557_v40, 0.0 }
 0x2f0   : > { %3618 = vst.msk [vmem:[#allocation2] sm:$0xff] %vm13667_vm3, %v3586_v39  ;;  %v3587_v53 = vmax.f32 %v3555_v43, 0.0 }
 0x2f1   : > { %3621 = vst.msk [vmem:[#allocation2 + $0x18] sm:$0xff] %vm13667_vm3, %v3589_v52 }
 0x2f2   : > { %3619 = vst.msk [vmem:[#allocation2 + $0x8] sm:$0xff] %vm13667_vm3, %v3587_v53  ;;  %v8536_v61 = vpop.f32.mrb[4].mxu0 }
 0x2f3   : > { %v10907_v46 = vadd.f32 %v8536_v61, %v10896_v19  ;;  %v3404_v24 = vpop.f32.mrb[5].mxu0 }
 0x2f4   : > { %v3558_v62 = vadd.f32 %v10896_v19, %v3404_v24  ;;  %v8537_v0 = vpop.f32.mrb[6].mxu0 }
 0x2f5   : > { %v3592_v1 = vmax.f32 %v10907_v46, 0.0  ;;  %v10912_v45 = vadd.f32 %v8537_v0, %v10896_v19  ;;  %v3407_v2 = vpop.f32.mrb[7].mxu0 }
 0x2f6   : > { %v3590_v59 = vmax.f32 %v3558_v62, 0.0  ;;  %v3559_v7 = vadd.f32 %v10896_v19, %v3407_v2  ;;  %v3714_v8 = vld [vmem:[#allocation2 + $0x10] sm:$0xff] }
 0x2f7   : > { %3624 = vst.msk [vmem:[#allocation2 + $0x30] sm:$0xff] %vm13667_vm3, %v3592_v1  ;;  %v3593_v13 = vmax.f32 %v10912_v45, 0.0 }
 0x2f8   : > { %3622 = vst.msk [vmem:[#allocation2 + $0x20] sm:$0xff] %vm13667_vm3, %v3590_v59  ;;  %v3591_v49 = vmax.f32 %v3559_v7, 0.0  ;;  %v3652_v44 = vld [vmem:[#allocation2 + $0x11] sm:$0xff] }
 0x2f9   : > { %v3650_v26 = vld [vmem:[#allocation2 + $0x1] sm:$0xff]  ;;  %v3651_v63 = vld [vmem:[#allocation2 + $0x9] sm:$0xff]  ;;  %3625 = vst.msk [vmem:[#allocation2 + $0x38] sm:$0xff] %vm13667_vm3, %v3593_v13  ;;  %v3715_v42 = vld [vmem:[#allocation2 + $0x18] sm:$0xff]  ;;  %v3684_v21 = vmax.f32 %v3588_v30, %v3652_v44 }
 0x2fa   : > { %v3682_v27 = vmax.f32 %v3586_v39, %v3650_v26  ;;  %v3683_v57 = vmax.f32 %v3587_v53, %v3651_v63  ;;  %3623 = vst.msk [vmem:[#allocation2 + $0x28] sm:$0xff] %vm13667_vm3, %v3591_v49  ;;  %v8540_v50 = vpop.f32.mrb[8].mxu0 }
 0x2fb   : > { %v10923_v51 = vadd.f32 %v8540_v50, %v10896_v19  ;;  %v3420_v11 = vpop.f32.mrb[9].mxu0 }
 0x2fc   : > { %v3746_v5 = vmax.f32 %v3682_v27, %v3714_v8  ;;  %v10926_v12 = vadd.f32 %v10896_v19, %v3420_v11  ;;  %v8541_v14 = vpop.f32.mrb[10].mxu0  ;;  %v3747_v54 = vmax.f32 %v3683_v57, %v3715_v42 }
 0x2fd   : > { %v3596_v56 = vmax.f32 %v10923_v51, 0.0  ;;  %v10930_v20 = vadd.f32 %v8541_v14, %v10896_v19  ;;  %v3423_v47 = vpop.f32.mrb[11].mxu0 }
 0x2fe   : > { %v3780_v25 = vmax.f32 %v3746_v5, %v3652_v44  ;;  %v3594_v32 = vmax.f32 %v10926_v12, 0.0  ;;  %v3563_v23 = vadd.f32 %v10896_v19, %v3423_v47  ;;  %v3718_v55 = vld [vmem:[#allocation2 + $0x30] sm:$0xff]  ;;  %v14098_v44 = vld [vmem:[#allocation15_spill] sm:$0xff] }
 0x2ff   : > { %v3653_v35 = vld [vmem:[#allocation2 + $0x19] sm:$0xff]  ;;  %3628 = vst.msk [vmem:[#allocation2 + $0x50] sm:$0xff] %vm13667_vm3, %v3596_v56  ;;  %v3597_v22 = vmax.f32 %v10930_v20, 0.0  ;;  %v14099_v45 = vand.u32 15, %v14098_v44  ;;  %v14105_v20 = vld [vmem:[#allocation18_spill] sm:$0xff] }
 0x300   : > { %v3716_v41 = vld [vmem:[#allocation2 + $0x20] sm:$0xff]  ;;  %v3685_v38 = vmax.f32 %v3589_v52, %v3653_v35  ;;  %v3781_v29 = vmax.f32 %v3747_v54, %v3653_v35  ;;  %3812 = vst.msk [vmem:[#allocation3 + $0x22] sm:$0xff] %vm13667_vm3, %v3780_v25  ;;  %3626 = vst.msk [vmem:[#allocation2 + $0x40] sm:$0xff] %vm13667_vm3, %v3594_v32  ;;  %v3595_v9 = vmax.f32 %v3563_v23, 0.0  ;;  %v3656_v34 = vld [vmem:[#allocation2 + $0x31] sm:$0xff] }
 0x301   : > { %v3748_v33 = vmax.f32 %v3684_v21, %v3716_v41  ;;  %v3654_v18 = vld [vmem:[#allocation2 + $0x21] sm:$0xff]  ;;  %v3655_v28 = vld [vmem:[#allocation2 + $0x29] sm:$0xff]  ;;  %3629 = vst.msk [vmem:[#allocation2 + $0x58] sm:$0xff] %vm13667_vm3, %v3597_v22  ;;  %v3688_v40 = vmax.f32 %v3592_v1, %v3656_v34  ;;  %v3719_v36 = vld [vmem:[#allocation2 + $0x38] sm:$0xff]  ;;  %vm10979_vm15 = vcmp.ge.s32.totalorder %v14099_v45, 2 }
 0x302   : > { %v3717_v17 = vld [vmem:[#allocation2 + $0x28] sm:$0xff]  ;;  %v3686_v16 = vmax.f32 %v3590_v59, %v3654_v18  ;;  %v3687_v3 = vmax.f32 %v3591_v49, %v3655_v28  ;;  %3813 = vst.msk [vmem:[#allocation3 + $0x2a] sm:$0xff] %vm13667_vm3, %v3781_v29  ;;  %3627 = vst.msk [vmem:[#allocation2 + $0x48] sm:$0xff] %vm13667_vm3, %v3595_v9  ;;  %v8544_v10 = vpop.f32.mrb[12].mxu0 }
 0x303   : > { %v3749_v58 = vmax.f32 %v3685_v38, %v3717_v17  ;;  %v3782_v15 = vmax.f32 %v3748_v33, %v3654_v18  ;;  %v10946_v6 = vadd.f32 %v8544_v10, %v10896_v19  ;;  %v3436_v31 = vpop.f32.mrb[13].mxu0 }
 0x304   : > { %v3750_v37 = vmax.f32 %v3686_v16, %v3718_v55  ;;  %v10950_v48 = vadd.f32 %v10896_v19, %v3436_v31  ;;  %v8545_v30 = vpop.f32.mrb[14].mxu0  ;;  %v3751_v53 = vmax.f32 %v3687_v3, %v3719_v36 }
 0x305   : > { %v3783_v4 = vmax.f32 %v3749_v58, %v3655_v28  ;;  %3814 = vst.msk [vmem:[#allocation3 + $0x32] sm:$0xff] %vm13667_vm3, %v3782_v15  ;;  %v3600_v39 = vmax.f32 %v10946_v6, 0.0  ;;  %v10954_v43 = vadd.f32 %v8545_v30, %v10896_v19  ;;  %v3439_v52 = vpop.f32.mrb[15].mxu0 }
 0x306   : > { %v3784_v61 = vmax.f32 %v3750_v37, %v3656_v34  ;;  %v3598_v46 = vmax.f32 %v10950_v48, 0.0  ;;  %v10959_v24 = vadd.f32 %v10896_v19, %v3439_v52  ;;  %v3722_v47 = vld [vmem:[#allocation2 + $0x50] sm:$0xff] }
 0x307   : > { %3815 = vst.msk [vmem:[#allocation3 + $0x3a] sm:$0xff] %vm13667_vm3, %v3783_v4  ;;  %v3657_v62 = vld [vmem:[#allocation2 + $0x39] sm:$0xff]  ;;  %3632 = vst.msk [vmem:[#allocation2 + $0x70] sm:$0xff] %vm13667_vm3, %v3600_v39  ;;  %v3601_v1 = vmax.f32 %v10954_v43, 0.0 }
 0x308   : > { %v3720_v0 = vld [vmem:[#allocation2 + $0x40] sm:$0xff]  ;;  %3816 = vst.msk [vmem:[#allocation3 + $0x42] sm:$0xff] %vm13667_vm3, %v3784_v61  ;;  %v3689_v2 = vmax.f32 %v3593_v13, %v3657_v62  ;;  %v3785_v7 = vmax.f32 %v3751_v53, %v3657_v62  ;;  %3630 = vst.msk [vmem:[#allocation2 + $0x60] sm:$0xff] %vm13667_vm3, %v3598_v46  ;;  %v3599_v49 = vmax.f32 %v10959_v24, 0.0  ;;  %v10972_v26 = vld [vmem:[#allocation3 + $0x20] sm:$0xff] }
 0x309   : > { %v3752_v59 = vmax.f32 %v3688_v40, %v3720_v0  ;;  %v3658_v63 = vld [vmem:[#allocation2 + $0x41] sm:$0xff]  ;;  %v3659_v27 = vld [vmem:[#allocation2 + $0x49] sm:$0xff]  ;;  %3633 = vst.msk [vmem:[#allocation2 + $0x78] sm:$0xff] %vm13667_vm3, %v3601_v1  ;;  %v3660_v50 = vld [vmem:[#allocation2 + $0x51] sm:$0xff] }
 0x30a   : > { %v3721_v57 = vld [vmem:[#allocation2 + $0x48] sm:$0xff]  ;;  %v3690_v8 = vmax.f32 %v3594_v32, %v3658_v63  ;;  %v3691_v11 = vmax.f32 %v3595_v9, %v3659_v27  ;;  %3817 = vst.msk [vmem:[#allocation3 + $0x4a] sm:$0xff] %vm13667_vm3, %v3785_v7  ;;  %3631 = vst.msk [vmem:[#allocation2 + $0x68] sm:$0xff] %vm13667_vm3, %v3599_v49  ;;  %v8548_v14 = vpop.f32.mrb[16].mxu0  ;;  %v3994_v42 = vld [vmem:[#allocation3 + $0x22] sm:$0xff]  ;;  %v4897_v9 = vsel %vm10979_vm15, %v10972_v26, 0.0  ;;  %v3692_v18 = vmax.f32 %v3596_v56, %v3660_v50 }
 0x30b   : > { %v3753_v5 = vmax.f32 %v3689_v2, %v3721_v57  ;;  %v3786_v12 = vmax.f32 %v3752_v59, %v3658_v63  ;;  %v3995_v21 = vld [vmem:[#allocation3 + $0x2a] sm:$0xff]  ;;  %v10986_v54 = vadd.f32 %v8548_v14, %v10896_v19  ;;  %v3452_v25 = vpop.f32.mrb[17].mxu0  ;;  %v3723_v35 = vld [vmem:[#allocation2 + $0x58] sm:$0xff] }
 0x30c   : > { %v10988_v23 = vpack.c.bf16 %v3995_v21, %v3994_v42  ;;  %v3754_v41 = vmax.f32 %v3690_v8, %v3722_v47  ;;  %v10992_v38 = vadd.f32 %v10896_v19, %v3452_v25  ;;  %v8549_v33 = vpop.f32.mrb[18].mxu0  ;;  %v10994_v29 = vld [vmem:[#allocation3 + $0x28] sm:$0xff]  ;;  %v3755_v28 = vmax.f32 %v3691_v11, %v3723_v35  ;;  %v3996_v3 = vld [vmem:[#allocation3 + $0x32] sm:$0xff] }
 0x30d   : > { %v3787_v32 = vmax.f32 %v3753_v5, %v3659_v27  ;;  %3818 = vst.msk [vmem:[#allocation3 + $0x52] sm:$0xff] %vm13667_vm3, %v3786_v12  ;;  %v3604_v17 = vmax.f32 %v10986_v54, 0.0  ;;  %v11003_v34 = vadd.f32 %v8549_v33, %v10896_v19  ;;  %v3455_v16 = vpop.f32.mrb[19].mxu0  ;;  %v11019_v4 = vpack.c.bf16 %v10994_v29, %v4897_v9  ;;  %v11030_v53 = vld [vmem:[#allocation3 + $0x30] sm:$0xff] }
 0x30e   : > { %14102 = vst [vmem:[#allocation6_spill] sm:$0xff] %v10988_v23  ;;  %8568 = vmatprep.mubr.msk.bf16.mxu1 %vm13667_vm3, %v10988_v23  ;;  %v3997_v58 = vld [vmem:[#allocation3 + $0x3a] sm:$0xff]  ;;  %v3788_v15 = vmax.f32 %v3754_v41, %v3660_v50  ;;  %v3602_v10 = vmax.f32 %v10992_v38, 0.0  ;;  %v11010_v51 = vadd.f32 %v10896_v19, %v3455_v16 }
 0x30f   : > { %3819 = vst.msk [vmem:[#allocation3 + $0x5a] sm:$0xff] %vm13667_vm3, %v3787_v32  ;;  %v11012_v56 = vpack.c.bf16 %v3997_v58, %v3996_v3  ;;  %v3661_v55 = vld [vmem:[#allocation2 + $0x59] sm:$0xff]  ;;  %3636 = vst.msk [vmem:[#allocation2 + $0x90] sm:$0xff] %vm13667_vm3, %v3604_v17  ;;  %v3605_v37 = vmax.f32 %v11003_v34, 0.0  ;;  %v3726_v8 = vld [vmem:[#allocation2 + $0x70] sm:$0xff] }
 0x310   : > { %v3724_v31 = vld [vmem:[#allocation2 + $0x60] sm:$0xff]  ;;  %14104 = vst [vmem:[#allocation8_spill] sm:$0xff] %v11019_v4  ;;  %3820 = vst.msk [vmem:[#allocation3 + $0x62] sm:$0xff] %vm13667_vm3, %v3788_v15  ;;  %v3693_v30 = vmax.f32 %v3597_v22, %v3661_v55  ;;  %v3789_v36 = vmax.f32 %v3755_v28, %v3661_v55  ;;  %v3603_v52 = vmax.f32 %v11010_v51, 0.0  ;;  %v14106_v22 = vand.u32 15, %v14105_v20  ;;  %v3664_v2 = vld [vmem:[#allocation2 + $0x71] sm:$0xff] }
 0x311   : > { %14103 = vst [vmem:[#allocation7_spill] sm:$0xff] %v11012_v56  ;;  %v3756_v40 = vmax.f32 %v3692_v18, %v3724_v31  ;;  %3634 = vst.msk [vmem:[#allocation2 + $0x80] sm:$0xff] %vm13667_vm3, %v3602_v10  ;;  %8569 = vmatmul.mubr.msk.bf16.gmra.mrb[4].mxu1 %vm13667_vm3, %v11012_v56  ;;  %v3662_v61 = vld [vmem:[#allocation2 + $0x61] sm:$0xff]  ;;  %v3663_v24 = vld [vmem:[#allocation2 + $0x69] sm:$0xff]  ;;  %v3696_v25 = vmax.f32 %v3600_v39, %v3664_v2 }
 0x312   : > { %v3725_v62 = vld [vmem:[#allocation2 + $0x68] sm:$0xff]  ;;  %3637 = vst.msk [vmem:[#allocation2 + $0x98] sm:$0xff] %vm13667_vm3, %v3605_v37  ;;  %vm11037_vm12 = vcmp.ge.s32.totalorder %v14106_v22, 2  ;;  %v3694_v59 = vmax.f32 %v3598_v46, %v3662_v61  ;;  %v3695_v7 = vmax.f32 %v3599_v49, %v3663_v24  ;;  %3821 = vst.msk [vmem:[#allocation3 + $0x6a] sm:$0xff] %vm13667_vm3, %v3789_v36  ;;  %v8552_v57 = vpop.f32.mrb[20].mxu0  ;;  %v3998_v45 = vld [vmem:[#allocation3 + $0x42] sm:$0xff] }
 0x313   : > { %v3757_v63 = vmax.f32 %v3693_v30, %v3725_v62  ;;  %v3790_v27 = vmax.f32 %v3756_v40, %v3662_v61  ;;  %3635 = vst.msk [vmem:[#allocation2 + $0x88] sm:$0xff] %vm13667_vm3, %v3603_v52  ;;  %v3999_v50 = vld [vmem:[#allocation3 + $0x4a] sm:$0xff]  ;;  %v11048_v11 = vadd.f32 %v8552_v57, %v10896_v19  ;;  %v3468_v5 = vpop.f32.mrb[21].mxu0  ;;  %v3727_v48 = vld [vmem:[#allocation2 + $0x78] sm:$0xff]  ;;  %v11056_v21 = vld [vmem:[#allocation3 + $0x38] sm:$0xff]  ;;  %v4899_v47 = vsel %vm11037_vm12, %v11030_v53, 0.0 }
 0x314   : > { %v11050_v12 = vpack.c.bf16 %v3999_v50, %v3998_v45  ;;  %v3758_v46 = vmax.f32 %v3694_v59, %v3726_v8  ;;  %v11054_v14 = vadd.f32 %v10896_v19, %v3468_v5  ;;  %v8553_v42 = vpop.f32.mrb[22].mxu0  ;;  %14110 = vst [vmem:[#allocation10_spill] sm:$0xff] %v11056_v21  ;;  %v3759_v35 = vmax.f32 %v3695_v7, %v3727_v48  ;;  %v4000_v9 = vld [vmem:[#allocation3 + $0x52] sm:$0xff]  ;;  %v11076_v3 = vld [vmem:[#allocation3 + $0x40] sm:$0xff]  ;;  %v14112_v31 = vld [vmem:[#allocation20_spill] sm:$0xff] }
 0x315   : > { %v3791_v49 = vmax.f32 %v3757_v63, %v3663_v24  ;;  %3822 = vst.msk [vmem:[#allocation3 + $0x72] sm:$0xff] %vm13667_vm3, %v3790_v27  ;;  %v3608_v41 = vmax.f32 %v11048_v11, 0.0  ;;  %v11065_v32 = vadd.f32 %v8553_v42, %v10896_v19  ;;  %v3471_v33 = vpop.f32.mrb[23].mxu0  ;;  %v14113_v30 = vand.u32 15, %v14112_v31  ;;  %v11470_v4 = vld [vmem:[#allocation3 + $0x44] sm:$0xff] }
 0x316   : > { %14109 = vst [vmem:[#allocation9_spill] sm:$0xff] %v11050_v12  ;;  %8572 = vmatprep.mubr.msk.bf16.mxu1 %vm13667_vm3, %v11050_v12  ;;  %v4001_v18 = vld [vmem:[#allocation3 + $0x5a] sm:$0xff]  ;;  %v3792_v28 = vmax.f32 %v3758_v46, %v3664_v2  ;;  %v3606_v16 = vmax.f32 %v11054_v14, 0.0  ;;  %v11072_v6 = vadd.f32 %v10896_v19, %v3471_v33  ;;  %v11089_v36 = vpack.c.bf16 %v11056_v21, %v4899_v47 }
 0x317   : > { %3823 = vst.msk [vmem:[#allocation3 + $0x7a] sm:$0xff] %vm13667_vm3, %v3791_v49  ;;  %v11074_v39 = vpack.c.bf16 %v4001_v18, %v4000_v9  ;;  %3640 = vst.msk [vmem:[#allocation2 + $0xb0] sm:$0xff] %vm13667_vm3, %v3608_v41  ;;  %v3609_v55 = vmax.f32 %v11065_v32, 0.0  ;;  %vm11084_vm6 = vcmp.ge.s32.totalorder %v14113_v30, 2  ;;  %v4002_v8 = vld [vmem:[#allocation3 + $0x62] sm:$0xff]  ;;  %v3730_v48 = vld [vmem:[#allocation2 + $0x90] sm:$0xff] }
 0x318   : > { %v3665_v58 = vld [vmem:[#allocation2 + $0x79] sm:$0xff]  ;;  %14116 = vst [vmem:[#allocation12_spill] sm:$0xff] %v11089_v36  ;;  %3824 = vst.msk [vmem:[#allocation3 + $0x82] sm:$0xff] %vm13667_vm3, %v3792_v28  ;;  %v3607_v22 = vmax.f32 %v11072_v6, 0.0  ;;  %v4901_v43 = vsel %vm11084_vm6, %v11076_v3, 0.0 }
 0x319   : > { %14111 = vst [vmem:[#allocation11_spill] sm:$0xff] %v11074_v39  ;;  %v3728_v15 = vld [vmem:[#allocation2 + $0x80] sm:$0xff]  ;;  %v3697_v61 = vmax.f32 %v3601_v1, %v3665_v58  ;;  %v3793_v62 = vmax.f32 %v3759_v35, %v3665_v58  ;;  %3638 = vst.msk [vmem:[#allocation2 + $0xa0] sm:$0xff] %vm13667_vm3, %v3606_v16  ;;  %8573 = vmatmul.mubr.msk.bf16.gmra.mrb[8].mxu1 %vm13667_vm3, %v11074_v39  ;;  %v3668_v1 = vld [vmem:[#allocation2 + $0x91] sm:$0xff] }
 0x31a   : > { %v3760_v24 = vmax.f32 %v3696_v25, %v3728_v15  ;;  %v3666_v2 = vld [vmem:[#allocation2 + $0x81] sm:$0xff]  ;;  %v3667_v59 = vld [vmem:[#allocation2 + $0x89] sm:$0xff]  ;;  %3641 = vst.msk [vmem:[#allocation2 + $0xb8] sm:$0xff] %vm13667_vm3, %v3609_v55  ;;  %3639 = vst.msk [vmem:[#allocation2 + $0xa8] sm:$0xff] %vm13667_vm3, %v3607_v22  ;;  %v8556_v50 = vpop.f32.mrb[24].mxu0  ;;  %v3700_v35 = vmax.f32 %v3604_v17, %v3668_v1 }
 0x31b   : > { %v3729_v7 = vld [vmem:[#allocation2 + $0x88] sm:$0xff]  ;;  %v3698_v63 = vmax.f32 %v3602_v10, %v3666_v2  ;;  %v3699_v27 = vmax.f32 %v3603_v52, %v3667_v59  ;;  %3825 = vst.msk [vmem:[#allocation3 + $0x8a] sm:$0xff] %vm13667_vm3, %v3793_v62  ;;  %v11113_v46 = vadd.f32 %v8556_v50, %v10896_v19  ;;  %v3484_v49 = vpop.f32.mrb[25].mxu0  ;;  %v3731_v38 = vld [vmem:[#allocation2 + $0x98] sm:$0xff]  ;;  %v11121_v25 = vld [vmem:[#allocation3 + $0x48] sm:$0xff] }
 0x31c   : > { %v3761_v57 = vmax.f32 %v3697_v61, %v3729_v7  ;;  %v3794_v45 = vmax.f32 %v3760_v24, %v3666_v2  ;;  %v4003_v5 = vld [vmem:[#allocation3 + $0x6a] sm:$0xff]  ;;  %v11119_v52 = vadd.f32 %v10896_v19, %v3484_v49  ;;  %v8557_v47 = vpop.f32.mrb[26].mxu0  ;;  %v4004_v6 = vld [vmem:[#allocation3 + $0x72] sm:$0xff] }
 0x31d   : > { %v11115_v42 = vpack.c.bf16 %v4003_v5, %v4002_v8  ;;  %v3762_v10 = vmax.f32 %v3698_v63, %v3730_v48  ;;  %v3763_v33 = vmax.f32 %v3699_v27, %v3731_v38  ;;  %v13571_v9 = vmax.f32 %v11113_v46, 0.0  ;;  %v3487_v28 = vpop.f32.mrb[27].mxu0  ;;  %v11138_v61 = vld [vmem:[#allocation3 + $0x50] sm:$0xff] }
 0x31e   : > { %v3795_v51 = vmax.f32 %v3761_v57, %v3667_v59  ;;  %3826 = vst.msk [vmem:[#allocation3 + $0x92] sm:$0xff] %vm13667_vm3, %v3794_v45  ;;  %v11127_v18 = vadd.f32 %v8557_v47, %v10896_v19  ;;  %v4005_v58 = vld [vmem:[#allocation3 + $0x7a] sm:$0xff]  ;;  %v3610_v30 = vmax.f32 %v11119_v52, 0.0  ;;  %v11134_v54 = vadd.f32 %v10896_v19, %v3487_v28  ;;  %v11472_v21 = vld [vmem:[#allocation3 + $0x6c] sm:$0xff] }
 0x31f   : > { %14117 = vst [vmem:[#allocation13_spill] sm:$0xff] %v11115_v42  ;;  %8576 = vmatprep.mubr.msk.bf16.mxu1 %vm13667_vm3, %v11115_v42  ;;  %v3796_v15 = vmax.f32 %v3762_v10, %v3668_v1  ;;  %v11136_v17 = vpack.c.bf16 %v4005_v58, %v4004_v6  ;;  %3644 = vst.msk [vmem:[#allocation2 + $0xd0] sm:$0xff] %vm13667_vm3, %v13571_v9  ;;  %v14119_v59 = vld [vmem:[#allocation22_spill] sm:$0xff]  ;;  %v11151_v63 = vpack.c.bf16 %v11121_v25, %v4901_v43  ;;  %v4006_v47 = vld [vmem:[#allocation3 + $0x82] sm:$0xff]  ;;  %v14147_v9 = vmov 0 }
 0x320   : > { %3827 = vst.msk [vmem:[#allocation3 + $0x9a] sm:$0xff] %vm13667_vm3, %v3795_v51  ;;  %v3669_v24 = vld [vmem:[#allocation2 + $0x99] sm:$0xff]  ;;  %v13570_v2 = vmax.f32 %v11127_v18, 0.0  ;;  %v14120_v7 = vand.u32 15, %v14119_v59  ;;  %3642 = vst.msk [vmem:[#allocation2 + $0xc0] sm:$0xff] %vm13667_vm3, %v3610_v30  ;;  %v3611_v50 = vmax.f32 %v11134_v54, 0.0 }
 0x321   : > { %14118 = vst [vmem:[#allocation14_spill] sm:$0xff] %v11136_v17  ;;  %v3732_v62 = vld [vmem:[#allocation2 + $0xa0] sm:$0xff]  ;;  %14123 = vst [vmem:[#allocation16_spill] sm:$0xff] %v11151_v63  ;;  %v3701_v27 = vmax.f32 %v3605_v37, %v3669_v24  ;;  %v3797_v45 = vmax.f32 %v3763_v33, %v3669_v24  ;;  %8577 = vmatmul.mubr.msk.bf16.gmra.mrb[12].mxu1 %vm13667_vm3, %v11136_v17  ;;  %v3671_v5 = vld [vmem:[#allocation2 + $0xa9] sm:$0xff] }
 0x322   : > { %vm11146_vm7 = vcmp.ge.s32.totalorder %v14120_v7, 2  ;;  %3828 = vst.msk [vmem:[#allocation3 + $0xa2] sm:$0xff] %vm13667_vm3, %v3796_v15  ;;  %v3764_v57 = vmax.f32 %v3700_v35, %v3732_v62  ;;  %v3670_v8 = vld [vmem:[#allocation2 + $0xa1] sm:$0xff]  ;;  %3645 = vst.msk [vmem:[#allocation2 + $0xd8] sm:$0xff] %vm13667_vm3, %v13570_v2  ;;  %v3672_v37 = vld [vmem:[#allocation2 + $0xb1] sm:$0xff]  ;;  %v3703_v49 = vmax.f32 %v3607_v22, %v3671_v5  ;;  %v8560_v51 = vpop.f32.mrb[28].mxu0 }
 0x323   : > { %v3733_v43 = vld [vmem:[#allocation2 + $0xa8] sm:$0xff]  ;;  %v4903_v34 = vsel %vm11146_vm7, %v11138_v61, 0.0  ;;  %v3702_v48 = vmax.f32 %v3606_v16, %v3670_v8  ;;  %3829 = vst.msk [vmem:[#allocation3 + $0xaa] sm:$0xff] %vm13667_vm3, %v3797_v45  ;;  %3643 = vst.msk [vmem:[#allocation2 + $0xc8] sm:$0xff] %vm13667_vm3, %v3611_v50  ;;  %v3734_v33 = vld [vmem:[#allocation2 + $0xb0] sm:$0xff]  ;;  %v11175_v28 = vadd.f32 %v8560_v51, %v10896_v19  ;;  %v3500_v6 = vpop.f32.mrb[29].mxu0  ;;  %v3704_v7 = vmax.f32 %v3608_v41, %v3672_v37 }
 0x324   : > { %v3765_v38 = vmax.f32 %v3701_v27, %v3733_v43  ;;  %v3798_v10 = vmax.f32 %v3764_v57, %v3670_v8  ;;  %v4007_v35 = vld [vmem:[#allocation3 + $0x8a] sm:$0xff]  ;;  %v3735_v14 = vld [vmem:[#allocation2 + $0xb8] sm:$0xff]  ;;  %v11181_v15 = vadd.f32 %v10896_v19, %v3500_v6  ;;  %v8561_v24 = vpop.f32.mrb[30].mxu0  ;;  %v11183_v62 = vld [vmem:[#allocation3 + $0x58] sm:$0xff]  ;;  %14231 = vst [vmem:[#allocation55_spill] sm:$0xff] %v11472_v21 }
 0x325   : > { %v11177_v58 = vpack.c.bf16 %v4007_v35, %v4006_v47  ;;  %v3766_v16 = vmax.f32 %v3702_v48, %v3734_v33  ;;  %v3767_v27 = vmax.f32 %v3703_v49, %v3735_v14  ;;  %v13568_v57 = vmax.f32 %v11175_v28, 0.0  ;;  %v3503_v8 = vpop.f32.mrb[31].mxu0  ;;  %v11200_v49 = vld [vmem:[#allocation3 + $0x60] sm:$0xff]  ;;  %v14132_v54 = vld [vmem:[#allocation25_spill] sm:$0xff]  ;;  %v14145_v2 = vld [vmem:[#allocation28_spill] sm:$0xff] }
 0x326   : > { %v3799_v22 = vmax.f32 %v3765_v38, %v3671_v5  ;;  %3830 = vst.msk [vmem:[#allocation3 + $0xb2] sm:$0xff] %vm13667_vm3, %v3798_v10  ;;  %v11189_v45 = vadd.f32 %v8561_v24, %v10896_v19  ;;  %v4008_v5 = vld [vmem:[#allocation3 + $0x92] sm:$0xff]  ;;  %v13566_v38 = vmax.f32 %v11181_v15, 0.0  ;;  %v11196_v11 = vadd.f32 %v10896_v19, %v3503_v8  ;;  %v11224_v24 = vld [vmem:[#allocation3 + $0x68] sm:$0xff]  ;;  %v11244_v60 = vld [vmem:[#allocation3 + $0x80] sm:$0xff] }
 0x327   : > { %14124 = vst [vmem:[#allocation17_spill] sm:$0xff] %v11177_v58  ;;  %8580 = vmatprep.mubr.msk.bf16.mxu1 %vm13667_vm3, %v11177_v58  ;;  %v4009_v43 = vld [vmem:[#allocation3 + $0x9a] sm:$0xff]  ;;  %v3800_v48 = vmax.f32 %v3766_v16, %v3672_v37  ;;  %v3736_v51 = vld [vmem:[#allocation2 + $0xc0] sm:$0xff]  ;;  %3648 = vst.msk [vmem:[#allocation2 + $0xf0] sm:$0xff] %vm13667_vm3, %v13568_v57  ;;  %v11213_v19 = vpack.c.bf16 %v11183_v62, %v4903_v34 }
 0x328   : > { %3831 = vst.msk [vmem:[#allocation3 + $0xba] sm:$0xff] %vm13667_vm3, %v3799_v22  ;;  %v11198_v41 = vpack.c.bf16 %v4009_v43, %v4008_v5  ;;  %v3673_v10 = vld [vmem:[#allocation2 + $0xb9] sm:$0xff]  ;;  %v13569_v47 = vmax.f32 %v11189_v45, 0.0  ;;  %v3768_v14 = vmax.f32 %v3704_v7, %v3736_v51  ;;  %3646 = vst.msk [vmem:[#allocation2 + $0xe0] sm:$0xff] %vm13667_vm3, %v13566_v38  ;;  %v13567_v22 = vmax.f32 %v11196_v11, 0.0  ;;  %v11226_v34 = vld [vmem:[#allocation3 + $0x70] sm:$0xff] }
 0x329   : > { %v14126_v37 = vld [vmem:[#allocation24_spill] sm:$0xff]  ;;  %14130 = vst [vmem:[#allocation46_spill] sm:$0xff] %v11213_v19  ;;  %3832 = vst.msk [vmem:[#allocation3 + $0xc2] sm:$0xff] %vm13667_vm3, %v3800_v48  ;;  %v3705_v6 = vmax.f32 %v3609_v55, %v3673_v10  ;;  %v3801_v16 = vmax.f32 %v3767_v27, %v3673_v10  ;;  %v3676_v38 = vld [vmem:[#allocation2 + $0xd1] sm:$0xff]  ;;  %v14159_v42 = vmax.f32 %v11189_v45, 0.0 }
 0x32a   : > { %14125 = vst [vmem:[#allocation21_spill] sm:$0xff] %v11198_v41  ;;  %v14127_v35 = vand.u32 15, %v14126_v37  ;;  %8581 = vmatmul.mubr.msk.bf16.gmra.mrb[16].mxu1 %vm13667_vm3, %v11198_v41  ;;  %v3674_v8 = vld [vmem:[#allocation2 + $0xc1] sm:$0xff]  ;;  %v3675_v5 = vld [vmem:[#allocation2 + $0xc9] sm:$0xff]  ;;  %3649 = vst.msk [vmem:[#allocation2 + $0xf8] sm:$0xff] %vm13667_vm3, %v13569_v47  ;;  %v14143_v47 = vmov 0 }
 0x32b   : > { %v3737_v43 = vld [vmem:[#allocation2 + $0xc8] sm:$0xff]  ;;  %v3706_v55 = vmax.f32 %v3610_v30, %v3674_v8  ;;  %v3707_v7 = vmax.f32 %v3611_v50, %v3675_v5  ;;  %v3802_v48 = vmax.f32 %v3768_v14, %v3674_v8  ;;  %3833 = vst.msk [vmem:[#allocation3 + $0xca] sm:$0xff] %vm13667_vm3, %v3801_v16  ;;  %3647 = vst.msk [vmem:[#allocation2 + $0xe8] sm:$0xff] %vm13667_vm3, %v13567_v22  ;;  %v4010_v10 = vld [vmem:[#allocation3 + $0xa2] sm:$0xff]  ;;  %v14133_v50 = vand.u32 15, %v14132_v54 }
 0x32c   : > { %vm11208_vm8 = vcmp.ge.s32.totalorder %v14127_v35, 2  ;;  %v3769_v27 = vmax.f32 %v3705_v6, %v3737_v43  ;;  %v4011_v51 = vld [vmem:[#allocation3 + $0xaa] sm:$0xff]  ;;  %v11242_v35 = vld [vmem:[#allocation3 + $0x78] sm:$0xff]  ;;  %v14134_v6 = vmov 0  ;;  %v14138_v8 = vmov 0 }
 0x32d   : > { %v4905_v32 = vsel %vm11208_vm8, %v11200_v49, 0.0  ;;  %v3738_v52 = vld [vmem:[#allocation2 + $0xd0] sm:$0xff]  ;;  %v11246_v30 = vpack.c.bf16 %v4011_v51, %v4010_v10  ;;  %vm11250_vm9 = vcmp.ge.s32.totalorder %v14133_v50, 2  ;;  %v11260_v43 = vld [vmem:[#allocation3 + $0x88] sm:$0xff]  ;;  %3834 = vst.msk [vmem:[#allocation3 + $0xd2] sm:$0xff] %vm13667_vm3, %v3802_v48  ;;  %v14141_v51 = vld [vmem:[#allocation27_spill] sm:$0xff] }
 0x32e   : > { %v14135_v6 = vsel %vm11250_vm9, 4294967295, %v14134_v6  ;;  %v14136_v14 = vld [vmem:[#allocation26_spill] sm:$0xff]  ;;  %v11263_v22 = vpack.c.bf16 %v11224_v24, %v4905_v32  ;;  %v3770_v57 = vmax.f32 %v3706_v55, %v3738_v52  ;;  %v3803_v10 = vmax.f32 %v3769_v27, %v3675_v5  ;;  %v11282_v55 = vld [vmem:[#allocation3 + $0xa0] sm:$0xff]  ;;  %v14149_v52 = vld [vmem:[#allocation29_spill] sm:$0xff] }
 0x32f   : > { %14131 = vst [vmem:[#allocation67_spill] sm:$0xff] %v11246_v30  ;;  %v14137_v16 = vand.u32 15, %v14136_v14  ;;  %v14142_v50 = vand.u32 15, %v14141_v51  ;;  %v11278_v14 = vld [vmem:[#allocation3 + $0x90] sm:$0xff]  ;;  %v11280_v32 = vld [vmem:[#allocation3 + $0x98] sm:$0xff]  ;;  %v3739_v5 = vld [vmem:[#allocation2 + $0xd8] sm:$0xff]  ;;  %8584 = vmatprep.mubr.msk.bf16.mxu1 %vm13667_vm3, %v11246_v30 }
 0x330   : > { %14140 = vst [vmem:[#allocation75_spill] sm:$0xff] %v11263_v22  ;;  %v4012_v27 = vld [vmem:[#allocation3 + $0xb2] sm:$0xff]  ;;  %v4013_v48 = vld [vmem:[#allocation3 + $0xba] sm:$0xff]  ;;  %v14153_v54 = vmax.f32 %v11113_v46, 0.0  ;;  %v3771_v59 = vmax.f32 %v3707_v7, %v3739_v5  ;;  %v3804_v31 = vmax.f32 %v3770_v57, %v3676_v38  ;;  %3835 = vst.msk [vmem:[#allocation3 + $0xda] sm:$0xff] %vm13667_vm3, %v3803_v10  ;;  %v14157_v5 = vmax.f32 %v11127_v18, 0.0 }
 0x331   : > { %vm11256_vm13 = vcmp.ge.s32.totalorder %v14137_v16, 2  ;;  %vm11268_vm10 = vcmp.ge.s32.totalorder %v14142_v50, 2  ;;  %v14146_v16 = vand.u32 15, %v14145_v2  ;;  %v14150_v50 = vand.u32 15, %v14149_v52  ;;  %v3745_v52 = vld [vmem:[#allocation2 + $0x108] sm:$0xff]  ;;  %v11303_v20 = vld [vmem:[#allocation3 + $0xa8] sm:$0xff] }
 0x332   : > { %v14139_v8 = vsel %vm11256_vm13, 4294967295, %v14138_v8  ;;  %v14144_v47 = vsel %vm11268_vm10, 4294967295, %v14143_v47  ;;  %v14151_v2 = vmov 0  ;;  %v4909_v51 = vsel %vm11256_vm13, %v11244_v60, 0.0  ;;  %v11305_v44 = vld [vmem:[#allocation3 + $0xb0] sm:$0xff]  ;;  %v3677_v30 = vld [vmem:[#allocation2 + $0xd9] sm:$0xff] }
 0x333   : > { %vm11274_vm11 = vcmp.ge.s32.totalorder %v14146_v16, 2  ;;  %vm11288_vm1 = vcmp.ge.s32.totalorder %v14150_v50, 2  ;;  %v4907_v16 = vsel %vm11250_vm9, %v11226_v34, 0.0  ;;  %v3708_v37 = vmax.f32 %v14153_v54, %v3676_v38  ;;  %v3740_v41 = vld [vmem:[#allocation2 + $0xe0] sm:$0xff]  ;;  %3836 = vst.msk [vmem:[#allocation3 + $0xe2] sm:$0xff] %vm13667_vm3, %v3804_v31  ;;  %v3779_v54 = vld [vmem:[#allocation2 + $0x109] sm:$0xff] }
 0x334   : > { %v14148_v9 = vsel %vm11274_vm11, 4294967295, %v14147_v9  ;;  %v14152_v2 = vsel %vm11288_vm1, 4294967295, %v14151_v2  ;;  %v11301_v50 = vpack.c.bf16 %v4013_v48, %v4012_v27  ;;  %v3744_v58 = vld [vmem:[#allocation2 + $0x100] sm:$0xff]  ;;  %v11308_v17 = vpack.c.bf16 %v11242_v35, %v4907_v16  ;;  %v3680_v10 = vld [vmem:[#allocation2 + $0xf1] sm:$0xff]  ;;  %v3679_v56 = vld [vmem:[#allocation2 + $0xe9] sm:$0xff] }
 0x335   : > { %v11311_v46 = vpack.c.bf16 %v11260_v43, %v4909_v51  ;;  %v4911_v57 = vsel %vm11268_vm10, %v11278_v14, 0.0  ;;  %v4913_v38 = vsel %vm11274_vm11, %v11282_v55, 0.0  ;;  %v3681_v7 = vld [vmem:[#allocation2 + $0xf9] sm:$0xff]  ;;  %v3709_v27 = vmax.f32 %v14157_v5, %v3677_v30  ;;  %v3678_v12 = vld [vmem:[#allocation2 + $0xe1] sm:$0xff]  ;;  %v9431_v1 = vld [vmem:[%s13322_s3 + $0x10] sm:$0xff]  }
 0x336   : > { %14154 = vst [vmem:[#allocation82_spill] sm:$0xff] %v11301_v50  ;;  %14155 = vst [vmem:[#allocation80_spill] sm:$0xff] %v11308_v17  ;;  %v3772_v48 = vmax.f32 %v3708_v37, %v3740_v41  ;;  %v3805_v16 = vmax.f32 %v3771_v59, %v3677_v30  ;;  %8585 = vmatmul.mubr.msk.bf16.gmra.mrb[20].mxu1 %vm13667_vm3, %v11301_v50  ;;  %v11325_v51 = vpack.c.bf16 %v11280_v32, %v4911_v57  ;;  %v3778_v57 = vld [vmem:[#allocation2 + $0x101] sm:$0xff]  ;;  %v3742_v17 = vld [vmem:[#allocation2 + $0xf0] sm:$0xff] }
 0x337   : > { %14156 = vst [vmem:[#allocation83_spill] sm:$0xff] %v11311_v46  ;;  %v3713_v39 = vmax.f32 %v14159_v42, %v3681_v7  ;;  %v14160_v31 = vmax.f32 %v11175_v28, 0.0  ;;  %v3741_v46 = vld [vmem:[#allocation2 + $0xe8] sm:$0xff]  ;;  %v11332_v18 = vpack.c.bf16 %v11303_v20, %v4913_v38  ;;  %v4915_v59 = vsel %vm11288_vm1, %v11305_v44, 0.0  ;;  %v4014_v28 = vld [vmem:[#allocation3 + $0xc2] sm:$0xff] }
 0x338   : > { %14158 = vst [vmem:[#allocation88_spill] sm:$0xff] %v11325_v51  ;;  %v14162_v41 = vmax.f32 %v11181_v15, 0.0  ;;  %v14163_v30 = vmax.f32 %v11196_v11, 0.0  ;;  %v3773_v42 = vmax.f32 %v3709_v27, %v3741_v46  ;;  %v3806_v5 = vmax.f32 %v3772_v48, %v3678_v12  ;;  %3837 = vst.msk [vmem:[#allocation3 + $0xea] sm:$0xff] %vm13667_vm3, %v3805_v16  ;;  %v14164_v50 = vld [vmem:[#allocation41_spill] sm:$0xff]  ;;  %v3743_v15 = vld [vmem:[#allocation2 + $0xf8] sm:$0xff] }
 0x339   : > { %v3712_v23 = vmax.f32 %v14160_v31, %v3680_v10  ;;  %14161 = vst [vmem:[#allocation90_spill] sm:$0xff] %v11332_v18  ;;  %v4015_v31 = vld [vmem:[#allocation3 + $0xca] sm:$0xff]  ;;  %v14165_v38 = vand.u32 15, %v14164_v50  ;;  %v14166_v18 = vmov 0  ;;  %v3777_v51 = vmax.f32 %v3713_v39, %v3745_v52  ;;  %v14170_v11 = vld [vmem:[#allocation39_spill] sm:$0xff] }
 0x33a   : > { %v3710_v37 = vmax.f32 %v14162_v41, %v3678_v12  ;;  %v3711_v45 = vmax.f32 %v14163_v30, %v3679_v56  ;;  %v11348_v22 = vpack.c.bf16 %v4015_v31, %v4014_v28  ;;  %v14171_v46 = vand.u32 15, %v14170_v11  ;;  %3838 = vst.msk [vmem:[#allocation3 + $0xf2] sm:$0xff] %vm13667_vm3, %v3806_v5  ;;  %v11357_v30 = vld [vmem:[#allocation3 + $0xb8] sm:$0xff]  ;;  %v14175_v39 = vld [vmem:[#allocation43_spill] sm:$0xff]  ;;  %v14218_v50 = vld [vmem:[#allocation33_spill] sm:$0xff] }
 0x33b   : > { %vm11344_vm0 = vcmp.le.s32.totalorder %v14165_v38, 13  ;;  %v3776_v41 = vmax.f32 %v3712_v23, %v3744_v58  ;;  %v14172_v12 = vmov 0  ;;  %v3807_v16 = vmax.f32 %v3773_v42, %v3679_v56  ;;  %v11359_v38 = vld [vmem:[#allocation3 + $0xc0] sm:$0xff]  ;;  %v11369_v56 = vld [vmem:[#allocation3 + $0xc8] sm:$0xff]  ;;  %v14185_v31 = vld [vmem:[#allocation50_spill] sm:$0xff] }
 0x33c   : > { %v14167_v18 = vsel %vm11344_vm0, 4294967295, %v14166_v18  ;;  %14169 = vst [vmem:[#allocation19_spill] sm:$0xff] %v11348_v22  ;;  %vm11352_vm14 = vcmp.le.s32.totalorder %v14171_v46, 13  ;;  %v3774_v27 = vmax.f32 %v3710_v37, %v3742_v17  ;;  %v3775_v48 = vmax.f32 %v3711_v45, %v3743_v15  ;;  %8588 = vmatprep.mubr.msk.bf16.mxu1 %vm13667_vm3, %v11348_v22  ;;  %v4016_v17 = vld [vmem:[#allocation3 + $0xd2] sm:$0xff]  ;;  %v4017_v37 = vld [vmem:[#allocation3 + $0xda] sm:$0xff]  ;;  %v11442_v11 = vld [vmem:[#allocation3 + $0x24] sm:$0xff] }
 0x33d   : > { %14168 = vst [vmem:[#allocation93_spill] sm:$0xff] %v14167_v18  ;;  %v14173_v12 = vsel %vm11352_vm14, 4294967295, %v14172_v12  ;;  %v14176_v52 = vand.u32 15, %v14175_v39  ;;  %v14177_v23 = vmov 0  ;;  %v3811_v58 = vmax.f32 %v3777_v51, %v3779_v54  ;;  %v14180_v45 = vld [vmem:[#allocation47_spill] sm:$0xff]  ;;  %3839 = vst.msk [vmem:[#allocation3 + $0xfa] sm:$0xff] %vm13667_vm3, %v3807_v16 }
 0x33e   : > { %14174 = vst [vmem:[#allocation23_spill] sm:$0xff] %v14173_v12  ;;  %v3810_v28 = vmax.f32 %v3776_v41, %v3778_v57  ;;  %v14181_v42 = vand.u32 15, %v14180_v45  ;;  %v14182_v5 = vmov 0  ;;  %v14186_v15 = vand.u32 15, %v14185_v31  ;;  %v14191_v41 = vld [vmem:[#allocation30_spill] sm:$0xff]  ;;  %v11394_v39 = vld [vmem:[#allocation3 + $0x2c] sm:$0xff] }
 0x33f   : > { %vm11363_vm4 = vcmp.le.s32.totalorder %v14176_v52, 13  ;;  %v14187_v46 = vmov 0  ;;  %v3808_v54 = vmax.f32 %v3774_v27, %v3680_v10  ;;  %v3809_v51 = vmax.f32 %v3775_v48, %v3681_v7  ;;  %14196 = vst [vmem:[#allocation96_spill] sm:$0xff] %v11394_v39  ;;  %3843 = vst.msk [vmem:[#allocation3 + $0x11a] sm:$0xff] %vm13667_vm3, %v3811_v58  ;;  %v3844_v10 = vld [vmem:[#allocation3] sm:$0xff]  ;;  %v11398_v7 = vld [vmem:[#allocation3 + $0xd8] sm:$0xff] }
 0x340   : > { %v14178_v23 = vsel %vm11363_vm4, 4294967295, %v14177_v23  ;;  %vm11373_vm5 = vcmp.le.s32.totalorder %v14181_v42, 13  ;;  %vm11379_vm2 = vcmp.le.s32.totalorder %v14186_v15, 13  ;;  %v11384_v57 = vpack.c.bf16 %v4017_v37, %v4016_v17  ;;  %v11392_v42 = vld [vmem:[#allocation3 + $0xd0] sm:$0xff]  ;;  %3842 = vst.msk [vmem:[#allocation3 + $0x112] sm:$0xff] %vm13667_vm3, %v3810_v28  ;;  %v11400_v27 = vld [vmem:[#allocation3 + $0xe0] sm:$0xff] }
 0x341   : > { %14179 = vst [vmem:[#allocation34_spill] sm:$0xff] %v14178_v23  ;;  %v14183_v5 = vsel %vm11373_vm5, 4294967295, %v14182_v5  ;;  %v14188_v46 = vsel %vm11379_vm2, 4294967295, %v14187_v46  ;;  %v14192_v52 = vand.u32 15, %v14191_v41  ;;  %v14193_v45 = vmov 0  ;;  %v14197_v48 = vld [vmem:[#allocation54_spill] sm:$0xff] }
 0x342   : > { %14184 = vst [vmem:[#allocation36_spill] sm:$0xff] %v14183_v5  ;;  %14189 = vst [vmem:[#allocation95_spill] sm:$0xff] %v14188_v46  ;;  %v14198_v16 = vand.u32 15, %v14197_v48  ;;  %v14199_v17 = vmov 0  ;;  %v14202_v37 = vld [vmem:[#allocation57_spill] sm:$0xff]  ;;  %v11415_v58 = vpack.c.bf16 %v11357_v30, %v4915_v59  ;;  %8589 = vmatmul.mubr.msk.bf16.gmra.mrb[24].mxu1 %vm13667_vm3, %v11384_v57  ;;  %v14208_v41 = vld [vmem:[#allocation31_spill] sm:$0xff] }
 0x343   : > { %14190 = vst [vmem:[#allocation38_spill] sm:$0xff] %v11384_v57  ;;  %vm11388_vm1 = vcmp.ge.s32.totalorder %v14192_v52, 2  ;;  %v14203_v15 = vand.u32 15, %v14202_v37  ;;  %v14204_v52 = vmov 0  ;;  %3840 = vst.msk [vmem:[#allocation3 + $0x102] sm:$0xff] %vm13667_vm3, %v3808_v54  ;;  %v14210_v37 = vmov 0 }
 0x344   : > { %v14194_v45 = vsel %vm11388_vm1, 4294967295, %v14193_v45  ;;  %vm11404_vm11 = vcmp.le.s32.totalorder %v14198_v16, 13  ;;  %14207 = vst [vmem:[#allocation49_spill] sm:$0xff] %v11415_v58  ;;  %v4917_v28 = vsel %vm11388_vm1, %v11359_v38, 0.0  ;;  %3841 = vst.msk [vmem:[#allocation3 + $0x10a] sm:$0xff] %vm13667_vm3, %v3809_v51  ;;  %v3845_v16 = vld [vmem:[#allocation3 + $0x8] sm:$0xff] }
 0x345   : > { %14195 = vst [vmem:[#allocation44_spill] sm:$0xff] %v14194_v45  ;;  %v14200_v17 = vsel %vm11404_vm11, 4294967295, %v14199_v17  ;;  %vm11410_vm10 = vcmp.le.s32.totalorder %v14203_v15, 13  ;;  %v14209_v15 = vand.u32 15, %v14208_v41  ;;  %v14213_v59 = vld [vmem:[#allocation32_spill] sm:$0xff]  ;;  %v14215_v31 = vmov 0 }
 0x346   : > { %14201 = vst [vmem:[#allocation40_spill] sm:$0xff] %v14200_v17  ;;  %v14205_v52 = vsel %vm11410_vm10, 4294967295, %v14204_v52  ;;  %v14214_v48 = vand.u32 15, %v14213_v59  ;;  %v14219_v54 = vand.u32 15, %v14218_v50  ;;  %v14220_v51 = vmov 0  ;;  %14223 = vst [vmem:[#allocation45_spill] sm:$0xff] %v11442_v11 }
 0x347   : > { %14206 = vst [vmem:[#allocation5_spill] sm:$0xff] %v14205_v52  ;;  %vm11426_vm13 = vcmp.ge.s32.totalorder %v14209_v15, 2  ;;  %v11444_v57 = vld [vmem:[#allocation3 + $0x3c] sm:$0xff]  ;;  %v11446_v15 = vld [vmem:[#allocation3 + $0x4c] sm:$0xff]  ;;  %v11451_v59 = vpack.c.bf16 %v11369_v56, %v4917_v28  ;;  %v5526_v63 = vsel %vm11352_vm14, %v11394_v39, 0.0  ;;  %v3940_v28 = vsel %vm10979_vm15, %v3844_v10, 0.0 }
 0x348   : > { %v14211_v37 = vsel %vm11426_vm13, 4294967295, %v14210_v37  ;;  %vm11432_vm9 = vcmp.ge.s32.totalorder %v14214_v48, 2  ;;  %vm11438_vm1 = vcmp.ge.s32.totalorder %v14219_v54, 2  ;;  %14224 = vst [vmem:[#allocation56_spill] sm:$0xff] %v11444_v57  ;;  %14225 = vst [vmem:[#allocation48_spill] sm:$0xff] %v11446_v15  ;;  %v11448_v41 = vld [vmem:[#allocation3 + $0x5c] sm:$0xff]  ;;  %v11487_v10 = vpack.c.bf16 %v5526_v63, %v11442_v11 }
 0x349   : > { %14212 = vst [vmem:[#allocation42_spill] sm:$0xff] %v14211_v37  ;;  %v14216_v31 = vsel %vm11432_vm9, 4294967295, %v14215_v31  ;;  %v14221_v51 = vsel %vm11438_vm1, 4294967295, %v14220_v51  ;;  %14226 = vst [vmem:[#allocation58_spill] sm:$0xff] %v11448_v41  ;;  %v4018_v48 = vld [vmem:[#allocation3 + $0xe2] sm:$0xff]  ;;  %v4019_v22 = vld [vmem:[#allocation3 + $0xea] sm:$0xff]  ;;  %v3972_v12 = vpack.c.bf16 %v3845_v16, %v3940_v28 }
 0x34a   : > { %14217 = vst [vmem:[#allocation51_spill] sm:$0xff] %v14216_v31  ;;  %14222 = vst [vmem:[#allocation53_spill] sm:$0xff] %v14221_v51  ;;  %v3846_v58 = vld [vmem:[#allocation3 + $0x10] sm:$0xff]  ;;  %v11453_v19 = vld [vmem:[#allocation3 + $0xe8] sm:$0xff]  ;;  %v4919_v54 = vsel %vm11426_vm13, %v11392_v42, 0.0  ;;  %v4921_v50 = vsel %vm11432_vm9, %v11400_v27, 0.0  ;;  %v11464_v36 = vpack.c.bf16 %v4019_v22, %v4018_v48 }
 0x34b   : > { %14227 = vst [vmem:[#allocation59_spill] sm:$0xff] %v11451_v59  ;;  %14228 = vst [vmem:[#allocation61_spill] sm:$0xff] %v11453_v19  ;;  %v11468_v59 = vld [vmem:[#allocation3 + $0x34] sm:$0xff]  ;;  %v11475_v37 = vpack.c.bf16 %v11398_v7, %v4919_v54  ;;  %v11478_v31 = vpack.c.bf16 %v11453_v19, %v4921_v50  ;;  %v11484_v22 = vld [vmem:[#allocation3 + $0x64] sm:$0xff]  ;;  %v5528_v48 = vsel %vm11344_vm0, %v11444_v57, 0.0  ;;  %v5530_v54 = vsel %vm11363_vm4, %v11446_v15, 0.0 }
 0x34c   : > { %14229 = vst [vmem:[#allocation52_spill] sm:$0xff] %v11464_v36  ;;  %14230 = vst [vmem:[#allocation64_spill] sm:$0xff] %v11468_v59  ;;  %v11480_v45 = vld [vmem:[#allocation3 + $0xf0] sm:$0xff]  ;;  %v5532_v50 = vsel %vm11373_vm5, %v11448_v41, 0.0  ;;  %8592 = vmatprep.mubr.msk.bf16.mxu1 %vm13667_vm3, %v11464_v36  ;;  %v14240_v63 = vmov 0  ;;  %v14246_v23 = vmov 0 }
 0x34d   : > { %14232 = vst [vmem:[#allocation66_spill] sm:$0xff] %v11475_v37  ;;  %14233 = vst [vmem:[#allocation69_spill] sm:$0xff] %v11478_v31  ;;  %v11482_v39 = vld [vmem:[#allocation3 + $0x54] sm:$0xff]  ;;  %v11514_v18 = vld [vmem:[#allocation3 + $0x8c] sm:$0xff]  ;;  %v5534_v19 = vsel %vm11379_vm2, %v11472_v21, 0.0 }
 0x34e   : > { %14234 = vst [vmem:[#allocation60_spill] sm:$0xff] %v11480_v45  ;;  %14235 = vst [vmem:[#allocation72_spill] sm:$0xff] %v11482_v39  ;;  %v14238_v31 = vld [vmem:[#allocation62_spill] sm:$0xff]  ;;  %v14244_v57 = vld [vmem:[#allocation65_spill] sm:$0xff]  ;;  %v11545_v28 = vpack.c.bf16 %v5534_v19, %v11484_v22 }
 0x34f   : > { %14236 = vst [vmem:[#allocation63_spill] sm:$0xff] %v11484_v22  ;;  %14237 = vst [vmem:[#allocation74_spill] sm:$0xff] %v11487_v10  ;;  %v14239_v37 = vand.u32 15, %v14238_v31  ;;  %v11506_v10 = vld [vmem:[#allocation3 + $0x7c] sm:$0xff]  ;;  %v14245_v11 = vand.u32 15, %v14244_v57  ;;  %v4923_v31 = vsel %vm11438_vm1, %v11480_v45, 0.0  ;;  %v11530_v57 = vpack.c.bf16 %v5532_v50, %v11482_v39 }
 0x350   : > { %14243 = vst [vmem:[#allocation68_spill] sm:$0xff] %v11506_v10  ;;  %14249 = vst [vmem:[#allocation85_spill] sm:$0xff] %v11514_v18  ;;  %v11516_v5 = vld [vmem:[#allocation3 + $0x9c] sm:$0xff]  ;;  %v4020_v36 = vld [vmem:[#allocation3 + $0xf2] sm:$0xff] }
 0x351   : > { %vm11502_vm14 = vcmp.le.s32.totalorder %v14239_v37, 13  ;;  %vm11510_vm0 = vcmp.le.s32.totalorder %v14245_v11, 13  ;;  %14250 = vst [vmem:[#allocation76_spill] sm:$0xff] %v11516_v5  ;;  %v11522_v37 = vpack.c.bf16 %v5528_v48, %v11468_v59  ;;  %v4021_v41 = vld [vmem:[#allocation3 + $0xfa] sm:$0xff]  ;;  %v11527_v11 = vpack.c.bf16 %v5530_v54, %v11470_v4  ;;  %14253 = vst [vmem:[#allocation84_spill] sm:$0xff] %v11530_v57  ;;  %v11547_v54 = vld [vmem:[#allocation3 + $0x84] sm:$0xff] }
 0x352   : > { %v14241_v63 = vsel %vm11502_vm14, 4294967295, %v14240_v63  ;;  %v14247_v23 = vsel %vm11510_vm0, 4294967295, %v14246_v23  ;;  %v11524_v15 = vld [vmem:[#allocation3 + $0xf8] sm:$0xff]  ;;  %v11535_v51 = vpack.c.bf16 %v4021_v41, %v4020_v36  ;;  %v3942_v48 = vsel %vm11037_vm12, %v3846_v58, 0.0  ;;  %14257 = vst [vmem:[#allocation98_spill] sm:$0xff] %v11545_v28  ;;  %14258 = vst [vmem:[#allocation99_spill] sm:$0xff] %v11547_v54 }
 0x353   : > { %14242 = vst [vmem:[#allocation77_spill] sm:$0xff] %v14241_v63  ;;  %14248 = vst [vmem:[#allocation71_spill] sm:$0xff] %v14247_v23  ;;  %v3847_v45 = vld [vmem:[#allocation3 + $0x18] sm:$0xff]  ;;  %v11542_v16 = vpack.c.bf16 %v11524_v15, %v4923_v31  ;;  %v11549_v50 = vld [vmem:[#allocation3 + $0xac] sm:$0xff]  ;;  %v5536_v36 = vsel %vm11404_vm11, %v11506_v10, 0.0  ;;  %v5538_v41 = vsel %vm11410_vm10, %v11514_v18, 0.0 }
 0x354   : > { %14251 = vst [vmem:[#allocation79_spill] sm:$0xff] %v11522_v37  ;;  %14252 = vst [vmem:[#allocation91_spill] sm:$0xff] %v11527_v11  ;;  %v11539_v37 = vld [vmem:[#allocation3 + $0x74] sm:$0xff]  ;;  %v11551_v57 = vld [vmem:[#allocation3 + $0xbc] sm:$0xff]  ;;  %v5540_v31 = vsel %vm11502_vm14, %v11516_v5, 0.0  ;;  %8593 = vmatmul.mubr.msk.bf16.gmra.mrb[28].mxu1 %vm13667_vm3, %v11535_v51  ;;  %v14263_v28 = vmov 0 }
 0x355   : > { %14254 = vst [vmem:[#allocation87_spill] sm:$0xff] %v11535_v51  ;;  %14255 = vst [vmem:[#allocation94_spill] sm:$0xff] %v11539_v37  ;;  %v14261_v19 = vld [vmem:[#allocation70_spill] sm:$0xff]  ;;  %v14266_v11 = vld [vmem:[#allocation73_spill] sm:$0xff]  ;;  %v14268_v59 = vmov 0  ;;  %v11581_v63 = vpack.c.bf16 %v5536_v36, %v11539_v37  ;;  %v11584_v51 = vpack.c.bf16 %v5538_v41, %v11547_v54  ;;  %8598 = vmatprep.mubr.msk.bf16.mxu1 %vm13667_vm3, %v3972_v12  ;;  %v14278_v5 = vmov 0 }
 0x356   : > { %14256 = vst [vmem:[#allocation97_spill] sm:$0xff] %v11542_v16  ;;  %14259 = vst [vmem:[#allocation100_spill] sm:$0xff] %v11549_v50  ;;  %v14262_v58 = vand.u32 15, %v14261_v19  ;;  %v14267_v16 = vand.u32 15, %v14266_v11  ;;  %v11576_v52 = vld [vmem:[#allocation3 + $0xcc] sm:$0xff]  ;;  %v11578_v17 = vld [vmem:[#allocation3 + $0xdc] sm:$0xff] }
 0x357   : > { %14260 = vst [vmem:[#allocation101_spill] sm:$0xff] %v11551_v57  ;;  %14271 = vst [vmem:[#allocation104_spill] sm:$0xff] %v11576_v52  ;;  %v11587_v19 = vld [vmem:[#allocation3 + $0x94] sm:$0xff]  ;;  %v11607_v12 = vld [vmem:[#allocation3 + $0xec] sm:$0xff] }
 0x358   : > { %vm11566_vm2 = vcmp.le.s32.totalorder %v14262_v58, 13  ;;  %vm11572_vm11 = vcmp.le.s32.totalorder %v14267_v16, 13  ;;  %14272 = vst [vmem:[#allocation105_spill] sm:$0xff] %v11578_v17  ;;  %14273 = vst [vmem:[#allocation106_spill] sm:$0xff] %v11581_v63  ;;  %v3973_v58 = vpack.c.bf16 %v3847_v45, %v3942_v48  ;;  %v14276_v11 = vld [vmem:[#allocation78_spill] sm:$0xff]  ;;  %v14281_v46 = vld [vmem:[#allocation81_spill] sm:$0xff] }
 0x359   : > { %v14264_v28 = vsel %vm11566_vm2, 4294967295, %v14263_v28  ;;  %v14269_v59 = vsel %vm11572_vm11, 4294967295, %v14268_v59  ;;  %14274 = vst [vmem:[#allocation107_spill] sm:$0xff] %v11584_v51  ;;  %14275 = vst [vmem:[#allocation108_spill] sm:$0xff] %v11587_v19  ;;  %v14277_v16 = vand.u32 15, %v14276_v11  ;;  %v14282_v18 = vand.u32 15, %v14281_v46 }
 0x35a   : > { %14265 = vst [vmem:[#allocation102_spill] sm:$0xff] %v14264_v28  ;;  %14270 = vst [vmem:[#allocation103_spill] sm:$0xff] %v14269_v59  ;;  %v14285_v36 = vld [vmem:[#allocation86_spill] sm:$0xff]  ;;  %v14287_v51 = vmov 0  ;;  %v3944_v48 = vsel %vm11084_vm6, %v10972_v26, 0.0  ;;  %v11619_v46 = vpack.c.bf16 %v5540_v31, %v11587_v19  ;;  %v11627_v11 = vld [vmem:[#allocation3 + $0xc4] sm:$0xff] }
 0x35b   : > { %vm11591_vm14 = vcmp.le.s32.totalorder %v14277_v16, 13  ;;  %vm11597_vm10 = vcmp.le.s32.totalorder %v14282_v18, 13  ;;  %v14286_v41 = vand.u32 15, %v14285_v36  ;;  %14289 = vst [vmem:[#allocation110_spill] sm:$0xff] %v11607_v12  ;;  %v11609_v45 = vld [vmem:[#allocation3 + $0xfc] sm:$0xff]  ;;  %v11614_v16 = vld [vmem:[#allocation3 + $0xa4] sm:$0xff] }
 0x35c   : > { %v14279_v5 = vsel %vm11591_vm14, 4294967295, %v14278_v5  ;;  %v11616_v18 = vld [vmem:[#allocation3 + $0xb4] sm:$0xff]  ;;  %14291 = vst [vmem:[#allocation112_spill] sm:$0xff] %v11619_v46  ;;  %v5544_v36 = vsel %vm11566_vm2, %v11551_v57, 0.0  ;;  %v5546_v31 = vsel %vm11572_vm11, %v11576_v52, 0.0  ;;  %v5548_v46 = vsel %vm11591_vm14, %v11578_v17, 0.0  ;;  %8599 = vmatmul.mubr.msk.bf16.vlgmr.msra.gmra.mrb[0].mxu1 %vm13667_vm3, %v3973_v58 }
 0x35d   : > { %14280 = vst [vmem:[#allocation109_spill] sm:$0xff] %v14279_v5  ;;  %vm11603_vm5 = vcmp.le.s32.totalorder %v14286_v41, 13  ;;  %14290 = vst [vmem:[#allocation111_spill] sm:$0xff] %v11616_v18  ;;  %v5542_v41 = vsel %vm11510_vm0, %v11549_v50, 0.0  ;;  %v11629_v63 = vld [vmem:[#allocation3 + $0xd4] sm:$0xff]  ;;  %v11635_v54 = vpack.c.bf16 %v5544_v36, %v11616_v18  ;;  %v11643_v28 = vld [vmem:[#allocation3 + $0xe4] sm:$0xff]  ;;  %v11648_v19 = vpack.c.bf16 %v5546_v31, %v11627_v11  ;;  %8631 = vmatpush3.bf16.msra.mxu1 %v9431_v1 }
 0x35e   : > { %v14288_v51 = vsel %vm11603_vm5, 4294967295, %v14287_v51  ;;  %v11632_v26 = vpack.c.bf16 %v5542_v41, %v11614_v16  ;;  %v11645_v23 = vld [vmem:[#allocation3 + $0xf4] sm:$0xff]  ;;  %v11651_v41 = vpack.c.bf16 %v5548_v46, %v11629_v63  ;;  %v5550_v36 = vsel %vm11597_vm10, %v11607_v12, 0.0  ;;  %v11712_v58 = vld [vmem:[#allocation3 + $0x100] sm:$0xff] }
 0x35f   : > { %14293 = vst [vmem:[#allocation114_spill] sm:$0xff] %v11635_v54  ;;  %14294 = vst [vmem:[#allocation115_spill] sm:$0xff] %v11648_v19  ;;  %v5552_v54 = vsel %vm11603_vm5, %v11609_v45, 0.0  ;;  %v11661_v5 = vpack.c.bf16 %v5550_v36, %v11643_v28  ;;  %v3946_v46 = vsel %vm11146_vm7, %v11030_v53, 0.0  ;;  %v3948_v31 = vsel %vm11208_vm8, %v11076_v3, 0.0 }
 0x360   : > { %14292 = vst [vmem:[#allocation113_spill] sm:$0xff] %v11632_v26  ;;  %14295 = vst [vmem:[#allocation116_spill] sm:$0xff] %v11651_v41  ;;  %v3974_v26 = vpack.c.bf16 %v10994_v29, %v3944_v48  ;;  %v11664_v59 = vpack.c.bf16 %v5552_v54, %v11645_v23  ;;  %v11675_v41 = vld [vmem:[%s13322_s3 + $0x18] sm:$0xff]   ;;  %v5855_v29 = vsel %vm10979_vm15, %v11076_v3, 0.0  ;;  %v5857_v54 = vsel %vm11037_vm12, %v11138_v61, 0.0 }
 0x361   : > { %14296 = vst [vmem:[#allocation117_spill] sm:$0xff] %v11661_v5  ;;  %14298 = vst [vmem:[#allocation119_spill] sm:$0xff] %v11675_v41  ;;  %v11684_v48 = vpack.c.bf16 %v11121_v25, %v5855_v29  ;;  %v11687_v53 = vpack.c.bf16 %v11183_v62, %v5857_v54  ;;  %v5859_v36 = vsel %vm11084_vm6, %v11200_v49, 0.0  ;;  %v5863_v3 = vsel %vm11208_vm8, %v11244_v60, 0.0  ;;  %v11714_v29 = vld [vmem:[#allocation3 + $0x110] sm:$0xff]  ;;  %8664 = vmatprep.subr.bf16.mxu1 %v11675_v41 }
 0x362   : > { %14297 = vst [vmem:[#allocation118_spill] sm:$0xff] %v11664_v59  ;;  %v5861_v59 = vsel %vm11146_vm7, %v11226_v34, 0.0  ;;  %v11697_v13 = vpack.c.bf16 %v11224_v24, %v5859_v36  ;;  %vm14303_vm15 = vnez %v14135_v6  ;;  %8602 = vmatprep.mubr.msk.bf16.mxu1 %vm13667_vm3, %v3974_v26  ;;  %14304 = vst [vmem:[#allocation124_spill] sm:$0xff] %v11712_v58  ;;  %vm14308_vm12 = vnez %v14139_v8  ;;  %v11729_v26 = vld [vmem:[#allocation3 + $0x108] sm:$0xff]  ;;  %v14333_v6 = vld [vmem:[#allocation23_spill] sm:$0xff] }
 0x363   : > { %14299 = vst [vmem:[#allocation120_spill] sm:$0xff] %v11684_v48  ;;  %14300 = vst [vmem:[#allocation121_spill] sm:$0xff] %v11687_v53  ;;  %v11700_v0 = vpack.c.bf16 %v11242_v35, %v5861_v59  ;;  %v5865_v40 = vsel %vm14303_vm15, %v11278_v14, 0.0  ;;  %v11717_v59 = vpack.c.bf16 %v11260_v43, %v5863_v3  ;;  %v5867_v54 = vsel %vm14308_vm12, %v11282_v55, 0.0  ;;  %v11755_v53 = vld [vmem:[#allocation3 + $0x118] sm:$0xff]  ;;  %v14322_v48 = vld [vmem:[#allocation61_spill] sm:$0xff] }
 0x364   : > { %14301 = vst [vmem:[#allocation122_spill] sm:$0xff] %v11697_v13  ;;  %14305 = vst [vmem:[#allocation125_spill] sm:$0xff] %v11714_v29  ;;  %v11720_v33 = vpack.c.bf16 %v11280_v32, %v5865_v40  ;;  %vm14309_vm6 = vnez %v14144_v47  ;;  %v11732_v1 = vpack.c.bf16 %v11303_v20, %v5867_v54  ;;  %vm14313_vm7 = vnez %v14148_v9  ;;  %v14317_v54 = vld [vmem:[#allocation44_spill] sm:$0xff]  ;;  %v14428_v22 = vld [vmem:[#allocation110_spill] sm:$0xff] }
 0x365   : > { %14302 = vst [vmem:[#allocation123_spill] sm:$0xff] %v11700_v0  ;;  %14306 = vst [vmem:[#allocation126_spill] sm:$0xff] %v11717_v59  ;;  %v5869_v36 = vsel %vm14309_vm6, %v11305_v44, 0.0  ;;  %v5871_v40 = vsel %vm14313_vm7, %v11359_v38, 0.0  ;;  %vm14314_vm8 = vnez %v14152_v2  ;;  %vm14318_vm3 = vnez %v14317_v54  ;;  %v6158_v54 = vld [vmem:[#allocation3 + $0x6a] sm:$0xff] }
 0x366   : > { %14307 = vst [vmem:[#allocation127_spill] sm:$0xff] %v11720_v33  ;;  %14310 = vst [vmem:[#allocation128_spill] sm:$0xff] %v11729_v26  ;;  %v11735_v3 = vpack.c.bf16 %v11357_v30, %v5869_v36  ;;  %v5873_v33 = vsel %vm14314_vm8, %v11392_v42, 0.0  ;;  %v11744_v59 = vpack.c.bf16 %v11369_v56, %v5871_v40  ;;  %v14319_v36 = vld [vmem:[#allocation60_spill] sm:$0xff]  ;;  %v14325_v40 = vld [vmem:[#allocation51_spill] sm:$0xff]  ;;  %v3950_v41 = vsel %vm14303_vm15, %v11138_v61, 0.0 }
 0x367   : > { %14311 = vst [vmem:[#allocation129_spill] sm:$0xff] %v11732_v1  ;;  %v11747_v0 = vpack.c.bf16 %v11398_v7, %v5873_v33  ;;  %v5875_v1 = vsel %vm14318_vm3, %v11400_v27, 0.0  ;;  %v5877_v13 = vsel %vm11426_vm13, %v14319_v36, 0.0  ;;  %14321 = vst [vmem:[#allocation44_spill] sm:$0xff] %v11755_v53  ;;  %v5879_v33 = vsel %vm11432_vm9, %v11712_v58, 0.0  ;;  %v14332_v61 = vld [vmem:[#allocation48_spill] sm:$0xff] }
 0x368   : > { %14312 = vst [vmem:[#allocation130_spill] sm:$0xff] %v11735_v3  ;;  %14315 = vst [vmem:[#allocation131_spill] sm:$0xff] %v11744_v59  ;;  %v14320_v3 = vld [vmem:[#allocation42_spill] sm:$0xff]  ;;  %v11758_v5 = vpack.c.bf16 %v14322_v48, %v5875_v1  ;;  %v11761_v19 = vpack.c.bf16 %v11524_v15, %v5877_v13  ;;  %v5881_v59 = vsel %vm11438_vm1, %v11714_v29, 0.0  ;;  %v11773_v36 = vpack.c.bf16 %v11729_v26, %v5879_v33 }
 0x369   : > { %14316 = vst [vmem:[#allocation132_spill] sm:$0xff] %v11747_v0  ;;  %v14326_v0 = vld [vmem:[#allocation53_spill] sm:$0xff]  ;;  %v11776_v1 = vpack.c.bf16 %v11755_v53, %v5881_v59  ;;  %v14329_v13 = vld [vmem:[#allocation10_spill] sm:$0xff]  ;;  %vm14330_vm13 = vcmask 130048   ;;  %v3977_v58 = vpack.c.bf16 %v11183_v62, %v3950_v41  ;;  %v3952_v29 = vsel %vm14308_vm12, %v11200_v49, 0.0  ;;  %v14339_v62 = vld [vmem:[#allocation36_spill] sm:$0xff] }
 0x36a   : > { %14323 = vst [vmem:[#allocation42_spill] sm:$0xff] %v11758_v5  ;;  %14324 = vst [vmem:[#allocation61_spill] sm:$0xff] %v11761_v19  ;;  %v3975_v19 = vpack.c.bf16 %v14329_v13, %v3946_v46  ;;  %v3976_v5 = vpack.c.bf16 %v11121_v25, %v3948_v31  ;;  %vm14334_vm15 = vnez %v14333_v6  ;;  %v14335_v59 = vld [vmem:[#allocation58_spill] sm:$0xff]  ;;  %v14347_v53 = vld [vmem:[#allocation95_spill] sm:$0xff]  ;;  %v3960_v47 = vsel %vm14318_vm3, %v11282_v55, 0.0 }
 0x36b   : > { %14327 = vst [vmem:[#allocation51_spill] sm:$0xff] %v11773_v36  ;;  %14328 = vst [vmem:[#allocation53_spill] sm:$0xff] %v11776_v1  ;;  %v6484_v33 = vsel %vm14334_vm15, %v14332_v61, 0.0  ;;  %v14336_v1 = vld [vmem:[#allocation93_spill] sm:$0xff]  ;;  %v14338_v25 = vld [vmem:[#allocation34_spill] sm:$0xff] }
 0x36c   : > { %8603 = vmatmul.mubr.msk.bf16.gmra.mrb[4].mxu1 %vm14330_vm13, %v3975_v19  ;;  %vm14331_vm1 = vmmov %vm14330_vm13  ;;  %vm14337_vm9 = vnez %v14336_v1  ;;  %v6488_v19 = vsel %vm11363_vm4, %v11472_v21, 0.0  ;;  %vm14340_vm13 = vnez %v14339_v62  ;;  %v11799_v49 = vpack.c.bf16 %v6484_v33, %v11470_v4  ;;  %v14346_v36 = vld [vmem:[#allocation85_spill] sm:$0xff]  ;;  %v14349_v21 = vld [vmem:[#allocation76_spill] sm:$0xff] }
 0x36d   : > { %8606 = vmatprep.mubr.msk.bf16.mxu1 %vm14331_vm1, %v3976_v5  ;;  %v6486_v46 = vsel %vm14337_vm9, %v14335_v59, 0.0  ;;  %v6490_v41 = vsel %vm14340_vm13, %v11506_v10, 0.0  ;;  %v14343_v5 = vld [vmem:[#allocation63_spill] sm:$0xff]  ;;  %vm14348_vm1 = vnez %v14347_v53  ;;  %v14350_v59 = vld [vmem:[#allocation40_spill] sm:$0xff]  ;;  %v14352_v33 = vld [vmem:[#allocation5_spill] sm:$0xff] }
 0x36e   : > { %14341 = vst [vmem:[#allocation10_spill] sm:$0xff] %v11799_v49  ;;  %v11802_v8 = vpack.c.bf16 %v6486_v46, %v11482_v39  ;;  %v11805_v31 = vpack.c.bf16 %v6488_v19, %v14343_v5  ;;  %v11808_v13 = vpack.c.bf16 %v6490_v41, %v11539_v37  ;;  %v6492_v26 = vsel %vm14348_vm1, %v14346_v36, 0.0  ;;  %v14354_v46 = vld [vmem:[#allocation77_spill] sm:$0xff]  ;;  %v11824_v41 = vld [vmem:[#allocation3 + $0x11c] sm:$0xff]  ;;  %v14358_v37 = vld [vmem:[#allocation108_spill] sm:$0xff] }
 0x36f   : > { %vm14351_vm12 = vnez %v14350_v59  ;;  %vm14353_vm13 = vnez %v14352_v33  ;;  %vm14355_vm4 = vnez %v14354_v46  ;;  %v11840_v46 = vld [vmem:[#allocation3 + $0x114] sm:$0xff]  ;;  %v6500_v39 = vsel %vm11510_vm0, %v11576_v52, 0.0  ;;  %v14395_v1 = vld [vmem:[#allocation56_spill] sm:$0xff]  ;;  %v14402_v53 = vld [vmem:[#allocation63_spill] sm:$0xff] }
 0x370   : > { %14342 = vst [vmem:[#allocation48_spill] sm:$0xff] %v11802_v8  ;;  %14344 = vst [vmem:[#allocation23_spill] sm:$0xff] %v11805_v31  ;;  %v6494_v10 = vsel %vm14351_vm12, %v14349_v21, 0.0  ;;  %v6496_v49 = vsel %vm14353_vm13, %v11549_v50, 0.0  ;;  %v6498_v19 = vsel %vm14355_vm4, %v11551_v57, 0.0  ;;  %v11822_v31 = vld [vmem:[#allocation3 + $0x10c] sm:$0xff] }
 0x371   : > { %14345 = vst [vmem:[#allocation93_spill] sm:$0xff] %v11808_v13  ;;  %v14356_v13 = vld [vmem:[#allocation99_spill] sm:$0xff]  ;;  %v11830_v36 = vpack.c.bf16 %v6494_v10, %v14358_v37  ;;  %v11833_v21 = vpack.c.bf16 %v6496_v49, %v11614_v16  ;;  %v11836_v5 = vpack.c.bf16 %v6498_v19, %v11616_v18  ;;  %v6504_v49 = vsel %vm11572_vm11, %v11607_v12, 0.0 }
 0x372   : > { %v11827_v8 = vpack.c.bf16 %v6492_v26, %v14356_v13  ;;  %v11838_v50 = vld [vmem:[#allocation3 + $0x104] sm:$0xff]  ;;  %v6506_v19 = vsel %vm11591_vm14, %v11609_v45, 0.0  ;;  %v11861_v18 = vpack.c.bf16 %v6504_v49, %v11643_v28  ;;  %v6508_v12 = vsel %vm11597_vm10, %v11822_v31, 0.0 }
 0x373   : > { %14359 = vst [vmem:[#allocation36_spill] sm:$0xff] %v11830_v36  ;;  %14360 = vst [vmem:[#allocation95_spill] sm:$0xff] %v11833_v21  ;;  %v14364_v10 = vld [vmem:[#allocation103_spill] sm:$0xff]  ;;  %v14365_v21 = vld [vmem:[#allocation109_spill] sm:$0xff]  ;;  %v11864_v52 = vpack.c.bf16 %v6506_v19, %v11645_v23  ;;  %vm14366_vm14 = vcmask 130048  }
 0x374   : > { %14357 = vst [vmem:[#allocation34_spill] sm:$0xff] %v11827_v8  ;;  %14361 = vst [vmem:[#allocation40_spill] sm:$0xff] %v11836_v5  ;;  %v6502_v8 = vsel %vm11566_vm2, %v11578_v17, 0.0  ;;  %v11855_v5 = vpack.c.bf16 %v6500_v39, %v11627_v11  ;;  %v3978_v17 = vpack.c.bf16 %v11224_v24, %v3952_v29  ;;  %v6510_v39 = vsel %vm11603_vm5, %v11824_v41, 0.0  ;;  %8607 = vmatmul.mubr.msk.bf16.gmra.mrb[8].mxu1 %vm14366_vm14, %v3977_v58 }
 0x375   : > { %v11858_v36 = vpack.c.bf16 %v6502_v8, %v11629_v63  ;;  %v11875_v8 = vpack.c.bf16 %v6508_v12, %v11838_v50  ;;  %v11878_v49 = vpack.c.bf16 %v6510_v39, %v11840_v46  ;;  %vm14367_vm11 = vmmov %vm14366_vm14  ;;  %v3954_v24 = vsel %vm14309_vm6, %v11226_v34, 0.0  ;;  %v14382_v12 = vld [vmem:[#allocation37_spill] sm:$0xff]  ;;  %v4474_v39 = vld [vmem:[#allocation3 + $0x1c] sm:$0xff] }
 0x376   : > { %8610 = vmatprep.mubr.msk.bf16.mxu1 %vm14367_vm11, %v3978_v17  ;;  %v3956_v29 = vsel %vm14313_vm7, %v11244_v60, 0.0  ;;  %v3979_v19 = vpack.c.bf16 %v11242_v35, %v3954_v24  ;;  %vm14368_vm14 = vmmov %vm14367_vm11  ;;  %v3958_v17 = vsel %vm14314_vm8, %v11278_v14, 0.0  ;;  %v3982_v60 = vpack.c.bf16 %v11303_v20, %v3960_v47  ;;  %v14376_v20 = vld [vmem:[#allocation35_spill] sm:$0xff]  ;;  %v4473_v24 = vld [vmem:[#allocation3 + $0x14] sm:$0xff] }
 0x377   : > { %v3980_v58 = vpack.c.bf16 %v11260_v43, %v3956_v29  ;;  %vm14369_vm5 = vmmov %vm14367_vm11  ;;  %v3981_v34 = vpack.c.bf16 %v11280_v32, %v3958_v17  ;;  %vm14372_vm7 = vnez %v14320_v3  ;;  %v14377_v43 = vand.u32 15, %v14376_v20  ;;  %v9416_v17 = vld [vmem:[%s13322_s3 + $0x20] sm:$0xff]   ;;  %v14391_v47 = vld [vmem:[#allocation45_spill] sm:$0xff] }
 0x378   : > { %vm14370_vm11 = vmmov %vm14369_vm5  ;;  %v3962_v9 = vsel %vm14372_vm7, %v11305_v44, 0.0  ;;  %v14383_v3 = vand.u32 15, %v14382_v12  ;;  %v4570_v29 = vsel %vm14337_vm9, %v4474_v39, 0.0  ;;  %vm14396_vm9 = vnez %v14339_v62  ;;  %v6156_v32 = vld [vmem:[#allocation3 + $0x5a] sm:$0xff] }
 0x379   : > { %vm14371_vm6 = vmmov %vm14369_vm5  ;;  %v3983_v35 = vpack.c.bf16 %v11357_v30, %v3962_v9  ;;  %v14397_v9 = vld [vmem:[#allocation64_spill] sm:$0xff] }
 0x37a   : > { %vm14374_vm3 = vmmov %vm14371_vm6  ;;  %vm11928_vm7 = vcmp.ge.s32.totalorder %v14383_v3, 2  ;;  %v14407_v3 = vld [vmem:[#allocation85_spill] sm:$0xff] }
 0x37b   : > { %vm14375_vm8 = vmmov %vm14374_vm3  ;;  %v4584_v59 = vsel %vm11510_vm0, %v14407_v3, 0.0  ;;  %v14463_v3 = vld [vmem:[#allocation97_spill] sm:$0xff] }
 0x37c   : > { %8611 = vmatmul.mubr.msk.bf16.gmra.mrb[12].mxu1 %vm14368_vm14, %v3979_v19  ;;  %vm11913_vm14 = vcmp.ge.s32.totalorder %v14377_v43, 2  ;;  %v14389_v19 = vld [vmem:[#allocation96_spill] sm:$0xff]  ;;  %v4607_v33 = vpack.c.bf16 %v4584_v59, %v14356_v13  ;;  %v14416_v13 = vld [vmem:[#allocation101_spill] sm:$0xff] }
 0x37d   : > { %8614 = vmatprep.mubr.msk.bf16.mxu1 %vm14369_vm5, %v3980_v58  ;;  %vm14373_vm5 = vnez %v14325_v40  ;;  %v3968_v55 = vsel %vm11913_vm14, %v11400_v27, 0.0  ;;  %v14387_v27 = vld [vmem:[#allocation60_spill] sm:$0xff]  ;;  %v4600_v58 = vpack.c.bf16 %v4570_v29, %v4473_v24  ;;  %v14466_v59 = vld [vmem:[#allocation125_spill] sm:$0xff] }
 0x37e   : > { %v3964_v2 = vsel %vm14373_vm5, %v11359_v38, 0.0  ;;  %v3986_v38 = vpack.c.bf16 %v14322_v48, %v3968_v55  ;;  %vm14386_vm5 = vmmov %vm14374_vm3  ;;  %v14401_v55 = vld [vmem:[#allocation72_spill] sm:$0xff] }
 0x37f   : > { %v3984_v14 = vpack.c.bf16 %v11369_v56, %v3964_v2  ;;  %v4472_v56 = vld [vmem:[#allocation3 + $0xc] sm:$0xff] }
 0x380   : > { %v14418_v29 = vld [vmem:[#allocation104_spill] sm:$0xff] }
 0x381   : > { %v4592_v26 = vsel %vm11597_vm10, %v14418_v29, 0.0  ;;  %v14482_v29 = vld [vmem:[#allocation21_spill] sm:$0xff] }
 0x384   : > { %8615 = vmatmul.mubr.msk.bf16.gmra.mrb[16].mxu1 %vm14370_vm11, %v3981_v34  ;;  %vm14380_vm11 = vnez %v14326_v0  ;;  %v4568_v0 = vsel %vm14334_vm15, %v4472_v56, 0.0  ;;  %vm14392_vm15 = vmmov %vm14374_vm3  ;;  %v14393_v34 = vld [vmem:[#allocation119_spill] sm:$0xff] }
 0x385   : > { %8618 = vmatprep.mubr.msk.bf16.mxu1 %vm14371_vm6, %v3982_v60  ;;  %v3966_v44 = vsel %vm14380_vm11, %v11392_v42, 0.0  ;;  %vm14381_vm6 = vmmov %vm14374_vm3  ;;  %v4471_v42 = vld [vmem:[#allocation3 + $0x4] sm:$0xff]  ;;  %vm14390_vm11 = vnez %v14338_v25  ;;  %v4574_v60 = vsel %vm14396_vm9, %v14395_v1, 0.0  ;;  %v4576_v25 = vsel %vm14348_vm1, %v14332_v61, 0.0 }
 0x386   : > { %v3985_v30 = vpack.c.bf16 %v11398_v7, %v3966_v44  ;;  %v3970_v7 = vsel %vm11928_vm7, %v14387_v27, 0.0  ;;  %v4599_v48 = vpack.c.bf16 %v4568_v0, %v4471_v42  ;;  %v4572_v6 = vsel %vm14390_vm11, %v14389_v19, 0.0  ;;  %v14400_v44 = vld [vmem:[#allocation55_spill] sm:$0xff]  ;;  %vm14403_vm1 = vmmov %vm14374_vm3  ;;  %v14408_v42 = vld [vmem:[#allocation94_spill] sm:$0xff] }
 0x387   : > { %v3987_v40 = vpack.c.bf16 %v11524_v15, %v3970_v7  ;;  %v4601_v15 = vpack.c.bf16 %v4572_v6, %v14391_v47  ;;  %v4602_v2 = vpack.c.bf16 %v4574_v60, %v14397_v9  ;;  %v4580_v62 = vsel %vm14353_vm13, %v14400_v44, 0.0  ;;  %vm14409_vm13 = vmmov %vm14403_vm1  ;;  %v14411_v27 = vld [vmem:[#allocation76_spill] sm:$0xff]  ;;  %v14419_v19 = vld [vmem:[#allocation111_spill] sm:$0xff] }
 0x388   : > { %v4605_v61 = vpack.c.bf16 %v4580_v62, %v14402_v53  ;;  %v4586_v7 = vsel %vm11566_vm2, %v14411_v27, 0.0  ;;  %vm14413_vm11 = vnez %v14364_v10  ;;  %vm14414_vm0 = vmmov %vm14403_vm1  ;;  %v4611_v10 = vpack.c.bf16 %v4592_v26, %v11627_v11  ;;  %v14430_v1 = vld [vmem:[#allocation92_spill] sm:$0xff]  ;;  %v14453_v62 = vld [vmem:[#allocation49_spill] sm:$0xff] }
 0x389   : > { %v4608_v39 = vpack.c.bf16 %v4586_v7, %v14358_v37  ;;  %vm14420_vm2 = vmmov %vm14414_vm0  ;;  %v14422_v37 = vld [vmem:[#allocation89_spill] sm:$0xff]  ;;  %v14431_v60 = vand.u32 15, %v14430_v1  ;;  %v14449_v44 = vld [vmem:[#allocation88_spill] sm:$0xff] }
 0x38a   : > { %vm14429_vm10 = vmmov %vm14414_vm0  ;;  %v14459_v53 = vld [vmem:[#allocation69_spill] sm:$0xff]  ;;  %v14468_v27 = vld [vmem:[#allocation6_spill] sm:$0xff] }
 0x38b   : > { %v9418_v7 = vld [vmem:[%s13322_s3 + $0x30] sm:$0xff]   ;;  %v14484_v26 = vld [vmem:[#allocation67_spill] sm:$0xff] }
 0x38c   : > { %8619 = vmatmul.mubr.msk.bf16.gmra.mrb[20].mxu1 %vm14374_vm3, %v3983_v35  ;;  %v4603_v35 = vpack.c.bf16 %v4576_v25, %v11470_v4  ;;  %v14405_v4 = vld [vmem:[#allocation68_spill] sm:$0xff]  ;;  %v9425_v25 = vld [vmem:[%s13326_s7 + $0x10] sm:$0xff]  }
 0x38d   : > { %8622 = vmatprep.mubr.msk.bf16.mxu1 %vm14375_vm8, %v3984_v14  ;;  %vm14388_vm8 = vmmov %vm14374_vm3  ;;  %v14399_v14 = vld [vmem:[#allocation58_spill] sm:$0xff]  ;;  %v4582_v56 = vsel %vm14355_vm4, %v14405_v4, 0.0 }
 0x38e   : > { %v4578_v43 = vsel %vm14351_vm12, %v14399_v14, 0.0  ;;  %v4606_v0 = vpack.c.bf16 %v4582_v56, %v14408_v42  ;;  %vm14410_vm12 = vmmov %vm14403_vm1  ;;  %v14445_v14 = vld [vmem:[#allocation80_spill] sm:$0xff]  ;;  %v4927_v42 = vsel %vm11928_vm7, %v14466_v59, 0.0  ;;  %v14531_v59 = vld [vmem:[#allocation122_spill] sm:$0xff] }
 0x38f   : > { %vm14415_vm4 = vmmov %vm14414_vm0 }
 0x394   : > { %8623 = vmatmul.mubr.msk.bf16.gmra.mrb[24].mxu1 %vm14381_vm6, %v3985_v30  ;;  %vm14394_vm6 = vmmov %vm14374_vm3  ;;  %v4604_v30 = vpack.c.bf16 %v4578_v43, %v14401_v55  ;;  %v14447_v43 = vld [vmem:[#allocation83_spill] sm:$0xff] }
 0x395   : > { %8626 = vmatprep.mubr.msk.bf16.mxu1 %vm14386_vm5, %v3986_v38  ;;  %vm14398_vm5 = vmmov %vm14374_vm3  ;;  %v14455_v55 = vld [vmem:[#allocation59_spill] sm:$0xff]  ;;  %v14462_v38 = vld [vmem:[#allocation128_spill] sm:$0xff] }
 0x39c   : > { %8627 = vmatmul.mubr.msk.bf16.gmra.mrb[28].mxu1 %vm14374_vm3, %v3987_v40 }
 0x39d   : > { %8632 = vmatprep.mubr.msk.bf16.mxu1 %vm14388_vm8, %v4599_v48  ;;  %vm14404_vm8 = vmmov %vm14403_vm1  ;;  %v14412_v48 = vld [vmem:[#allocation100_spill] sm:$0xff] }
 0x39e   : > { %v4588_v40 = vsel %vm14413_vm11, %v14412_v48, 0.0  ;;  %vm14441_vm11 = vmmov %vm14414_vm0  ;;  %v14470_v48 = vld [vmem:[#allocation7_spill] sm:$0xff] }
 0x39f   : > { %v4609_v57 = vpack.c.bf16 %v4588_v40, %v11614_v16  ;;  %v14423_v16 = vand.u32 15, %v14422_v37  ;;  %v14472_v40 = vld [vmem:[#allocation9_spill] sm:$0xff] }
 0x3a0   : > { %v14632_v37 = vld [vmem:[#allocation73_spill] sm:$0xff] }
 0x3a1   : > { %vm12005_vm9 = vcmp.le.s32.totalorder %v14423_v16, 13  ;;  %v14491_v16 = vld [vmem:[#allocation52_spill] sm:$0xff] }
 0x3a4   : > { %8633 = vmatmul.mubr.msk.bf16.vlgmr.msra.gmra.mrb[0].mxu1 %vm14392_vm15, %v4600_v58  ;;  %vm14417_vm15 = vnez %v14365_v21  ;;  %v14426_v21 = vld [vmem:[#allocation105_spill] sm:$0xff] }
 0x3a5   : > { %8665 = vmatpush3.bf16.msra.mxu1 %v14393_v34  ;;  %8636 = vmatprep.mubr.msk.bf16.mxu1 %vm14394_vm6, %v4601_v15  ;;  %v4590_v24 = vsel %vm14417_vm15, %v14416_v13, 0.0  ;;  %vm14421_vm6 = vmmov %vm14414_vm0  ;;  %v4596_v15 = vsel %vm12005_vm9, %v14428_v22, 0.0  ;;  %v14478_v13 = vld [vmem:[#allocation14_spill] sm:$0xff]  ;;  %v9424_v58 = vld [vmem:[%s13326_s7 + $0x8] sm:$0xff]  }
 0x3a6   : > { %8698 = vmatprep.subr.bf16.mxu1 %v9416_v17  ;;  %v4610_v6 = vpack.c.bf16 %v4590_v24, %v14419_v19  ;;  %v4613_v34 = vpack.c.bf16 %v4596_v15, %v11643_v28  ;;  %v9417_v28 = vld [vmem:[%s13322_s3 + $0x28] sm:$0xff]   ;;  %vm14446_vm15 = vmmov %vm14414_vm0  ;;  %v14486_v19 = vld [vmem:[#allocation82_spill] sm:$0xff] }
 0x3a7   : > { %v14480_v24 = vld [vmem:[#allocation17_spill] sm:$0xff]  ;;  %v14493_v15 = vld [vmem:[#allocation87_spill] sm:$0xff] }
 0x3ac   : > { %8637 = vmatmul.mubr.msk.bf16.gmra.mrb[4].mxu1 %vm14398_vm5, %v4602_v2  ;;  %vm14427_vm5 = vnez %v14288_v51  ;;  %v14438_v2 = vld [vmem:[#allocation12_spill] sm:$0xff] }
 0x3ad   : > { %8640 = vmatprep.mubr.msk.bf16.mxu1 %vm14374_vm3, %v4603_v35  ;;  %v4594_v47 = vsel %vm14427_vm5, %v14426_v21, 0.0  ;;  %vm12020_vm3 = vcmp.le.s32.totalorder %v14431_v60, 13  ;;  %v14440_v35 = vld [vmem:[#allocation16_spill] sm:$0xff]  ;;  %vm14452_vm5 = vmmov %vm14414_vm0 }
 0x3ae   : > { %v4612_v11 = vpack.c.bf16 %v4594_v47, %v11629_v63  ;;  %v4598_v51 = vsel %vm12020_vm3, %v11609_v45, 0.0  ;;  %v14436_v63 = vld [vmem:[#allocation8_spill] sm:$0xff]  ;;  %v14442_v45 = vld [vmem:[#allocation46_spill] sm:$0xff] }
 0x3af   : > { %v4614_v9 = vpack.c.bf16 %v4598_v51, %v11645_v23  ;;  %v14443_v23 = vld [vmem:[#allocation75_spill] sm:$0xff]  ;;  %v5224_v47 = vld [vmem:[#allocation3 + $0x10a] sm:$0xff]  ;;  %v14497_v51 = vld [vmem:[#allocation74_spill] sm:$0xff] }
 0x3b0   : > { %v5223_v21 = vld [vmem:[#allocation3 + $0x102] sm:$0xff] }
 0x3b1   : > { %v12100_v22 = vpack.c.bf16 %v5224_v47, %v5223_v21  ;;  %v6154_v21 = vld [vmem:[#allocation3 + $0x4a] sm:$0xff]  ;;  %v6153_v47 = vld [vmem:[#allocation3 + $0x42] sm:$0xff] }
 0x3b4   : > { %8641 = vmatmul.mubr.msk.bf16.gmra.mrb[8].mxu1 %vm14403_vm1, %v4604_v30  ;;  %vm14434_vm1 = vmmov %vm14414_vm0  ;;  %v14457_v30 = vld [vmem:[#allocation66_spill] sm:$0xff] }
 0x3b5   : > { %8644 = vmatprep.mubr.msk.bf16.mxu1 %vm14404_vm8, %v4605_v61  ;;  %vm14435_vm8 = vmmov %vm14414_vm0  ;;  %v14461_v61 = vld [vmem:[#allocation124_spill] sm:$0xff] }
 0x3b6   : > { %v4925_v4 = vsel %vm11913_vm14, %v14461_v61, 0.0  ;;  %v14522_v61 = vld [vmem:[#allocation118_spill] sm:$0xff] }
 0x3b7   : > { %v4943_v56 = vpack.c.bf16 %v14462_v38, %v4925_v4  ;;  %v14525_v4 = vmov 0.0   ;;  %v5556_v38 = vsel %vm12020_vm3, %v11824_v41, 0.0  ;;  %v14534_v41 = vld [vmem:[#allocation126_spill] sm:$0xff] }
 0x3bc   : > { %8645 = vmatmul.mubr.msk.bf16.gmra.mrb[12].mxu1 %vm14409_vm13, %v4606_v0  ;;  %vm14437_vm13 = vmmov %vm14414_vm0  ;;  %v14467_v0 = vld [vmem:[#allocation44_spill] sm:$0xff] }
 0x3bd   : > { %8648 = vmatprep.mubr.msk.bf16.mxu1 %vm14410_vm12, %v4607_v33  ;;  %vm14439_vm12 = vmmov %vm14414_vm0  ;;  %v4944_v33 = vpack.c.bf16 %v14467_v0, %v4927_v42  ;;  %v14536_v42 = vld [vmem:[#allocation127_spill] sm:$0xff]  ;;  %v14538_v0 = vld [vmem:[#allocation129_spill] sm:$0xff] }
 0x3c4   : > { %8649 = vmatmul.mubr.msk.bf16.gmra.mrb[16].mxu1 %vm14414_vm0, %v4608_v39  ;;  %v14474_v39 = vld [vmem:[#allocation11_spill] sm:$0xff] }
 0x3c5   : > { %8652 = vmatprep.mubr.msk.bf16.mxu1 %vm14415_vm4, %v4609_v57  ;;  %vm14444_vm4 = vmmov %vm14414_vm0  ;;  %v14476_v57 = vld [vmem:[#allocation13_spill] sm:$0xff] }
 0x3cc   : > { %8653 = vmatmul.mubr.msk.bf16.gmra.mrb[20].mxu1 %vm14420_vm2, %v4610_v6  ;;  %vm14448_vm2 = vmmov %vm14414_vm0  ;;  %v14488_v6 = vld [vmem:[#allocation19_spill] sm:$0xff] }
 0x3cd   : > { %8656 = vmatprep.mubr.msk.bf16.mxu1 %vm14421_vm6, %v4611_v10  ;;  %vm14450_vm6 = vmmov %vm14414_vm0  ;;  %v14490_v10 = vld [vmem:[#allocation38_spill] sm:$0xff] }
 0x3d4   : > { %8657 = vmatmul.mubr.msk.bf16.gmra.mrb[24].mxu1 %vm14429_vm10, %v4612_v11  ;;  %vm14454_vm10 = vmmov %vm14414_vm0  ;;  %v5225_v11 = vld [vmem:[#allocation3 + $0x112] sm:$0xff] }
 0x3d5   : > { %8660 = vmatprep.mubr.msk.bf16.mxu1 %vm14434_vm1, %v4613_v34  ;;  %vm14456_vm1 = vmmov %vm14414_vm0  ;;  %v5226_v34 = vld [vmem:[#allocation3 + $0x11a] sm:$0xff] }
 0x3d6   : > { %v12106_v60 = vpack.c.bf16 %v5226_v34, %v5225_v11  ;;  %v6155_v11 = vld [vmem:[#allocation3 + $0x52] sm:$0xff] }
 0x3d7   : > { %v6186_v34 = vpack.c.bf16 %v6156_v32, %v6155_v11 }
 0x3dc   : > { %8661 = vmatmul.mubr.msk.bf16.gmra.mrb[28].mxu1 %vm14435_vm8, %v4614_v9  ;;  %vm14458_vm8 = vmmov %vm14414_vm0  ;;  %v9419_v9 = vld [vmem:[%s13322_s3 + $0x38] sm:$0xff]  }
 0x3dd   : > { %8666 = vmatprep.mubr.msk.bf16.mxu1 %vm14437_vm13, %v14436_v63  ;;  %vm14460_vm13 = vmmov %vm14414_vm0  ;;  %v14499_v63 = vld [vmem:[#allocation79_spill] sm:$0xff] }
 0x3e4   : > { %8667 = vmatmul.mubr.msk.bf16.vlgmr.msra.gmra.mrb[0].mxu1 %vm14439_vm12, %v14438_v2  ;;  %vm14464_vm12 = vmmov %vm14414_vm0  ;;  %v14503_v2 = vld [vmem:[#allocation84_spill] sm:$0xff] }
 0x3e5   : > { %8699 = vmatpush3.bf16.msra.mxu1 %v9416_v17  ;;  %8670 = vmatprep.mubr.msk.bf16.mxu1 %vm14441_vm11, %v14440_v35  ;;  %v14451_v17 = vld [vmem:[#allocation90_spill] sm:$0xff]  ;;  %vm14465_vm11 = vmmov %vm14414_vm0 }
 0x3e6   : > { %8732 = vmatprep.subr.bf16.mxu1 %v9417_v28  ;;  %v14505_v35 = vld [vmem:[#allocation98_spill] sm:$0xff] }
 0x3ec   : > { %8671 = vmatmul.mubr.msk.bf16.gmra.mrb[4].mxu1 %vm14414_vm0, %v14442_v45  ;;  %v14507_v45 = vld [vmem:[#allocation106_spill] sm:$0xff] }
 0x3ed   : > { %8674 = vmatprep.mubr.msk.bf16.mxu1 %vm14444_vm4, %v14443_v23  ;;  %vm14469_vm4 = vmmov %vm14414_vm0  ;;  %v14509_v23 = vld [vmem:[#allocation107_spill] sm:$0xff] }
 0x3f4   : > { %8675 = vmatmul.mubr.msk.bf16.gmra.mrb[8].mxu1 %vm14446_vm15, %v14445_v14  ;;  %vm14471_vm15 = vmmov %vm14414_vm0  ;;  %v14511_v14 = vld [vmem:[#allocation112_spill] sm:$0xff] }
 0x3f5   : > { %8678 = vmatprep.mubr.msk.bf16.mxu1 %vm14448_vm2, %v14447_v43  ;;  %vm14473_vm2 = vmmov %vm14414_vm0  ;;  %v14512_v43 = vld [vmem:[#allocation113_spill] sm:$0xff] }
 0x3fc   : > { %8679 = vmatmul.mubr.msk.bf16.gmra.mrb[12].mxu1 %vm14450_vm6, %v14449_v44  ;;  %vm14475_vm6 = vmmov %vm14414_vm0  ;;  %v14514_v44 = vld [vmem:[#allocation114_spill] sm:$0xff] }
 0x3fd   : > { %8682 = vmatprep.mubr.msk.bf16.mxu1 %vm14452_vm5, %v14451_v17  ;;  %vm14477_vm5 = vmmov %vm14414_vm0  ;;  %v14516_v17 = vld [vmem:[#allocation115_spill] sm:$0xff] }
 0x404   : > { %8683 = vmatmul.mubr.msk.bf16.gmra.mrb[16].mxu1 %vm14454_vm10, %v14453_v62  ;;  %vm14479_vm10 = vmmov %vm14414_vm0  ;;  %v14518_v62 = vld [vmem:[#allocation116_spill] sm:$0xff] }
 0x405   : > { %8686 = vmatprep.mubr.msk.bf16.mxu1 %vm14456_vm1, %v14455_v55  ;;  %vm14481_vm1 = vmmov %vm14414_vm0  ;;  %v14520_v55 = vld [vmem:[#allocation117_spill] sm:$0xff] }
 0x40c   : > { %8687 = vmatmul.mubr.msk.bf16.gmra.mrb[20].mxu1 %vm14458_vm8, %v14457_v30  ;;  %vm14483_vm8 = vmmov %vm14414_vm0  ;;  %v5554_v30 = vsel %vm12005_vm9, %v11822_v31, 0.0  ;;  %v14529_v31 = vld [vmem:[#allocation121_spill] sm:$0xff] }
 0x40d   : > { %8690 = vmatprep.mubr.msk.bf16.mxu1 %vm14460_vm13, %v14459_v53  ;;  %vm14485_vm13 = vmmov %vm14414_vm0  ;;  %v5571_v53 = vpack.c.bf16 %v5554_v30, %v11838_v50  ;;  %v12157_v50 = vld [vmem:[%s13322_s3 + $0x40] sm:$0xff]   ;;  %v6168_v30 = vld [vmem:[#allocation3 + $0xba] sm:$0xff] }
 0x414   : > { %8691 = vmatmul.mubr.msk.bf16.gmra.mrb[24].mxu1 %vm14464_vm12, %v14463_v3  ;;  %vm14487_vm12 = vmmov %vm14414_vm0  ;;  %v14527_v3 = vld [vmem:[#allocation120_spill] sm:$0xff] }
 0x415   : > { %8694 = vmatprep.mubr.msk.bf16.mxu1 %vm14465_vm11, %v4943_v56  ;;  %vm14489_vm11 = vmmov %vm14414_vm0  ;;  %v5572_v56 = vpack.c.bf16 %v5556_v38, %v11840_v46  ;;  %v14532_v46 = vld [vmem:[#allocation123_spill] sm:$0xff] }
 0x41c   : > { %8695 = vmatmul.mubr.msk.bf16.gmra.mrb[28].mxu1 %vm14414_vm0, %v4944_v33  ;;  %v14540_v33 = vld [vmem:[#allocation130_spill] sm:$0xff] }
 0x41d   : > { %8700 = vmatprep.mubr.msk.bf16.mxu1 %vm14469_vm4, %v14468_v27  ;;  %vm14492_vm4 = vmmov %vm14414_vm0  ;;  %v14542_v27 = vld [vmem:[#allocation131_spill] sm:$0xff] }
 0x424   : > { %8701 = vmatmul.mubr.msk.bf16.vlgmr.msra.gmra.mrb[0].mxu1 %vm14471_vm15, %v14470_v48  ;;  %vm14494_vm15 = vmmov %vm14414_vm0  ;;  %v14546_v48 = vld [vmem:[#allocation42_spill] sm:$0xff] }
 0x425   : > { %8733 = vmatpush3.bf16.msra.mxu1 %v9417_v28  ;;  %8704 = vmatprep.mubr.msk.bf16.mxu1 %vm14473_vm2, %v14472_v40  ;;  %vm14495_vm2 = vmmov %vm14414_vm0  ;;  %v14501_v28 = vld [vmem:[#allocation91_spill] sm:$0xff]  ;;  %v14548_v40 = vld [vmem:[#allocation61_spill] sm:$0xff] }
 0x426   : > { %8766 = vmatprep.subr.bf16.mxu1 %v9418_v7 }
 0x42c   : > { %8705 = vmatmul.mubr.msk.bf16.gmra.mrb[4].mxu1 %vm14475_vm6, %v14474_v39  ;;  %vm14496_vm6 = vmmov %vm14414_vm0  ;;  %v14550_v39 = vld [vmem:[#allocation51_spill] sm:$0xff] }
 0x42d   : > { %8708 = vmatprep.mubr.msk.bf16.mxu1 %vm14477_vm5, %v14476_v57  ;;  %vm14498_vm5 = vmmov %vm14414_vm0  ;;  %v5851_v57 = vld [vmem:[#allocation3 + $0x120] sm:$0xff] }
 0x434   : > { %8709 = vmatmul.mubr.msk.bf16.gmra.mrb[8].mxu1 %vm14479_vm10, %v14478_v13  ;;  %vm14500_vm10 = vmmov %vm14414_vm0  ;;  %v5852_v13 = vld [vmem:[#allocation3 + $0x128] sm:$0xff] }
 0x435   : > { %8712 = vmatprep.mubr.msk.bf16.mxu1 %vm14481_vm1, %v14480_v24  ;;  %vm14502_vm1 = vmmov %vm14414_vm0  ;;  %v5883_v24 = vsel %vm11913_vm14, %v5851_v57, 0.0 }
 0x436   : > { %vm14556_vm14 = vmmov %vm14414_vm0 }
 0x43c   : > { %8713 = vmatmul.mubr.msk.bf16.gmra.mrb[12].mxu1 %vm14483_vm8, %v14482_v29  ;;  %vm14504_vm8 = vmmov %vm14414_vm0  ;;  %v5853_v29 = vld [vmem:[#allocation3 + $0x130] sm:$0xff] }
 0x43d   : > { %8716 = vmatprep.mubr.msk.bf16.mxu1 %vm14485_vm13, %v14484_v26  ;;  %vm14506_vm13 = vmmov %vm14414_vm0  ;;  %v5901_v26 = vpack.c.bf16 %v5852_v13, %v5883_v24  ;;  %v14570_v24 = vld [vmem:[#allocation10_spill] sm:$0xff] }
 0x444   : > { %8717 = vmatmul.mubr.msk.bf16.gmra.mrb[16].mxu1 %vm14487_vm12, %v14486_v19  ;;  %vm14508_vm12 = vmmov %vm14414_vm0  ;;  %v14552_v19 = vld [vmem:[#allocation53_spill] sm:$0xff] }
 0x445   : > { %8720 = vmatprep.mubr.msk.bf16.mxu1 %vm14489_vm11, %v14488_v6  ;;  %vm14510_vm11 = vmmov %vm14414_vm0  ;;  %v5854_v6 = vld [vmem:[#allocation3 + $0x138] sm:$0xff] }
 0x44c   : > { %8721 = vmatmul.mubr.msk.bf16.gmra.mrb[20].mxu1 %vm14414_vm0, %v14490_v10  ;;  %v5885_v10 = vsel %vm11928_vm7, %v5853_v29, 0.0  ;;  %vm14557_vm7 = vmmov %vm14414_vm0  ;;  %v14572_v29 = vld [vmem:[#allocation48_spill] sm:$0xff] }
 0x44d   : > { %8724 = vmatprep.mubr.msk.bf16.mxu1 %vm14492_vm4, %v14491_v16  ;;  %vm14513_vm4 = vmmov %vm14414_vm0  ;;  %v5902_v16 = vpack.c.bf16 %v5854_v6, %v5885_v10  ;;  %v14582_v6 = vld [vmem:[#allocation95_spill] sm:$0xff]  ;;  %v14584_v10 = vld [vmem:[#allocation40_spill] sm:$0xff] }
 0x454   : > { %8725 = vmatmul.mubr.msk.bf16.gmra.mrb[24].mxu1 %vm14494_vm15, %v14493_v15  ;;  %vm14515_vm15 = vmmov %vm14414_vm0  ;;  %v6185_v15 = vpack.c.bf16 %v6154_v21, %v6153_v47  ;;  %v6479_v21 = vld [vmem:[#allocation3 + $0x124] sm:$0xff] }
 0x455   : > { %8728 = vmatprep.mubr.msk.bf16.mxu1 %vm14495_vm2, %v12100_v22  ;;  %vm14517_vm2 = vmmov %vm14414_vm0 }
 0x45c   : > { %8729 = vmatmul.mubr.msk.bf16.gmra.mrb[28].mxu1 %vm14496_vm6, %v12106_v60  ;;  %vm14519_vm6 = vmmov %vm14414_vm0 }
 0x45d   : > { %8734 = vmatprep.mubr.msk.bf16.mxu1 %vm14498_vm5, %v14497_v51  ;;  %vm14521_vm5 = vmmov %vm14414_vm0  ;;  %v6157_v51 = vld [vmem:[#allocation3 + $0x62] sm:$0xff] }
 0x464   : > { %8735 = vmatmul.mubr.msk.bf16.vlgmr.msra.gmra.mrb[0].mxu1 %vm14500_vm10, %v14499_v63  ;;  %vm14523_vm10 = vmmov %vm14414_vm0  ;;  %v6160_v63 = vld [vmem:[#allocation3 + $0x7a] sm:$0xff] }
 0x465   : > { %8767 = vmatpush3.bf16.msra.mxu1 %v9418_v7  ;;  %8738 = vmatprep.mubr.msk.bf16.mxu1 %vm14502_vm1, %v14501_v28  ;;  %vm14524_vm1 = vmmov %vm14414_vm0  ;;  %v14544_v7 = vld [vmem:[#allocation132_spill] sm:$0xff] }
 0x466   : > { %8800 = vmatprep.subr.bf16.mxu1 %v9419_v9  ;;  %v6162_v28 = vld [vmem:[#allocation3 + $0x8a] sm:$0xff] }
 0x46c   : > { %8739 = vmatmul.mubr.msk.bf16.gmra.mrb[4].mxu1 %vm14504_vm8, %v14503_v2  ;;  %vm600_vm8 = vcmask 125952   ;;  %v6159_v2 = vld [vmem:[#allocation3 + $0x72] sm:$0xff] }
 0x46d   : > { %8742 = vmatprep.mubr.msk.bf16.mxu1 %vm14506_vm13, %v14505_v35  ;;  %601 = vst.msk [vmem:[#allocation3 + $0x140] sm:$0xf] %vm600_vm8, %v14525_v4  ;;  %vm14526_vm13 = vmmov %vm14414_vm0  ;;  %v6188_v35 = vpack.c.bf16 %v6160_v63, %v6159_v2  ;;  %v14595_v63 = vld [vmem:[#allocation18_spill] sm:$0xff]  ;;  %v9426_v2 = vld [vmem:[%s13326_s7 + $0x18] sm:$0xff]  }
 0x46e   : > { %vm14547_vm8 = vmmov %vm14414_vm0 }
 0x474   : > { %8743 = vmatmul.mubr.msk.bf16.gmra.mrb[8].mxu1 %vm14508_vm12, %v14507_v45  ;;  %vm14528_vm12 = vmmov %vm14414_vm0  ;;  %v6161_v45 = vld [vmem:[#allocation3 + $0x82] sm:$0xff]  ;;  %v6184_v57 = vld [vmem:[#allocation3 + $0x13a] sm:$0xff] }
 0x475   : > { %8746 = vmatprep.mubr.msk.bf16.mxu1 %vm14510_vm11, %v14509_v23  ;;  %vm14530_vm11 = vmmov %vm14414_vm0  ;;  %v6189_v23 = vpack.c.bf16 %v6162_v28, %v6161_v45  ;;  %v6482_v32 = vld [vmem:[#allocation3 + $0x13c] sm:$0xff]  ;;  %v7114_v28 = vshra.s32 %v14595_v63, 4 }
 0x47c   : > { %8747 = vmatmul.mubr.msk.bf16.gmra.mrb[12].mxu1 %vm14414_vm0, %v14511_v14  ;;  %v6164_v14 = vld [vmem:[#allocation3 + $0x9a] sm:$0xff] }
 0x47d   : > { %8750 = vmatprep.mubr.msk.bf16.mxu1 %vm14513_vm4, %v14512_v43  ;;  %vm14533_vm4 = vmmov %vm14414_vm0  ;;  %v6166_v43 = vld [vmem:[#allocation3 + $0xaa] sm:$0xff] }
 0x484   : > { %8751 = vmatmul.mubr.msk.bf16.gmra.mrb[16].mxu1 %vm14515_vm15, %v14514_v44  ;;  %vm14535_vm15 = vmmov %vm14414_vm0  ;;  %v6163_v44 = vld [vmem:[#allocation3 + $0x92] sm:$0xff] }
 0x485   : > { %8754 = vmatprep.mubr.msk.bf16.mxu1 %vm14517_vm2, %v14516_v17  ;;  %vm14537_vm2 = vmmov %vm14414_vm0  ;;  %v6190_v17 = vpack.c.bf16 %v6164_v14, %v6163_v44  ;;  %v7050_v44 = vand.u32 3, %v14595_v63  ;;  %v14604_v63 = vld [vmem:[#allocation54_spill] sm:$0xff] }
 0x48c   : > { %8755 = vmatmul.mubr.msk.bf16.gmra.mrb[20].mxu1 %vm14519_vm6, %v14518_v62  ;;  %vm14539_vm6 = vmmov %vm14414_vm0  ;;  %v6165_v62 = vld [vmem:[#allocation3 + $0xa2] sm:$0xff] }
 0x48d   : > { %8758 = vmatprep.mubr.msk.bf16.mxu1 %vm14521_vm5, %v14520_v55  ;;  %vm14541_vm5 = vmmov %vm14414_vm0  ;;  %v6191_v55 = vpack.c.bf16 %v6166_v43, %v6165_v62 }
 0x494   : > { %8759 = vmatmul.mubr.msk.bf16.gmra.mrb[24].mxu1 %vm14523_vm10, %v14522_v61  ;;  %vm14543_vm10 = vmmov %vm14414_vm0  ;;  %v6167_v61 = vld [vmem:[#allocation3 + $0xb2] sm:$0xff] }
 0x495   : > { %8762 = vmatprep.mubr.msk.bf16.mxu1 %vm14524_vm1, %v5571_v53  ;;  %vm14545_vm1 = vmmov %vm14414_vm0  ;;  %v6170_v53 = vld [vmem:[#allocation3 + $0xca] sm:$0xff]  ;;  %v6192_v38 = vpack.c.bf16 %v6168_v30, %v6167_v61 }
 0x49c   : > { %8763 = vmatmul.mubr.msk.bf16.gmra.mrb[28].mxu1 %vm14526_vm13, %v5572_v56  ;;  %vm14549_vm13 = vmmov %vm14414_vm0  ;;  %v6169_v56 = vld [vmem:[#allocation3 + $0xc2] sm:$0xff] }
 0x49d   : > { %8768 = vmatprep.mubr.msk.bf16.mxu1 %vm14528_vm12, %v14527_v3  ;;  %vm14551_vm12 = vmmov %vm14414_vm0  ;;  %v6193_v3 = vpack.c.bf16 %v6170_v53, %v6169_v56  ;;  %v14596_v53 = vld [vmem:[#allocation41_spill] sm:$0xff] }
 0x49e   : > { %v7115_v61 = vshra.s32 %v14596_v53, 4 }
 0x4a4   : > { %8769 = vmatmul.mubr.msk.bf16.vlgmr.msra.gmra.mrb[0].mxu1 %vm14530_vm11, %v14529_v31  ;;  %vm14553_vm11 = vmmov %vm14414_vm0  ;;  %v6174_v31 = vld [vmem:[#allocation3 + $0xea] sm:$0xff] }
 0x4a5   : > { %8801 = vmatpush3.bf16.msra.mxu1 %v9419_v9  ;;  %8772 = vmatprep.mubr.msk.bf16.mxu1 %vm14414_vm0, %v14531_v59  ;;  %v6187_v9 = vpack.c.bf16 %v6158_v54, %v6157_v51  ;;  %v6171_v59 = vld [vmem:[#allocation3 + $0xd2] sm:$0xff]  ;;  %v14593_v54 = vld [vmem:[#allocation15_spill] sm:$0xff] }
 0x4a6   : > { %8834 = vmatprep.subr.bf16.mxu1 %v12157_v50  ;;  %v7112_v11 = vshra.s32 %v14593_v54, 4  ;;  %v7048_v45 = vand.u32 3, %v14593_v54 }
 0x4ac   : > { %8773 = vmatmul.mubr.msk.bf16.gmra.mrb[4].mxu1 %vm14533_vm4, %v14532_v46  ;;  %vm14554_vm4 = vmmov %vm14414_vm0 }
 0x4ad   : > { %8776 = vmatprep.mubr.msk.bf16.mxu1 %vm14535_vm15, %v14534_v41  ;;  %vm602_vm15 = vcmask 261120   ;;  %v6173_v41 = vld [vmem:[#allocation3 + $0xe2] sm:$0xff] }
 0x4ae   : > { %605 = vst.msk [vmem:[#allocation4 + $0x10] sm:$0xff] %vm602_vm15, %v14525_v4  ;;  %603 = vst.msk [vmem:[#allocation4] sm:$0xff] %vm602_vm15, %v14525_v4 }
 0x4af   : > { %604 = vst.msk [vmem:[#allocation4 + $0x8] sm:$0xff] %vm602_vm15, %v14525_v4  ;;  %606 = vst.msk [vmem:[#allocation4 + $0x18] sm:$0xff] %vm602_vm15, %v14525_v4 }
 0x4b0   : > { %607 = vst.msk [vmem:[#allocation4 + $0x20] sm:$0xff] %vm602_vm15, %v14525_v4  ;;  %608 = vst.msk [vmem:[#allocation4 + $0x28] sm:$0xff] %vm602_vm15, %v14525_v4 }
 0x4b1   : > { %609 = vst.msk [vmem:[#allocation4 + $0x30] sm:$0xff] %vm602_vm15, %v14525_v4  ;;  %610 = vst.msk [vmem:[#allocation4 + $0x38] sm:$0xff] %vm602_vm15, %v14525_v4 }
 0x4b2   : > { %611 = vst.msk [vmem:[#allocation4 + $0x40] sm:$0xff] %vm602_vm15, %v14525_v4  ;;  %612 = vst.msk [vmem:[#allocation4 + $0x48] sm:$0xff] %vm602_vm15, %v14525_v4 }
 0x4b3   : > { %613 = vst.msk [vmem:[#allocation4 + $0x50] sm:$0xff] %vm602_vm15, %v14525_v4  ;;  %614 = vst.msk [vmem:[#allocation4 + $0x58] sm:$0xff] %vm602_vm15, %v14525_v4 }
 0x4b4   : > { %8777 = vmatmul.mubr.msk.bf16.gmra.mrb[8].mxu1 %vm14537_vm2, %v14536_v42  ;;  %vm14555_vm2 = vmmov %vm14414_vm0  ;;  %615 = vst.msk [vmem:[#allocation4 + $0x60] sm:$0xff] %vm602_vm15, %v14525_v4  ;;  %v6195_v42 = vpack.c.bf16 %v6174_v31, %v6173_v41  ;;  %v14599_v41 = vld [vmem:[#allocation22_spill] sm:$0xff] }
 0x4b5   : > { %8780 = vmatprep.mubr.msk.bf16.mxu1 %vm14539_vm6, %v14538_v0  ;;  %616 = vst.msk [vmem:[#allocation4 + $0x68] sm:$0xff] %vm602_vm15, %v14525_v4  ;;  %617 = vst.msk [vmem:[#allocation4 + $0x70] sm:$0xff] %vm602_vm15, %v14525_v4  ;;  %v6176_v0 = vld [vmem:[#allocation3 + $0xfa] sm:$0xff]  ;;  %v14627_v20 = vand.u32 3, %v14599_v41 }
 0x4b6   : > { %618 = vst.msk [vmem:[#allocation4 + $0x78] sm:$0xff] %vm602_vm15, %v14525_v4  ;;  %619 = vst.msk [vmem:[#allocation4 + $0x80] sm:$0xff] %vm602_vm15, %v14525_v4 }
 0x4b7   : > { %620 = vst.msk [vmem:[#allocation4 + $0x88] sm:$0xff] %vm602_vm15, %v14525_v4  ;;  %621 = vst.msk [vmem:[#allocation4 + $0x90] sm:$0xff] %vm602_vm15, %v14525_v4 }
 0x4b8   : > { %622 = vst.msk [vmem:[#allocation4 + $0x98] sm:$0xff] %vm602_vm15, %v14525_v4  ;;  %623 = vst.msk [vmem:[#allocation4 + $0xa0] sm:$0xff] %vm602_vm15, %v14525_v4 }
 0x4b9   : > { %624 = vst.msk [vmem:[#allocation4 + $0xa8] sm:$0xff] %vm602_vm15, %v14525_v4  ;;  %625 = vst.msk [vmem:[#allocation4 + $0xb0] sm:$0xff] %vm602_vm15, %v14525_v4 }
 0x4ba   : > { %626 = vst.msk [vmem:[#allocation4 + $0xb8] sm:$0xff] %vm602_vm15, %v14525_v4  ;;  %627 = vst.msk [vmem:[#allocation4 + $0xc0] sm:$0xff] %vm602_vm15, %v14525_v4 }
 0x4bb   : > { %628 = vst.msk [vmem:[#allocation4 + $0xc8] sm:$0xff] %vm602_vm15, %v14525_v4  ;;  %629 = vst.msk [vmem:[#allocation4 + $0xd0] sm:$0xff] %vm602_vm15, %v14525_v4 }
 0x4bc   : > { %8781 = vmatmul.mubr.msk.bf16.gmra.mrb[12].mxu1 %vm14541_vm5, %v14540_v33  ;;  %630 = vst.msk [vmem:[#allocation4 + $0xd8] sm:$0xff] %vm602_vm15, %v14525_v4  ;;  %631 = vst.msk [vmem:[#allocation4 + $0xe0] sm:$0xff] %vm602_vm15, %v14525_v4  ;;  %v6175_v33 = vld [vmem:[#allocation3 + $0xf2] sm:$0xff] }
 0x4bd   : > { %8784 = vmatprep.mubr.msk.bf16.mxu1 %vm14543_vm10, %v14542_v27  ;;  %632 = vst.msk [vmem:[#allocation4 + $0xe8] sm:$0xff] %vm602_vm15, %v14525_v4  ;;  %633 = vst.msk [vmem:[#allocation4 + $0xf0] sm:$0xff] %vm602_vm15, %v14525_v4  ;;  %v6196_v27 = vpack.c.bf16 %v6176_v0, %v6175_v33 }
 0x4be   : > { %634 = vst.msk [vmem:[#allocation4 + $0xf8] sm:$0xff] %vm602_vm15, %v14525_v4  ;;  %635 = vst.msk [vmem:[#allocation4 + $0x100] sm:$0xff] %vm602_vm15, %v14525_v4 }
 0x4bf   : > { %636 = vst.msk [vmem:[#allocation4 + $0x108] sm:$0xff] %vm602_vm15, %v14525_v4  ;;  %637 = vst.msk [vmem:[#allocation4 + $0x110] sm:$0xff] %vm602_vm15, %v14525_v4 }
 0x4c0   : > { %638 = vst.msk [vmem:[#allocation4 + $0x118] sm:$0xff] %vm602_vm15, %v14525_v4  ;;  %vm14558_vm6 = vmmov %vm14414_vm0 }
 0x4c1   : > { %vm14559_vm5 = vmmov %vm14414_vm0 }
 0x4c2   : > { %vm14560_vm10 = vmmov %vm14414_vm0 }
 0x4c4   : > { %8785 = vmatmul.mubr.msk.bf16.gmra.mrb[16].mxu1 %vm14545_vm1, %v14544_v7  ;;  %vm14561_vm1 = vmmov %vm14414_vm0  ;;  %v6181_v7 = vld [vmem:[#allocation3 + $0x122] sm:$0xff] }
 0x4c5   : > { %8788 = vmatprep.mubr.msk.bf16.mxu1 %vm14547_vm8, %v14546_v48  ;;  %vm14562_vm8 = vmmov %vm14414_vm0  ;;  %v6182_v48 = vld [vmem:[#allocation3 + $0x12a] sm:$0xff] }
 0x4cc   : > { %8789 = vmatmul.mubr.msk.bf16.gmra.mrb[20].mxu1 %vm14549_vm13, %v14548_v40  ;;  %vm14563_vm13 = vmmov %vm14414_vm0  ;;  %v6199_v40 = vpack.c.bf16 %v6182_v48, %v6181_v7 }
 0x4cd   : > { %8792 = vmatprep.mubr.msk.bf16.mxu1 %vm14551_vm12, %v14550_v39  ;;  %vm14564_vm12 = vmmov %vm14414_vm0  ;;  %v6183_v39 = vld [vmem:[#allocation3 + $0x132] sm:$0xff] }
 0x4ce   : > { %v6200_v13 = vpack.c.bf16 %v6184_v57, %v6183_v39  ;;  %v14601_v57 = vld [vmem:[#allocation24_spill] sm:$0xff] }
 0x4d4   : > { %8793 = vmatmul.mubr.msk.bf16.gmra.mrb[24].mxu1 %vm14553_vm11, %v14552_v19  ;;  %vm14565_vm11 = vmmov %vm14414_vm0  ;;  %v14580_v19 = vld [vmem:[#allocation36_spill] sm:$0xff] }
 0x4d5   : > { %8796 = vmatprep.mubr.msk.bf16.mxu1 %vm14414_vm0, %v5901_v26  ;;  %v14576_v26 = vld [vmem:[#allocation93_spill] sm:$0xff] }
 0x4dc   : > { %8797 = vmatmul.mubr.msk.bf16.gmra.mrb[28].mxu1 %vm14554_vm4, %v5902_v16  ;;  %vm14566_vm4 = vmmov %vm14414_vm0  ;;  %v6480_v16 = vld [vmem:[#allocation3 + $0x12c] sm:$0xff] }
 0x4dd   : > { %8802 = vmatprep.mubr.msk.bf16.mxu1 %vm14555_vm2, %v6185_v15  ;;  %vm14567_vm2 = vmmov %vm14414_vm0  ;;  %v6512_v47 = vsel %vm12005_vm9, %v6480_v16, 0.0  ;;  %vm639_vm9 = vcmask 254976  }
 0x4de   : > { %v6529_v15 = vpack.c.bf16 %v6512_v47, %v6479_v21  ;;  %640 = vst.msk [vmem:[#allocation4 + $0x120] sm:$0x3] %vm639_vm9, %v14525_v4 }
 0x4e4   : > { %8803 = vmatmul.mubr.msk.bf16.vlgmr.msra.gmra.mrb[0].mxu1 %vm14556_vm14, %v6186_v34  ;;  %vm14568_vm14 = vmmov %vm14414_vm0  ;;  %v14594_v34 = vld [vmem:[#allocation39_spill] sm:$0xff] }
 0x4e5   : > { %8835 = vmatpush3.bf16.msra.mxu1 %v12157_v50  ;;  %8806 = vmatprep.mubr.msk.bf16.mxu1 %vm14557_vm7, %v6187_v9  ;;  %v6172_v50 = vld [vmem:[#allocation3 + $0xda] sm:$0xff]  ;;  %vm14569_vm7 = vmmov %vm14414_vm0  ;;  %v7113_v51 = vshra.s32 %v14594_v34, 4  ;;  %v12344_v9 = vld [vmem:[%s13323_s4] ss:$0 sm:$0xff] }
 0x4e6   : > { %8876 = vmatprep.subr.bf16.mxu1 %v14525_v4  ;;  %v6194_v46 = vpack.c.bf16 %v6172_v50, %v6171_v59  ;;  %v14598_v59 = vld [vmem:[#allocation43_spill] sm:$0xff] }
 0x4e7   : > { %v12359_v62 = vand.u32 3, %v7113_v51 }
 0x4ec   : > { %8807 = vmatmul.mubr.msk.bf16.gmra.mrb[4].mxu1 %vm14558_vm6, %v6188_v35  ;;  %vm14571_vm6 = vmmov %vm14414_vm0 }
 0x4ed   : > { %8810 = vmatprep.mubr.msk.bf16.mxu1 %vm14559_vm5, %v6189_v23  ;;  %vm14573_vm5 = vmmov %vm14414_vm0  ;;  %v7049_v23 = vand.u32 3, %v14594_v34 }
 0x4f4   : > { %8811 = vmatmul.mubr.msk.bf16.gmra.mrb[8].mxu1 %vm14560_vm10, %v6190_v17  ;;  %vm14575_vm10 = vmmov %vm14414_vm0  ;;  %v12357_v17 = vand.u32 3, %v7112_v11 }
 0x4f5   : > { %8814 = vmatprep.mubr.msk.bf16.mxu1 %vm14561_vm1, %v6191_v55  ;;  %vm14577_vm1 = vmmov %vm14414_vm0 }
 0x4fc   : > { %8815 = vmatmul.mubr.msk.bf16.gmra.mrb[12].mxu1 %vm14562_vm8, %v6192_v38  ;;  %vm14579_vm8 = vmmov %vm14414_vm0  ;;  %v14597_v38 = vld [vmem:[#allocation20_spill] sm:$0xff] }
 0x4fd   : > { %8818 = vmatprep.mubr.msk.bf16.mxu1 %vm14563_vm13, %v6193_v3  ;;  %vm14581_vm13 = vmmov %vm14414_vm0  ;;  %v7116_v56 = vshra.s32 %v14597_v38, 4 }
 0x4ff   : > { %v12399_v16 = vand.u32 3, %v7116_v56  ;;  %v14606_v56 = vld [vmem:[#allocation57_spill] sm:$0xff] }
 0x504   : > { %8819 = vmatmul.mubr.msk.bf16.gmra.mrb[16].mxu1 %vm14564_vm12, %v6194_v46  ;;  %vm14583_vm12 = vmmov %vm14414_vm0  ;;  %v7117_v46 = vshra.s32 %v14598_v59, 4 }
 0x505   : > { %8822 = vmatprep.mubr.msk.bf16.mxu1 %vm14565_vm11, %v6195_v42  ;;  %vm14585_vm11 = vmmov %vm14414_vm0  ;;  %v7118_v42 = vshra.s32 %v14599_v41, 4 }
 0x506   : > { %v12401_v21 = vand.u32 3, %v7117_v46  ;;  %v14607_v46 = vld [vmem:[#allocation27_spill] sm:$0xff] }
 0x507   : > { %v12403_v47 = vand.u32 3, %v7118_v42  ;;  %v7126_v42 = vshra.s32 %v14607_v46, 4 }
 0x508   : > { %vm7181_vm9 = vcmp.eq.s32.totalorder %v12401_v21, 0 }
 0x50c   : > { %8823 = vmatmul.mubr.msk.bf16.gmra.mrb[20].mxu1 %vm14414_vm0, %v6196_v27 }
 0x50d   : > { %8826 = vmatprep.mubr.msk.bf16.mxu1 %vm14566_vm4, %v12100_v22  ;;  %v14574_v22 = vld [vmem:[#allocation23_spill] sm:$0xff]  ;;  %vm14586_vm4 = vmmov %vm14414_vm0 }
 0x514   : > { %8827 = vmatmul.mubr.msk.bf16.gmra.mrb[24].mxu1 %vm14567_vm2, %v12106_v60  ;;  %v14578_v60 = vld [vmem:[#allocation34_spill] sm:$0xff]  ;;  %vm14587_vm2 = vmmov %vm14414_vm0 }
 0x515   : > { %8830 = vmatprep.mubr.msk.bf16.mxu1 %vm14568_vm14, %v6199_v40  ;;  %vm14588_vm14 = vmmov %vm14414_vm0  ;;  %v14600_v40 = vld [vmem:[#allocation47_spill] sm:$0xff] }
 0x516   : > { %v7119_v39 = vshra.s32 %v14600_v40, 4 }
 0x51c   : > { %8831 = vmatmul.mubr.msk.bf16.gmra.mrb[28].mxu1 %vm14569_vm7, %v6200_v13  ;;  %vm14589_vm7 = vmmov %vm14414_vm0  ;;  %v7120_v13 = vshra.s32 %v14601_v57, 4 }
 0x51d   : > { %8836 = vmatprep.mubr.msk.bf16.mxu1 %vm14571_vm6, %v14570_v24  ;;  %vm14590_vm6 = vmmov %vm14414_vm0  ;;  %v14602_v24 = vld [vmem:[#allocation50_spill] sm:$0xff] }
 0x524   : > { %8837 = vmatmul.mubr.msk.bf16.vlgmr.msra.gmra.mrb[0].mxu1 %vm14573_vm5, %v14572_v29  ;;  %vm14591_vm5 = vmmov %vm14414_vm0  ;;  %v7121_v29 = vshra.s32 %v14602_v24, 4 }
 0x525   : > { %8840 = vmatprep.mubr.msk.bf16.mxu1 %vm14575_vm10, %v14574_v22  ;;  %vm14592_vm10 = vmmov %vm14414_vm0 }
 0x52c   : > { %8841 = vmatmul.mubr.msk.bf16.gmra.mrb[4].mxu1 %vm14577_vm1, %v14576_v26  ;;  %vm9442_vm1 = vmmov 0  }
 0x52d   : > { %8844 = vmatprep.mubr.msk.bf16.mxu1 %vm14579_vm8, %v14578_v60  ;;  %8872 = vmatprep.mubr.msk.bf16.mxu0 %vm9442_vm1, %v14525_v4  ;;  %vm7176_vm8 = vcmp.eq.s32.totalorder %v12357_v17, 0 }
 0x534   : > { %8845 = vmatmul.mubr.msk.bf16.gmra.mrb[8].mxu1 %vm14581_vm13, %v14580_v19  ;;  %v14603_v19 = vld [vmem:[#allocation25_spill] sm:$0xff]  ;;  %vm12449_vm13 = vcmp.eq.s32.totalorder %v7050_v44, 0 }
 0x535   : > { %8848 = vmatprep.mubr.msk.bf16.mxu1 %vm14583_vm12, %v14582_v6  ;;  %v7122_v6 = vshra.s32 %v14603_v19, 4 }
 0x537   : > { %v12424_v51 = vand.u32 3, %v7122_v6 }
 0x53c   : > { %8849 = vmatmul.mubr.msk.bf16.gmra.mrb[12].mxu1 %vm14585_vm11, %v14584_v10  ;;  %v12397_v10 = vand.u32 3, %v7115_v61  ;;  %vm12463_vm11 = vcmp.eq.s32.totalorder %v7049_v23, 0  ;;  %v12480_v23 = vand.u32 3, %v7126_v42 }
 0x53d   : > { %8852 = vmatprep.mubr.msk.bf16.mxu1 %vm14414_vm0, %v11855_v5  ;;  %vm7177_vm0 = vcmp.eq.s32.totalorder %v12359_v62, 0 }
 0x544   : > { %8853 = vmatmul.mubr.msk.bf16.gmra.mrb[16].mxu1 %vm14586_vm4, %v11858_v36  ;;  %v6481_v36 = vld [vmem:[#allocation3 + $0x134] sm:$0xff] }
 0x545   : > { %8856 = vmatprep.mubr.msk.bf16.mxu1 %vm14587_vm2, %v11861_v18  ;;  %v6514_v18 = vsel %vm12020_vm3, %v6482_v32, 0.0  ;;  %vm12438_vm3 = vcmp.eq.s32.totalorder %v7048_v45, 0  ;;  %v14612_v45 = vld [vmem:[#allocation62_spill] sm:$0xff]  ;;  %vm7179_vm2 = vcmp.eq.s32.totalorder %v12397_v10, 0 }
 0x546   : > { %v6530_v5 = vpack.c.bf16 %v6514_v18, %v6481_v36  ;;  %v14614_v36 = vld [vmem:[#allocation65_spill] sm:$0xff] }
 0x547   : > { %v7129_v6 = vshra.s32 %v14614_v36, 4 }
 0x54c   : > { %8857 = vmatmul.mubr.msk.bf16.gmra.mrb[20].mxu1 %vm14588_vm14, %v11864_v52  ;;  %v9421_v52 = vld [vmem:[%s13324_s5] sm:$0xff]   ;;  %vm12520_vm14 = vcmp.eq.s32.totalorder %v14627_v20, 0 }
 0x54d   : > { %8860 = vmatprep.mubr.msk.bf16.mxu1 %vm14589_vm7, %v11875_v8  ;;  %8869 = vmatpush3.bf16.msra.mxu0 %v9421_v52  ;;  %v9422_v8 = vld [vmem:[%s13324_s5 + $0x8] sm:$0xff]   ;;  %vm7182_vm7 = vcmp.eq.s32.totalorder %v12403_v47, 0 }
 0x54e   : > { %8870 = vmatprep.subr.bf16.mxu0 %v14525_v4 }
 0x551   : > { %8871 = vmatpush3.bf16.msra.mxu0 %v9422_v8 }
 0x554   : > { %8861 = vmatmul.mubr.msk.bf16.gmra.mrb[24].mxu1 %vm14590_vm6, %v11878_v49  ;;  %v9423_v49 = vld [vmem:[%s13326_s7] sm:$0xff]  }
 0x555   : > { %8864 = vmatprep.mubr.msk.bf16.mxu1 %vm14591_vm5, %v6529_v15  ;;  %8877 = vmatpush3.bf16.msra.mxu1 %v9423_v49  ;;  %v12415_v49 = vand.u32 3, %v7119_v39  ;;  %vm7180_vm5 = vcmp.eq.s32.totalorder %v12399_v16, 0 }
 0x556   : > { %8878 = vmatprep.subr.bf16.mxu1 %v14525_v4 }
 0x559   : > { %8879 = vmatpush3.bf16.msra.mxu1 %v9424_v58  ;;  %v12417_v58 = vand.u32 3, %v7120_v13 }
 0x55a   : > { %8880 = vmatprep.subr.bf16.mxu1 %v14525_v4 }
 0x55c   : > { %8865 = vmatmul.mubr.msk.bf16.gmra.mrb[28].mxu1 %vm14592_vm10, %v6530_v5  ;;  %v14613_v5 = vld [vmem:[#allocation28_spill] sm:$0xff] }
 0x55d   : > { %8884 = vmatprep.mubr.msk.bf16.mxu1 %vm9442_vm1, %v14525_v4  ;;  %8881 = vmatpush3.bf16.msra.mxu1 %v9425_v25  ;;  %v12419_v25 = vand.u32 3, %v7121_v29  ;;  %v7128_v18 = vshra.s32 %v14613_v5, 4  ;;  %vm12564_vm1 = vmand %vm12438_vm3, %vm7176_vm8 }
 0x55e   : > { %8882 = vmatprep.subr.bf16.mxu1 %v14525_v4  ;;  %v12364_v4 = vand.u32 3, %v7114_v28  ;;  %v7123_v28 = vshra.s32 %v14604_v63, 4  ;;  %vm12597_vm8 = vmand %vm12463_vm11, %vm7177_vm0 }
 0x560   : > { %vm7178_vm12 = vcmp.eq.s32.totalorder %v12364_v4, 0 }
 0x561   : > { %8883 = vmatpush3.bf16.msra.mxu1 %v9426_v2  ;;  %v14605_v2 = vld [vmem:[#allocation26_spill] sm:$0xff]  ;;  %vm12580_vm3 = vmand %vm12449_vm13, %vm7178_vm12  ;;  %vm7183_vm12 = vcmp.eq.s32.totalorder %v12415_v49, 0 }
 0x5f7   : > { %v8838_v35 = vpop.f32.mrb[0].mxu1 }
 0x5f8   : > { %v12354_v14 = vadd.f32 %v8838_v35, %v12344_v9  ;;  %v6622_v43 = vpop.f32.mrb[1].mxu1  ;;  %v7124_v35 = vshra.s32 %v14605_v2, 4 }
 0x5f9   : > { %v12362_v55 = vadd.f32 %v12344_v9, %v6622_v43  ;;  %v8839_v30 = vpop.f32.mrb[2].mxu1 }
 0x5fa   : > { %v13696_v3 = vmax.f32 %v12354_v14, 0.0  ;;  %v12370_v50 = vadd.f32 %v8839_v30, %v12344_v9  ;;  %v6625_v31 = vpop.f32.mrb[3].mxu1  ;;  %v14626_v12 = vmax.f32 %v12354_v14, 0.0 }
 0x5fb   : > { %v13694_v0 = vmax.f32 %v12362_v55, 0.0  ;;  %v12376_v33 = vadd.f32 %v12344_v9, %v6625_v31  ;;  %v7125_v31 = vshra.s32 %v14606_v56, 4 }
 0x5fc   : > { %6854 = vst.msk [vmem:[#allocation4 + $0x10] sm:$0xff] %vm602_vm15, %v13696_v3  ;;  %v13691_v48 = vmax.f32 %v12370_v50, 0.0  ;;  %v12494_v3 = vand.u32 3, %v7128_v18 }
 0x5fd   : > { %6852 = vst.msk [vmem:[#allocation4] sm:$0xff] %vm602_vm15, %v13694_v0  ;;  %v13693_v22 = vmax.f32 %v12376_v33, 0.0  ;;  %v12478_v34 = vand.u32 3, %v7125_v31  ;;  %v14621_v0 = vand.u32 3, %v14596_v53 }
 0x5fe   : > { %6855 = vst.msk [vmem:[#allocation4 + $0x18] sm:$0xff] %vm602_vm15, %v13691_v48  ;;  %v14617_v48 = vld [vmem:[#allocation29_spill] sm:$0xff]  ;;  %14619 = vst [vmem:[#allocation99_spill] sm:$0xff] %v12494_v3 }
 0x5ff   : > { %6853 = vst.msk [vmem:[#allocation4 + $0x8] sm:$0xff] %vm602_vm15, %v13693_v22  ;;  %v8842_v15 = vpop.f32.mrb[4].mxu1  ;;  %v7130_v26 = vshra.s32 %v14617_v48, 4  ;;  %v12476_v22 = vand.u32 3, %v7124_v35  ;;  %vm12503_vm4 = vcmp.eq.s32.totalorder %v14621_v0, 0 }
 0x600   : > { %v12413_v52 = vadd.f32 %v8842_v15, %v12344_v9  ;;  %v6638_v8 = vpop.f32.mrb[5].mxu1  ;;  %vm12641_vm11 = vmand %vm12503_vm4, %vm7179_vm2 }
 0x601   : > { %v12422_v54 = vadd.f32 %v12344_v9, %v6638_v8  ;;  %v8843_v11 = vpop.f32.mrb[6].mxu1  ;;  %vm12664_vm4 = vmand %vm12520_vm14, %vm7182_vm7 }
 0x602   : > { %v13690_v43 = vmax.f32 %v12413_v52, 0.0  ;;  %v12430_v30 = vadd.f32 %v8843_v11, %v12344_v9  ;;  %v6641_v61 = vpop.f32.mrb[7].mxu1 }
 0x603   : > { %v13692_v39 = vmax.f32 %v12422_v54, 0.0  ;;  %v12436_v13 = vadd.f32 %v12344_v9, %v6641_v61  ;;  %v7127_v61 = vshra.s32 %v14612_v45, 4 }
 0x604   : > { %6858 = vst.msk [vmem:[#allocation4 + $0x30] sm:$0xff] %vm602_vm15, %v13690_v43  ;;  %v13695_v8 = vmax.f32 %v12430_v30, 0.0 }
 0x605   : > { %6856 = vst.msk [vmem:[#allocation4 + $0x20] sm:$0xff] %vm602_vm15, %v13692_v39  ;;  %v13697_v15 = vmax.f32 %v12436_v13, 0.0  ;;  %v12474_v39 = vand.u32 3, %v7123_v28  ;;  %v6886_v32 = vld [vmem:[#allocation4 + $0x12] sm:$0xff]  ;;  %v12492_v60 = vand.u32 3, %v7127_v61 }
 0x606   : > { %6859 = vst.msk [vmem:[#allocation4 + $0x38] sm:$0xff] %vm602_vm15, %v13695_v8  ;;  %v6884_v35 = vld [vmem:[#allocation4 + $0x2] sm:$0xff]  ;;  %v14625_v61 = vld [vmem:[#allocation70_spill] sm:$0xff] }
 0x607   : > { %6857 = vst.msk [vmem:[#allocation4 + $0x28] sm:$0xff] %vm602_vm15, %v13697_v15  ;;  %v8846_v43 = vpop.f32.mrb[8].mxu1  ;;  %14618 = vst [vmem:[#allocation5_spill] sm:$0xff] %v12492_v60  ;;  %v12496_v15 = vand.u32 3, %v7129_v6  ;;  %v7131_v18 = vshra.s32 %v14625_v61, 4  ;;  %v6885_v6 = vld [vmem:[#allocation4 + $0xa] sm:$0xff] }
 0x608   : > { %v12490_v31 = vadd.f32 %v8846_v43, %v12344_v9  ;;  %v6654_v42 = vpop.f32.mrb[9].mxu1  ;;  %v12508_v43 = vand.u32 3, %v7130_v26  ;;  %v14630_v26 = vld [vmem:[#allocation30_spill] sm:$0xff]  ;;  %v14631_v61 = vmax.f32 %v12362_v55, 0.0  ;;  %v14634_v55 = vand.u32 3, %v14597_v38 }
 0x609   : > { %14620 = vst [vmem:[#allocation108_spill] sm:$0xff] %v12496_v15  ;;  %v12499_v27 = vadd.f32 %v12344_v9, %v6654_v42  ;;  %v8847_v7 = vpop.f32.mrb[10].mxu1  ;;  %v6918_v42 = vmax.f32 %v14626_v12, %v6886_v32  ;;  %v7132_v28 = vshra.s32 %v14630_v26, 4 }
 0x60a   : > { %14624 = vst [vmem:[#allocation71_spill] sm:$0xff] %v12508_v43  ;;  %v12516_v53 = vadd.f32 %v8847_v7, %v12344_v9  ;;  %v6657_v0 = vpop.f32.mrb[11].mxu1  ;;  %v6916_v14 = vmax.f32 %v14631_v61, %v6884_v35  ;;  %v7133_v43 = vshra.s32 %v14632_v37, 4  ;;  %v14633_v15 = vmax.f32 %v12490_v31, 0.0 }
 0x60b   : > { %v6950_v12 = vld [vmem:[#allocation4 + $0x30] sm:$0xff]  ;;  %v12530_v7 = vadd.f32 %v12344_v9, %v6657_v0  ;;  %vm12539_vm6 = vcmp.eq.s32.totalorder %v14634_v55, 0  ;;  %v14637_v0 = vld [vmem:[#allocation31_spill] sm:$0xff]  ;;  %v14639_v36 = vmax.f32 %v12499_v27, 0.0  ;;  %v14640_v55 = vand.u32 3, %v14598_v59 }
 0x60c   : > { %v6948_v41 = vld [vmem:[#allocation4 + $0x20] sm:$0xff]  ;;  %v6982_v20 = vmax.f32 %v6918_v42, %v6950_v12  ;;  %6862 = vst.msk [vmem:[#allocation4 + $0x50] sm:$0xff] %vm602_vm15, %v14633_v15  ;;  %v7134_v32 = vshra.s32 %v14637_v0, 4  ;;  %v14638_v42 = vmax.f32 %v12376_v33, 0.0  ;;  %v14645_v59 = vmax.f32 %v12516_v53, 0.0 }
 0x60d   : > { %v6887_v3 = vld [vmem:[#allocation4 + $0x1a] sm:$0xff]  ;;  %v6890_v5 = vld [vmem:[#allocation4 + $0x32] sm:$0xff]  ;;  %v6980_v15 = vmax.f32 %v6916_v14, %v6948_v41  ;;  %6860 = vst.msk [vmem:[#allocation4 + $0x40] sm:$0xff] %vm602_vm15, %v14639_v36  ;;  %vm12554_vm10 = vcmp.eq.s32.totalorder %v14640_v55, 0  ;;  %v12572_v41 = vand.u32 3, %v7131_v18  ;;  %v12574_v55 = vand.u32 3, %v7132_v28 }
 0x60e   : > { %v6917_v12 = vmax.f32 %v14638_v42, %v6885_v6  ;;  %v6888_v33 = vld [vmem:[#allocation4 + $0x22] sm:$0xff]  ;;  %v7018_v42 = vmax.f32 %v6982_v20, %v6890_v5  ;;  %6863 = vst.msk [vmem:[#allocation4 + $0x58] sm:$0xff] %vm602_vm15, %v14645_v59  ;;  %v6889_v61 = vld [vmem:[#allocation4 + $0x2a] sm:$0xff]  ;;  %v14648_v29 = vmax.f32 %v12530_v7, 0.0  ;;  %v14649_v18 = vmax.f32 %v12370_v50, 0.0  ;;  %v6951_v11 = vld [vmem:[#allocation4 + $0x38] sm:$0xff] }
 0x60f   : > { %v6949_v6 = vld [vmem:[#allocation4 + $0x28] sm:$0xff]  ;;  %v7016_v38 = vmax.f32 %v6980_v15, %v6888_v33  ;;  %v8850_v28 = vpop.f32.mrb[12].mxu1  ;;  %v12589_v14 = vand.u32 3, %v7133_v43  ;;  %v14653_v43 = vld [vmem:[#allocation78_spill] sm:$0xff]  ;;  %v14655_v0 = vand.u32 3, %v14600_v40  ;;  %vm12714_vm7 = vmand %vm12554_vm10, %vm7181_vm9  ;;  %vm7188_vm9 = vcmp.eq.s32.totalorder %v12476_v22, 0 }
 0x610   : > { %v6981_v20 = vmax.f32 %v6917_v12, %v6949_v6  ;;  %6861 = vst.msk [vmem:[#allocation4 + $0x48] sm:$0xff] %vm602_vm15, %v14648_v29  ;;  %v6919_v59 = vmax.f32 %v14649_v18, %v6887_v3  ;;  %v14650_v12 = vmax.f32 %v12413_v52, 0.0  ;;  %v12602_v6 = vadd.f32 %v8850_v28, %v12344_v9  ;;  %v6670_v50 = vpop.f32.mrb[13].mxu1 }
 0x611   : > { %v12604_v3 = vand.u32 3, %v7134_v32  ;;  %v14654_v52 = vmax.f32 %v12422_v54, 0.0  ;;  %v7304_v62 = vsel %vm12564_vm1, %v7016_v38, 0.0  ;;  %v12612_v44 = vadd.f32 %v12344_v9, %v6670_v50 }
 0x612   : > { %v6922_v15 = vmax.f32 %v14650_v12, %v6890_v5  ;;  %v7017_v18 = vmax.f32 %v6981_v20, %v6889_v61  ;;  %v8851_v12 = vpop.f32.mrb[14].mxu1  ;;  %vm12616_vm13 = vcmp.eq.s32.totalorder %v14655_v0, 0  ;;  %v14658_v32 = vmax.f32 %v12436_v13, 0.0 }
 0x613   : > { %v6920_v5 = vmax.f32 %v14654_v52, %v6888_v33  ;;  %v7306_v33 = vsel %vm12580_vm3, %v7018_v42, 0.0  ;;  %v6834_v38 = vmax.f32 %v12602_v6, 0.0  ;;  %v12627_v36 = vadd.f32 %v8851_v12, %v12344_v9  ;;  %v6673_v20 = vpop.f32.mrb[15].mxu1  ;;  %v6954_v0 = vld [vmem:[#allocation4 + $0x50] sm:$0xff] }
 0x614   : > { %v6921_v54 = vmax.f32 %v14658_v32, %v6889_v61  ;;  %v7305_v40 = vsel %vm12597_vm8, %v7017_v18, 0.0  ;;  %v6983_v50 = vmax.f32 %v6919_v59, %v6951_v11  ;;  %v6832_v52 = vmax.f32 %v12612_v44, 0.0  ;;  %v6891_v42 = vld [vmem:[#allocation4 + $0x3a] sm:$0xff]  ;;  %vm12701_vm8 = vmand %vm12539_vm6, %vm7180_vm5 }
 0x615   : > { %v12633_v29 = vadd.f32 %v12344_v9, %v6673_v20  ;;  %v7336_v13 = vsel %vm602_vm15, %v7304_v62, 0.0  ;;  %v7337_v61 = vsel %vm602_vm15, %v7305_v40, 0.0  ;;  %v6952_v17 = vld [vmem:[#allocation4 + $0x40] sm:$0xff]  ;;  %v6986_v32 = vmax.f32 %v6922_v15, %v6954_v0  ;;  %6866 = vst.msk [vmem:[#allocation4 + $0x70] sm:$0xff] %vm602_vm15, %v6834_v38  ;;  %v6894_v8 = vld [vmem:[#allocation4 + $0x52] sm:$0xff] }
 0x616   : > { %v13707_v59 = vmax.f32 %v12627_v36, 0.0  ;;  %v14661_v11 = vand.u32 3, %v14601_v57  ;;  %vm7184_vm1 = vcmp.eq.s32.totalorder %v12417_v58, 0  ;;  %v7338_v10 = vadd.f32 %v7337_v61, %v7336_v13  ;;  %6864 = vst.msk [vmem:[#allocation4 + $0x60] sm:$0xff] %vm602_vm15, %v6832_v52  ;;  %v6955_v13 = vld [vmem:[#allocation4 + $0x58] sm:$0xff] }
 0x617   : > { %v14664_v15 = vmax.f32 %v12430_v30, 0.0  ;;  %v6984_v12 = vmax.f32 %v6920_v5, %v6952_v17  ;;  %v7019_v20 = vmax.f32 %v6983_v50, %v6891_v42  ;;  %v14667_v40 = vand.u32 3, %v14602_v24  ;;  %v6892_v5 = vld [vmem:[#allocation4 + $0x42] sm:$0xff] }
 0x618   : > { %vm12651_vm0 = vcmp.eq.s32.totalorder %v14661_v11, 0  ;;  %vm7185_vm3 = vcmp.eq.s32.totalorder %v12419_v25, 0  ;;  %v7339_v47 = vsel %vm602_vm15, %v7306_v33, 0.0  ;;  %v6953_v48 = vld [vmem:[#allocation4 + $0x48] sm:$0xff]  ;;  %v12679_v0 = vmax.f32 %v6986_v32, %v6894_v8  ;;  %6867 = vst.msk [vmem:[#allocation4 + $0x78] sm:$0xff] %vm602_vm15, %v13707_v59  ;;  %v14673_v33 = vld [vmem:[#allocation86_spill] sm:$0xff] }
 0x619   : > { %v12658_v62 = vmax.f32 %v14664_v15, %v6891_v42  ;;  %vm12673_vm2 = vcmp.eq.s32.totalorder %v14667_v40, 0  ;;  %v6833_v50 = vmax.f32 %v12633_v29, 0.0  ;;  %v14670_v24 = vand.u32 3, %v14603_v19  ;;  %v8854_v40 = vpop.f32.mrb[16].mxu1  ;;  %v6893_v59 = vld [vmem:[#allocation4 + $0x4a] sm:$0xff] }
 0x61a   : > { %v7340_v17 = vadd.f32 %v7339_v47, %v7338_v10  ;;  %v14674_v32 = vmax.f32 %v12490_v31, 0.0  ;;  %v6985_v15 = vmax.f32 %v6921_v54, %v6953_v48  ;;  %v14677_v42 = vmax.f32 %v12499_v27, 0.0  ;;  %v6686_v27 = vpop.f32.mrb[17].mxu1 }
 0x61b   : > { %vm12687_vm14 = vcmp.eq.s32.totalorder %v14670_v24, 0  ;;  %v7020_v31 = vmax.f32 %v6984_v12, %v6892_v5  ;;  %v7307_v35 = vsel %vm12641_vm11, %v7019_v20, 0.0  ;;  %v7310_v54 = vsel %vm12664_vm4, %v12679_v0, 0.0  ;;  %6865 = vst.msk [vmem:[#allocation4 + $0x68] sm:$0xff] %vm602_vm15, %v6833_v50  ;;  %v8855_v47 = vpop.f32.mrb[18].mxu1  ;;  %vm12766_vm11 = vmand %vm12616_vm13, %vm7183_vm12 }
 0x61c   : > { %v12695_v11 = vmax.f32 %v14674_v32, %v6894_v8  ;;  %v12708_v10 = vmax.f32 %v14677_v42, %v6892_v5  ;;  %v7021_v8 = vmax.f32 %v6985_v15, %v6893_v59  ;;  %v7341_v21 = vsel %vm602_vm15, %v7307_v35, 0.0  ;;  %v6689_v48 = vpop.f32.mrb[19].mxu1 }
 0x61d   : > { %v6987_v60 = vmax.f32 %v12658_v62, %v6955_v13  ;;  %v12729_v12 = vadd.f32 %v8854_v40, %v12344_v9  ;;  %v7308_v4 = vsel %vm12701_vm8, %v7020_v31, 0.0  ;;  %v7342_v20 = vadd.f32 %v7341_v21, %v7340_v17  ;;  %v6958_v17 = vld [vmem:[#allocation4 + $0x70] sm:$0xff]  ;;  %v6895_v16 = vld [vmem:[#allocation4 + $0x5a] sm:$0xff]  ;;  %vm12806_vm8 = vmand %vm12651_vm0, %vm7184_vm1 }
 0x61e   : > { %v12734_v57 = vadd.f32 %v12344_v9, %v6686_v27  ;;  %v12737_v5 = vadd.f32 %v8855_v47, %v12344_v9  ;;  %v14680_v0 = vand.u32 3, %v14604_v63  ;;  %vm7187_vm5 = vcmp.eq.s32.totalorder %v12474_v39, 0  ;;  %v6956_v35 = vld [vmem:[#allocation4 + $0x60] sm:$0xff]  ;;  %vm12822_vm0 = vmand %vm12673_vm2, %vm7185_vm3 }
 0x61f   : > { %v7309_v62 = vsel %vm12714_vm7, %v7021_v8, 0.0  ;;  %v7343_v13 = vsel %vm602_vm15, %v7308_v4, 0.0  ;;  %v6838_v32 = vmax.f32 %v12729_v12, 0.0  ;;  %v12751_v15 = vadd.f32 %v12344_v9, %v6689_v48  ;;  %v6898_v4 = vld [vmem:[#allocation4 + $0x72] sm:$0xff] }
 0x620   : > { %vm12741_vm6 = vcmp.eq.s32.totalorder %v14680_v0, 0  ;;  %v14683_v19 = vand.u32 3, %v14605_v2  ;;  %v7344_v40 = vadd.f32 %v7343_v13, %v7342_v20  ;;  %v7345_v31 = vsel %vm602_vm15, %v7309_v62, 0.0  ;;  %v6959_v13 = vld [vmem:[#allocation4 + $0x78] sm:$0xff] }
 0x621   : > { %v6990_v27 = vmax.f32 %v12695_v11, %v6958_v17  ;;  %v6836_v2 = vmax.f32 %v12734_v57, 0.0  ;;  %v14688_v21 = vand.u32 3, %v14607_v46  ;;  %vm7190_vm7 = vcmp.eq.s32.totalorder %v12480_v23, 0  ;;  %6870 = vst.msk [vmem:[#allocation4 + $0x90] sm:$0xff] %vm602_vm15, %v6838_v32 }
 0x622   : > { %vm12755_vm10 = vcmp.eq.s32.totalorder %v14683_v19, 0  ;;  %v14691_v11 = vmax.f32 %v12516_v53, 0.0  ;;  %v6988_v28 = vmax.f32 %v12708_v10, %v6956_v35  ;;  %v7023_v20 = vmax.f32 %v6987_v60, %v6895_v16  ;;  %v6957_v19 = vld [vmem:[#allocation4 + $0x68] sm:$0xff] }
 0x623   : > { %vm12773_vm4 = vcmp.eq.s32.totalorder %v14688_v21, 0  ;;  %v6839_v46 = vmax.f32 %v12737_v5, 0.0  ;;  %v14692_v48 = vmax.f32 %v12530_v7, 0.0  ;;  %v7346_v62 = vadd.f32 %v7345_v31, %v7344_v40  ;;  %6868 = vst.msk [vmem:[#allocation4 + $0x80] sm:$0xff] %vm602_vm15, %v6836_v2  ;;  %v8858_v31 = vpop.f32.mrb[20].mxu1 }
 0x624   : > { %v12780_v49 = vmax.f32 %v14691_v11, %v6895_v16  ;;  %v6837_v53 = vmax.f32 %v12751_v15, 0.0  ;;  %v14693_v10 = vand.u32 3, %v14606_v56  ;;  %vm7189_vm12 = vcmp.eq.s32.totalorder %v12478_v34, 0  ;;  %v6702_v21 = vpop.f32.mrb[21].mxu1  ;;  %v6897_v11 = vld [vmem:[#allocation4 + $0x6a] sm:$0xff] }
 0x625   : > { %v6925_v0 = vmax.f32 %v14692_v48, %v6893_v59  ;;  %v7135_v17 = vshra.s32 %v14653_v43, 4  ;;  %v7347_v7 = vsel %vm602_vm15, %v7310_v54, 0.0  ;;  %v6896_v59 = vld [vmem:[#allocation4 + $0x62] sm:$0xff]  ;;  %v7311_v56 = vsel %vm12766_vm11, %v7023_v20, 0.0  ;;  %6871 = vst.msk [vmem:[#allocation4 + $0x98] sm:$0xff] %vm602_vm15, %v6839_v46 }
 0x626   : > { %vm12795_vm13 = vcmp.eq.s32.totalorder %v14693_v10, 0  ;;  %v7139_v54 = vshra.s32 %v14673_v33, 4  ;;  %v7348_v16 = vadd.f32 %v7347_v7, %v7346_v62  ;;  %v6930_v58 = vmax.f32 %v6834_v38, %v6898_v4  ;;  %6869 = vst.msk [vmem:[#allocation4 + $0x88] sm:$0xff] %vm602_vm15, %v6837_v53  ;;  %v14706_v10 = vld [vmem:[#allocation5_spill] sm:$0xff] }
 0x627   : > { %v6989_v35 = vmax.f32 %v6925_v0, %v6957_v19  ;;  %v7026_v18 = vmax.f32 %v6990_v27, %v6898_v4  ;;  %v7024_v20 = vmax.f32 %v6988_v28, %v6896_v59  ;;  %vm14700_vm1 = vcmp.eq.s32.totalorder %v12424_v51, 0  ;;  %v8859_v27 = vpop.f32.mrb[22].mxu1 }
 0x628   : > { %vm12833_vm11 = vmand %vm12687_vm14, %vm14700_vm1  ;;  %v7349_v25 = vsel %vm602_vm15, %v7311_v56, 0.0  ;;  %v6991_v38 = vmax.f32 %v12780_v49, %v6959_v13  ;;  %v12840_v30 = vadd.f32 %v8858_v31, %v12344_v9  ;;  %v6928_v4 = vmax.f32 %v6832_v52, %v6896_v59  ;;  %v6705_v61 = vpop.f32.mrb[23].mxu1  ;;  %v6962_v40 = vld [vmem:[#allocation4 + $0x90] sm:$0xff]  ;;  %v14707_v31 = vld [vmem:[#allocation28_spill] sm:$0xff] }
 0x629   : > { %v7025_v28 = vmax.f32 %v6989_v35, %v6897_v11  ;;  %v7350_v48 = vadd.f32 %v7349_v25, %v7348_v16  ;;  %v12845_v51 = vadd.f32 %v12344_v9, %v6702_v21  ;;  %v7312_v0 = vsel %vm12806_vm8, %v7024_v20, 0.0  ;;  %v14711_v35 = vld [vmem:[#allocation99_spill] sm:$0xff] }
 0x62a   : > { %v6842_v62 = vmax.f32 %v12840_v30, 0.0  ;;  %v12851_v49 = vadd.f32 %v8859_v27, %v12344_v9  ;;  %v12854_v13 = vadd.f32 %v12344_v9, %v6705_v61  ;;  %v14703_v44 = vand.u32 3, %v14612_v45  ;;  %v6899_v20 = vld [vmem:[#allocation4 + $0x7a] sm:$0xff] }
 0x62b   : > { %vm7191_vm3 = vcmp.eq.s32.totalorder %v14706_v10, 0  ;;  %v7313_v7 = vsel %vm12822_vm0, %v7025_v28, 0.0  ;;  %v7314_v59 = vsel %vm12833_vm11, %v7026_v18, 0.0  ;;  %v7351_v19 = vsel %vm602_vm15, %v7312_v0, 0.0  ;;  %v6960_v25 = vld [vmem:[#allocation4 + $0x80] sm:$0xff]  ;;  %vm12881_vm0 = vmand %vm12741_vm6, %vm7187_vm5  ;;  %v14716_v0 = vld [vmem:[#allocation65_spill] sm:$0xff] }
 0x62c   : > { %vm12858_vm2 = vcmp.eq.s32.totalorder %v14703_v44, 0  ;;  %v6840_v56 = vmax.f32 %v12845_v51, 0.0  ;;  %v14708_v16 = vand.u32 3, %v14707_v31  ;;  %vm7192_vm8 = vcmp.eq.s32.totalorder %v14711_v35, 0  ;;  %6874 = vst.msk [vmem:[#allocation4 + $0xb0] sm:$0xff] %vm602_vm15, %v6842_v62  ;;  %vm12895_vm6 = vmand %vm12755_vm10, %vm7188_vm9  ;;  %v14727_v31 = vld [vmem:[#allocation71_spill] sm:$0xff] }
 0x62d   : > { %v7352_v21 = vadd.f32 %v7351_v19, %v7350_v48  ;;  %v7353_v8 = vsel %vm602_vm15, %v7313_v7, 0.0  ;;  %v6994_v6 = vmax.f32 %v6930_v58, %v6962_v40  ;;  %v6843_v27 = vmax.f32 %v12851_v49, 0.0  ;;  %v6902_v48 = vld [vmem:[#allocation4 + $0x92] sm:$0xff]  ;;  %v6900_v63 = vld [vmem:[#allocation4 + $0x82] sm:$0xff]  ;;  %vm12914_vm10 = vmand %vm12773_vm4, %vm7190_vm7 }
 0x62e   : > { %vm12871_vm14 = vcmp.eq.s32.totalorder %v14708_v16, 0  ;;  %v6929_v28 = vmax.f32 %v6833_v50, %v6897_v11  ;;  %v6992_v61 = vmax.f32 %v6928_v4, %v6960_v25  ;;  %v7027_v58 = vmax.f32 %v6991_v38, %v6899_v20  ;;  %6872 = vst.msk [vmem:[#allocation4 + $0xa0] sm:$0xff] %vm602_vm15, %v6840_v56  ;;  %v14720_v11 = vld [vmem:[#allocation108_spill] sm:$0xff]  ;;  %v6961_v38 = vld [vmem:[#allocation4 + $0x88] sm:$0xff]  ;;  %v8862_v16 = vpop.f32.mrb[24].mxu1  ;;  %vm12947_vm4 = vmand %vm12795_vm13, %vm7189_vm12 }
 0x62f   : > { %v6841_v42 = vmax.f32 %v12854_v13, 0.0  ;;  %v14717_v29 = vand.u32 3, %v14716_v0  ;;  %vm7193_vm1 = vcmp.eq.s32.totalorder %v14720_v11, 0  ;;  %v7354_v22 = vadd.f32 %v7353_v8, %v7352_v21  ;;  %6875 = vst.msk [vmem:[#allocation4 + $0xb8] sm:$0xff] %vm602_vm15, %v6843_v27  ;;  %v14723_v7 = vld [vmem:[#allocation29_spill] sm:$0xff]  ;;  %vm12988_vm12 = vmand %vm12858_vm2, %vm7191_vm3  ;;  %v14742_v35 = vld [vmem:[#allocation32_spill] sm:$0xff] }
 0x630   : > { %v7030_v4 = vmax.f32 %v6994_v6, %v6902_v48  ;;  %v14724_v19 = vand.u32 3, %v14723_v7  ;;  %vm7194_vm11 = vcmp.eq.s32.totalorder %v14727_v31, 0  ;;  %v7143_v23 = vshra.s32 %v14430_v1, 4  ;;  %v14763_v13 = vld [vmem:[#allocation35_spill] sm:$0xff] }
 0x631   : > { %vm12905_vm5 = vcmp.eq.s32.totalorder %v14717_v29, 0  ;;  %v12931_v47 = vand.u32 3, %v7135_v17  ;;  %v7355_v21 = vsel %vm602_vm15, %v7314_v59, 0.0  ;;  %v14728_v8 = vmax.f32 %v12627_v36, 0.0  ;;  %6873 = vst.msk [vmem:[#allocation4 + $0xa8] sm:$0xff] %vm602_vm15, %v6841_v42  ;;  %v6718_v29 = vpop.f32.mrb[25].mxu1 }
 0x632   : > { %vm12923_vm9 = vcmp.eq.s32.totalorder %v14724_v19, 0  ;;  %v6993_v6 = vmax.f32 %v6929_v28, %v6961_v38  ;;  %v7028_v0 = vmax.f32 %v6992_v61, %v6900_v63  ;;  %v7356_v7 = vadd.f32 %v7355_v21, %v7354_v22  ;;  %v6901_v19 = vld [vmem:[#allocation4 + $0x8a] sm:$0xff]  ;;  %v8863_v28 = vpop.f32.mrb[26].mxu1 }
 0x633   : > { %v6931_v25 = vmax.f32 %v14728_v8, %v6899_v20  ;;  %v6932_v24 = vmax.f32 %v6836_v2, %v6900_v63  ;;  %v6934_v17 = vmax.f32 %v6838_v32, %v6902_v48  ;;  %v7315_v59 = vsel %vm12881_vm0, %v7027_v58, 0.0  ;;  %v6963_v20 = vld [vmem:[#allocation4 + $0x98] sm:$0xff]  ;;  %v6721_v32 = vpop.f32.mrb[27].mxu1  ;;  %v6966_v39 = vld [vmem:[#allocation4 + $0xb0] sm:$0xff]  ;;  %vm12997_vm0 = vmand %vm12871_vm14, %vm7192_vm8 }
 0x634   : > { %v7029_v61 = vmax.f32 %v6993_v6, %v6901_v19  ;;  %v7316_v57 = vsel %vm12895_vm6, %v7028_v0, 0.0  ;;  %v7318_v12 = vsel %vm12914_vm10, %v7030_v4, 0.0  ;;  %v7357_v34 = vsel %vm602_vm15, %v7315_v59, 0.0  ;;  %v14731_v4 = vld [vmem:[#allocation70_spill] sm:$0xff]  ;;  %v8866_v10 = vpop.f32.mrb[28].mxu1  ;;  %vm13034_vm6 = vmand %vm12905_vm5, %vm7193_vm1 }
 0x635   : > { %v7358_v2 = vadd.f32 %v7357_v34, %v7356_v7  ;;  %v7359_v60 = vsel %vm602_vm15, %v7316_v57, 0.0  ;;  %v12960_v48 = vadd.f32 %v8862_v16, %v12344_v9  ;;  %v12963_v18 = vadd.f32 %v12344_v9, %v6718_v29  ;;  %v6903_v6 = vld [vmem:[#allocation4 + $0x9a] sm:$0xff]  ;;  %vm13057_vm1 = vmand %vm12923_vm9, %vm7194_vm11 }
 0x636   : > { %v7317_v58 = vsel %vm12947_vm4, %v7029_v61, 0.0  ;;  %v6995_v22 = vmax.f32 %v6931_v25, %v6963_v20  ;;  %v12968_v63 = vadd.f32 %v8863_v28, %v12344_v9  ;;  %v12971_v38 = vadd.f32 %v12344_v9, %v6721_v32  ;;  %v6964_v0 = vld [vmem:[#allocation4 + $0xa0] sm:$0xff]  ;;  %v6906_v36 = vld [vmem:[#allocation4 + $0xb2] sm:$0xff] }
 0x637   : > { %v14732_v44 = vand.u32 3, %v14731_v4  ;;  %vm7195_vm13 = vcmp.eq.s32.totalorder %v12572_v41, 0  ;;  %v7360_v16 = vadd.f32 %v7359_v60, %v7358_v2  ;;  %v7361_v8 = vsel %vm602_vm15, %v7317_v58, 0.0  ;;  %v6967_v40 = vld [vmem:[#allocation4 + $0xb8] sm:$0xff] }
 0x638   : > { %v6998_v25 = vmax.f32 %v6934_v17, %v6966_v39  ;;  %v6846_v29 = vmax.f32 %v12960_v48, 0.0  ;;  %v6933_v7 = vmax.f32 %v6837_v53, %v6901_v19  ;;  %v6996_v59 = vmax.f32 %v6932_v24, %v6964_v0  ;;  %v6904_v17 = vld [vmem:[#allocation4 + $0xa2] sm:$0xff] }
 0x639   : > { %vm12975_vm7 = vcmp.eq.s32.totalorder %v14732_v44, 0  ;;  %v7031_v20 = vmax.f32 %v6995_v22, %v6903_v6  ;;  %v6844_v61 = vmax.f32 %v12963_v18, 0.0  ;;  %v7362_v57 = vadd.f32 %v7361_v8, %v7360_v16  ;;  %v6965_v34 = vld [vmem:[#allocation4 + $0xa8] sm:$0xff]  ;;  %v14748_v44 = vld [vmem:[#allocation31_spill] sm:$0xff] }
 0x63a   : > { %6878 = vst.msk [vmem:[#allocation4 + $0xd0] sm:$0xff] %vm602_vm15, %v6846_v29  ;;  %v6847_v15 = vmax.f32 %v12968_v63, 0.0  ;;  %v14739_v53 = vand.u32 3, %v14630_v26  ;;  %vm7196_vm3 = vcmp.eq.s32.totalorder %v12574_v55, 0  ;;  %v13014_v45 = vand.u32 3, %v7139_v54  ;;  %v6734_v54 = vpop.f32.mrb[29].mxu1  ;;  %vm13095_vm9 = vmand %vm12975_vm7, %vm7195_vm13 }
 0x63b   : > { %v7136_v19 = vshra.s32 %v14742_v35, 4  ;;  %v7363_v32 = vsel %vm602_vm15, %v7318_v12, 0.0  ;;  %v6935_v2 = vmax.f32 %v6839_v46, %v6903_v6  ;;  %v6997_v60 = vmax.f32 %v6933_v7, %v6965_v34  ;;  %6876 = vst.msk [vmem:[#allocation4 + $0xc0] sm:$0xff] %vm602_vm15, %v6844_v61  ;;  %v6905_v12 = vld [vmem:[#allocation4 + $0xaa] sm:$0xff]  ;;  %v8867_v50 = vpop.f32.mrb[30].mxu1 }
 0x63c   : > { %vm13007_vm2 = vcmp.eq.s32.totalorder %v14739_v53, 0  ;;  %v7032_v26 = vmax.f32 %v6996_v59, %v6904_v17  ;;  %v14743_v58 = vand.u32 3, %v14632_v37  ;;  %vm7197_vm8 = vcmp.eq.s32.totalorder %v12589_v14, 0  ;;  %6879 = vst.msk [vmem:[#allocation4 + $0xd8] sm:$0xff] %vm602_vm15, %v6847_v15  ;;  %v6737_v59 = vpop.f32.mrb[31].mxu1  ;;  %v14768_v39 = vld [vmem:[#allocation89_spill] sm:$0xff] }
 0x63d   : > { %v7364_v22 = vadd.f32 %v7363_v32, %v7362_v57  ;;  %v7034_v4 = vmax.f32 %v6998_v25, %v6906_v36  ;;  %v7319_v37 = vsel %vm12988_vm12, %v7031_v20, 0.0  ;;  %v6845_v46 = vmax.f32 %v12971_v38, 0.0  ;;  %vm13129_vm7 = vmand %vm13007_vm2, %vm7196_vm3  ;;  %v14782_v55 = vld [vmem:[#allocation37_spill] sm:$0xff] }
 0x63e   : > { %vm13025_vm14 = vcmp.eq.s32.totalorder %v14743_v58, 0  ;;  %v14749_v16 = vand.u32 3, %v14748_v44  ;;  %vm7198_vm5 = vcmp.eq.s32.totalorder %v12604_v3, 0  ;;  %v6938_v11 = vmax.f32 %v6842_v62, %v6906_v36 }
 0x63f   : > { %v7033_v6 = vmax.f32 %v6997_v60, %v6905_v12  ;;  %v7320_v25 = vsel %vm12997_vm0, %v7032_v26, 0.0  ;;  %v7365_v7 = vsel %vm602_vm15, %v7319_v37, 0.0  ;;  %v6936_v20 = vmax.f32 %v6840_v56, %v6904_v17  ;;  %6877 = vst.msk [vmem:[#allocation4 + $0xc8] sm:$0xff] %vm602_vm15, %v6845_v46  ;;  %vm13143_vm13 = vmand %vm13025_vm14, %vm7197_vm8 }
 0x640   : > { %vm13046_vm10 = vcmp.eq.s32.totalorder %v14749_v16, 0  ;;  %v7366_v30 = vadd.f32 %v7365_v7, %v7364_v22  ;;  %v7367_v62 = vsel %vm602_vm15, %v7320_v25, 0.0  ;;  %v13071_v31 = vadd.f32 %v8866_v10, %v12344_v9  ;;  %v14760_v25 = vld [vmem:[#allocation33_spill] sm:$0xff] }
 0x641   : > { %v7321_v36 = vsel %vm13034_vm6, %v7033_v6, 0.0  ;;  %v13076_v28 = vadd.f32 %v12344_v9, %v6734_v54  ;;  %v13079_v51 = vadd.f32 %v8867_v50, %v12344_v9  ;;  %v13082_v56 = vadd.f32 %v12344_v9, %v6737_v59  ;;  %v6970_v53 = vld [vmem:[#allocation4 + $0xd0] sm:$0xff]  ;;  %vm13153_vm12 = vmand %vm13046_vm10, %vm7198_vm5 }
 0x642   : > { %v7322_v57 = vsel %vm13057_vm1, %v7034_v4, 0.0  ;;  %v7368_v17 = vadd.f32 %v7367_v62, %v7366_v30  ;;  %v7369_v34 = vsel %vm602_vm15, %v7321_v36, 0.0  ;;  %v6850_v24 = vmax.f32 %v13071_v31, 0.0  ;;  %v6907_v54 = vld [vmem:[#allocation4 + $0xba] sm:$0xff] }
 0x643   : > { %v6999_v10 = vmax.f32 %v6935_v2, %v6967_v40  ;;  %v6848_v32 = vmax.f32 %v13076_v28, 0.0  ;;  %v6851_v60 = vmax.f32 %v13079_v51, 0.0  ;;  %v6849_v26 = vmax.f32 %v13082_v56, 0.0  ;;  %v6968_v9 = vld [vmem:[#allocation4 + $0xc0] sm:$0xff]  ;;  %v6910_v37 = vld [vmem:[#allocation4 + $0xd2] sm:$0xff] }
 0x644   : > { %v7370_v58 = vadd.f32 %v7369_v34, %v7368_v17  ;;  %v7002_v22 = vmax.f32 %v6938_v11, %v6970_v53  ;;  %6882 = vst.msk [vmem:[#allocation4 + $0xf0] sm:$0xff] %vm602_vm15, %v6850_v24  ;;  %v14756_v2 = vand.u32 3, %v14653_v43  ;;  %vm7199_vm4 = vcmp.eq.s32.totalorder %v12931_v47, 0  ;;  %v14759_v43 = vld [vmem:[#allocation81_spill] sm:$0xff]  ;;  %v6979_v51 = vld [vmem:[#allocation4 + $0x118] sm:$0xff] }
 0x645   : > { %v7072_v41 = vand.u32 3, %v14742_v35  ;;  %v7371_v21 = vsel %vm602_vm15, %v7322_v57, 0.0  ;;  %v7000_v44 = vmax.f32 %v6936_v20, %v6968_v9  ;;  %v7035_v16 = vmax.f32 %v6999_v10, %v6907_v54  ;;  %6880 = vst.msk [vmem:[#allocation4 + $0xe0] sm:$0xff] %vm602_vm15, %v6848_v32  ;;  %6883 = vst.msk [vmem:[#allocation4 + $0xf8] sm:$0xff] %vm602_vm15, %v6851_v60  ;;  %v6977_v10 = vld [vmem:[#allocation4 + $0x108] sm:$0xff] }
 0x646   : > { %vm13104_vm11 = vcmp.eq.s32.totalorder %v14756_v2, 0  ;;  %6881 = vst.msk [vmem:[#allocation4 + $0xe8] sm:$0xff] %vm602_vm15, %v6849_v26  ;;  %v7137_v50 = vshra.s32 %v14759_v43, 4  ;;  %v6937_v11 = vmax.f32 %v6841_v42, %v6905_v12  ;;  %v7372_v6 = vadd.f32 %v7371_v21, %v7370_v58  ;;  %v6908_v59 = vld [vmem:[#allocation4 + $0xc2] sm:$0xff]  ;;  %v6909_v34 = vld [vmem:[#allocation4 + $0xca] sm:$0xff] }
 0x647   : > { %v7073_v0 = vand.u32 3, %v14759_v43  ;;  %v7074_v7 = vand.u32 3, %v14760_v25  ;;  %v6969_v20 = vld [vmem:[#allocation4 + $0xc8] sm:$0xff]  ;;  %v7323_v62 = vsel %vm13095_vm9, %v7035_v16, 0.0  ;;  %v7076_v42 = vand.u32 3, %v14763_v13  ;;  %vm13196_vm10 = vmand %vm13104_vm11, %vm7199_vm4 }
 0x648   : > { %v7138_v12 = vshra.s32 %v14760_v25, 4  ;;  %v7168_v40 = vand.u32 3, %v7136_v19  ;;  %v7001_v36 = vmax.f32 %v6937_v11, %v6969_v20  ;;  %v7036_v57 = vmax.f32 %v7000_v44, %v6908_v59  ;;  %v6971_v19 = vld [vmem:[#allocation4 + $0xd8] sm:$0xff] }
 0x649   : > { %v7038_v17 = vmax.f32 %v7002_v22, %v6910_v37  ;;  %v6939_v52 = vmax.f32 %v6843_v27, %v6907_v54  ;;  %v7373_v14 = vsel %vm602_vm15, %v7323_v62, 0.0  ;;  %v7077_v53 = vand.u32 3, %v14768_v39 }
 0x64a   : > { %vm13159_vm0 = vcmp.eq.s32.totalorder %v7072_v41, 0  ;;  %v7169_v49 = vand.u32 3, %v7137_v50  ;;  %v7037_v27 = vmax.f32 %v7001_v36, %v6909_v34  ;;  %v7324_v3 = vsel %vm13129_vm7, %v7036_v57, 0.0 }
 0x64b   : > { %v7374_v58 = vadd.f32 %v7373_v14, %v7372_v6  ;;  %vm13165_vm2 = vcmp.eq.s32.totalorder %v7073_v0, 0  ;;  %v7375_v54 = vsel %vm602_vm15, %v7324_v3, 0.0  ;;  %v7140_v9 = vshra.s32 %v14763_v13, 4  ;;  %v6974_v25 = vld [vmem:[#allocation4 + $0xf0] sm:$0xff] }
 0x64c   : > { %v7170_v22 = vand.u32 3, %v7138_v12  ;;  %vm7200_vm3 = vcmp.eq.s32.totalorder %v7168_v40, 0  ;;  %v7325_v4 = vsel %vm13143_vm13, %v7037_v27, 0.0  ;;  %v7326_v2 = vsel %vm13153_vm12, %v7038_v17, 0.0  ;;  %v6911_v21 = vld [vmem:[#allocation4 + $0xda] sm:$0xff]  ;;  %v6914_v57 = vld [vmem:[#allocation4 + $0xf2] sm:$0xff] }
 0x64d   : > { %v7376_v41 = vadd.f32 %v7375_v54, %v7374_v58  ;;  %v7003_v44 = vmax.f32 %v6939_v52, %v6971_v19  ;;  %v14773_v16 = vand.u32 3, %v14673_v33  ;;  %vm7203_vm8 = vcmp.eq.s32.totalorder %v13014_v45, 0  ;;  %v6912_v0 = vld [vmem:[#allocation4 + $0xe2] sm:$0xff]  ;;  %v6913_v38 = vld [vmem:[#allocation4 + $0xea] sm:$0xff]  ;;  %vm13210_vm1 = vmand %vm13159_vm0, %vm7200_vm3 }
 0x64e   : > { %v6940_v50 = vmax.f32 %v6844_v61, %v6908_v59  ;;  %v6942_v11 = vmax.f32 %v6846_v29, %v6910_v37  ;;  %v7377_v6 = vsel %vm602_vm15, %v7325_v4, 0.0  ;;  %vm7201_vm6 = vcmp.eq.s32.totalorder %v7169_v49, 0  ;;  %v6972_v12 = vld [vmem:[#allocation4 + $0xe0] sm:$0xff]  ;;  %v6973_v36 = vld [vmem:[#allocation4 + $0xe8] sm:$0xff]  ;;  %v6975_v61 = vld [vmem:[#allocation4 + $0xf8] sm:$0xff] }
 0x64f   : > { %vm13177_vm14 = vcmp.eq.s32.totalorder %v14773_v16, 0  ;;  %v6941_v33 = vmax.f32 %v6845_v46, %v6909_v34  ;;  %v7378_v20 = vadd.f32 %v7377_v6, %v7376_v41  ;;  %v6943_v30 = vmax.f32 %v6847_v15, %v6911_v21  ;;  %vm13218_vm11 = vmand %vm13165_vm2, %vm7201_vm6  ;;  %v6978_v13 = vld [vmem:[#allocation4 + $0x110] sm:$0xff] }
 0x650   : > { %v7039_v62 = vmax.f32 %v7003_v44, %v6911_v21  ;;  %v7379_v18 = vsel %vm602_vm15, %v7326_v2, 0.0  ;;  %v7004_v29 = vmax.f32 %v6940_v50, %v6972_v12  ;;  %vm13200_vm5 = vcmp.eq.s32.totalorder %v7074_v7, 0  ;;  %v6976_v7 = vld [vmem:[#allocation4 + $0x100] sm:$0xff]  ;;  %vm13256_vm12 = vmand %vm13177_vm14, %vm7203_vm8  ;;  %v7013_v16 = vld [vmem:[#allocation4 + $0x10a] sm:$0xff] }
 0x651   : > { %v7141_v63 = vshra.s32 %v14768_v39, 4  ;;  %v7380_v15 = vadd.f32 %v7379_v18, %v7378_v20  ;;  %v6944_v37 = vmax.f32 %v6848_v32, %v6912_v0  ;;  %v7005_v59 = vmax.f32 %v6941_v33, %v6973_v36  ;;  %v6915_v32 = vld [vmem:[#allocation4 + $0xfa] sm:$0xff] }
 0x652   : > { %v7006_v47 = vmax.f32 %v6942_v11, %v6974_v25  ;;  %v7040_v17 = vmax.f32 %v7004_v29, %v6912_v0  ;;  %v7142_v52 = vshra.s32 %v14782_v55, 4  ;;  %v7172_v34 = vand.u32 3, %v7140_v9  ;;  %v7014_v0 = vld [vmem:[#allocation4 + $0x112] sm:$0xff] }
 0x653   : > { %vm7202_vm9 = vcmp.eq.s32.totalorder %v7170_v22, 0  ;;  %v7007_v40 = vmax.f32 %v6943_v30, %v6975_v61  ;;  %v7327_v35 = vsel %vm13196_vm10, %v7039_v62, 0.0  ;;  %v6945_v14 = vmax.f32 %v6849_v26, %v6913_v38  ;;  %v7015_v62 = vld [vmem:[#allocation4 + $0x11a] sm:$0xff] }
 0x654   : > { %v7041_v19 = vmax.f32 %v7005_v59, %v6913_v38  ;;  %v7078_v27 = vand.u32 3, %v14782_v55  ;;  %vm13229_vm4 = vcmp.eq.s32.totalorder %v7076_v42, 0  ;;  %v7173_v3 = vand.u32 3, %v7141_v63  ;;  %v7012_v42 = vld [vmem:[#allocation4 + $0x102] sm:$0xff]  ;;  %vm13244_vm13 = vmand %vm13200_vm5, %vm7202_vm9 }
 0x655   : > { %v7328_v58 = vsel %vm13210_vm1, %v7040_v17, 0.0  ;;  %v6946_v8 = vmax.f32 %v6850_v24, %v6914_v57  ;;  %v7008_v54 = vmax.f32 %v6944_v37, %v6976_v7  ;;  %v7042_v56 = vmax.f32 %v7006_v47, %v6914_v57 }
 0x656   : > { %v7329_v26 = vsel %vm13218_vm11, %v7041_v19, 0.0  ;;  %v6947_v9 = vmax.f32 %v6851_v60, %v6915_v32  ;;  %v7174_v4 = vand.u32 3, %v7142_v52  ;;  %vm7204_vm7 = vcmp.eq.s32.totalorder %v7172_v34, 0 }
 0x657   : > { %v7381_v31 = vsel %vm602_vm15, %v7327_v35, 0.0  ;;  %v7043_v24 = vmax.f32 %v7007_v40, %v6915_v32  ;;  %v7009_v41 = vmax.f32 %v6945_v14, %v6977_v10  ;;  %v7383_v44 = vsel %vm602_vm15, %v7328_v58, 0.0  ;;  %vm13276_vm8 = vmand %vm13229_vm4, %vm7204_vm7 }
 0x658   : > { %v7382_v21 = vadd.f32 %v7381_v31, %v7380_v15  ;;  %v7175_v60 = vand.u32 3, %v7143_v23  ;;  %vm13262_vm0 = vcmp.eq.s32.totalorder %v7077_v53, 0  ;;  %vm7205_vm2 = vcmp.eq.s32.totalorder %v7173_v3, 0 }
 0x659   : > { %v7385_v11 = vsel %vm602_vm15, %v7329_v26, 0.0  ;;  %v7010_v6 = vmax.f32 %v6946_v8, %v6978_v13  ;;  %v7044_v23 = vmax.f32 %v7008_v54, %v7012_v42  ;;  %v7330_v45 = vsel %vm13244_vm13, %v7042_v56, 0.0  ;;  %vm13287_vm10 = vmand %vm13262_vm0, %vm7205_vm2 }
 0x65a   : > { %v7384_v43 = vadd.f32 %v7383_v44, %v7382_v21  ;;  %vm13269_vm3 = vcmp.eq.s32.totalorder %v7078_v27, 0  ;;  %vm7206_vm14 = vcmp.eq.s32.totalorder %v7174_v4, 0  ;;  %v7011_v53 = vmax.f32 %v6947_v9, %v6979_v51  ;;  %v7411_v27 = vld [vmem:[%s13325_s6] sm:$0x1] }
 0x65b   : > { %v7331_v33 = vsel %vm13256_vm12, %v7043_v24, 0.0  ;;  %v7045_v20 = vmax.f32 %v7009_v41, %v7013_v16  ;;  %v14797_v12 = vand.u32 3, %v14430_v1  ;;  %v7387_v18 = vsel %vm602_vm15, %v7330_v45, 0.0  ;;  %vm7238_vm1 = vmand %vm13269_vm3, %vm7206_vm14  ;;  %v7477_v9 = vld [vmem:[%s13327_s8] sm:$0x1] }
 0x65c   : > { %v7386_v30 = vadd.f32 %v7385_v11, %v7384_v43  ;;  %vm7207_vm5 = vcmp.eq.s32.totalorder %v7175_v60, 0  ;;  %v7046_v61 = vmax.f32 %v7010_v6, %v7014_v0  ;;  %v7332_v48 = vsel %vm13276_vm8, %v7044_v23, 0.0 }
 0x65d   : > { %vm7111_vm6 = vcmp.eq.s32.totalorder %v14797_v12, 0  ;;  %v7389_v29 = vsel %vm602_vm15, %v7331_v33, 0.0  ;;  %v7047_v1 = vmax.f32 %v7011_v53, %v7015_v62  ;;  %v7333_v46 = vsel %vm13287_vm10, %v7045_v20, 0.0 }
 0x65e   : > { %v7388_v38 = vadd.f32 %v7387_v18, %v7386_v30  ;;  %vm7239_vm9 = vmand %vm7111_vm6, %vm7207_vm5  ;;  %v7391_v15 = vsel %vm602_vm15, %v7332_v48, 0.0  ;;  %v7334_v37 = vsel %vm7238_vm1, %v7046_v61, 0.0  ;;  %v7393_v47 = vsel %vm602_vm15, %v7333_v46, 0.0 }
 0x65f   : > { %v7335_v5 = vsel %vm7239_vm9, %v7047_v1, 0.0  ;;  %v7395_v7 = vsel %vm602_vm15, %v7334_v37, 0.0  ;;  %vm7502_vm11 = vcmask 523264   ;;  %v14800_v51 = vlaneseq }
 0x660   : > { %v7390_v63 = vadd.f32 %v7389_v29, %v7388_v38  ;;  %v7397_v55 = vsel %vm602_vm15, %v7335_v5, 0.0 }
 0x661   : > { %v7547_v60 = vand.u32 127, %v14800_v51 }
 0x662   : > { %v7392_v59 = vadd.f32 %v7391_v15, %v7390_v63 }
 0x664   : > { %v7394_v57 = vadd.f32 %v7393_v47, %v7392_v59 }
 0x666   : > { %v7396_v17 = vadd.f32 %v7395_v7, %v7394_v57 }
 0x668   : > { %v7398_v52 = vadd.f32 %v7397_v55, %v7396_v17 }
 0x66a   : > { %v7399_v34 = vrot.slane %v7398_v52, 4 }
 0x66c   : > { %v7400_v28 = vadd.f32 %v7399_v34, %v7398_v52 }
 0x66e   : > { %v7401_v32 = vrot.slane %v7400_v28, 2 }
 0x670   : > { %v7402_v40 = vadd.f32 %v7401_v32, %v7400_v28 }
 0x672   : > { %v7403_v35 = vrot.slane %v7402_v40, 1 }
 0x674   : > { %v7404_v14 = vadd.f32 %v7403_v35, %v7402_v40 }
 0x676   : > { %v7405_v19 = vmul.f32 0.0625, %v7404_v14 }
 0x678   : > { %v7406_v10 = vpack.c.bf16 %v7405_v19, %v7405_v19 }
 0x67a   : > { %8873 = vmatmul.mubr.msk.bf16.vlgmr.msra.gmra.mrb[32].mxu0 %vm602_vm15, %v7406_v10  ;;  %vm7553_vm15 = vcmp.lt.s32.totalorder %v7547_v60, 8 }
 0x74d   : > { %v7461_v49 = vpop.f32.mrb[32].mxu0 }
 0x74e   : > { %v7462_v3 = vadd.f32 %v7461_v49, %v7411_v27  ;;  %v8874_v58 = vpop.f32.mrb[33].mxu0 }
 0x74f   : > { %v7464_v8 = vpop.f32.mrb[34].mxu0 }
 0x750   : > { %v7467_v54 = vmax.f32 %v7462_v3, 0.0  ;;  %v8875_v56 = vpop.f32.mrb[35].mxu0 }
 0x752   : > { %v7468_v26 = vpack.c.bf16 %v7467_v54, %v7467_v54 }
 0x754   : > { %8885 = vmatmul.mubr.msk.bf16.vlgmr.msra.gmra.mrb[32].mxu1 %vm7502_vm11, %v7468_v26 }
 0x827   : > { %v7540_v13 = vpop.f32.mrb[32].mxu1 }
 0x828   : > { %v7541_v42 = vadd.f32 %v7540_v13, %v7477_v9  ;;  %v8886_v4 = vpop.f32.mrb[33].mxu1 }
 0x829   : > { %v7543_v2 = vpop.f32.mrb[34].mxu1 }
 0x82a   : > { %v7548_v31 = vsub.f32 0.0, %v7541_v42  ;;  %v8887_v24 = vpop.f32.mrb[35].mxu1 }
 0x82c   : > { %v7549_v41 = vmul.f32 1.442695, %v7548_v31 }
 0x82e   : > { %9427 = vpow2.f32 %v7549_v41 }
 0x838   : > { %v9428_v21 = vpop.eup %9427 }
 0x839   : > { %v7551_v44 = vadd.f32 1.0, %v9428_v21 }
 0x83b   : > { %9429 = vrcp.f32 %v7551_v44 }
 0x845   : > { %v9430_v22 = vpop.eup %9429 }
 0x846   : > { %v7554_v16 = vsel %vm7553_vm15, %v9430_v22, %v7541_v42 }
 0x847   : > { %7555 = vst [vmem:[%s328_s18] sm:$0x1] %v7554_v16 }
 0x848 PF: > { %s19_s30 = sadd.s32 1, %s9438_s30  }
 0x849   : > { %p16_p4 = scmp.ge.s32.totalorder %s19_s30, 4  }
 0x84b   :  { %18 = sbr.rel (!%p16_p4) target bundleno = 1 (0x1), region = 102 }

</bundles_post_ra>
